<compile_context>
chip_gen: v7x
topology: tpu7x:2x2x1
jax: 0.10.0
libtpu: 0.0.40
codegen_flags: <defaults>
</compile_context>

<pallas_src>
import jax
import jax.numpy as jnp
from jax.experimental import pallas as pl
from jax.experimental.pallas import tpu as pltpu

EPS = 1e-5


# ----------------------------------------------------------------------------
# Generation-aware VMEM budget + row-tile selection helpers.
# ----------------------------------------------------------------------------
def _vmem_limit_bytes():
    cap = 64 * 1024 * 1024                 # conservative fallback (v7x physical)
    try:
        info = pltpu.get_tpu_info()
        cap = int(getattr(info, "vmem_capacity_bytes", cap) or cap)
    except Exception:
        pass
    return int(cap * 7 // 8)               # ~112 MiB v5e/v6e, ~56 MiB v7x


_VMEM_LIMIT = _vmem_limit_bytes()


def _pick_tile(extent, cap):
    """Largest divisor of `extent` that is <= cap, preferring multiples of 8."""
    cap = max(1, min(cap, extent))
    divs = [d for d in range(1, extent + 1) if extent % d == 0 and d <= cap]
    mult8 = [d for d in divs if d % 8 == 0]
    return max(mult8) if mult8 else max(divs)


# ----------------------------------------------------------------------------
# Kernel 1: ConvTranspose2d(k=2, s=2) + folded BN1 + ReLU.
# kernel == stride, so each coarse pixel owns a disjoint 2x2 output patch:
# ONE matmul per tile with a (Cin, 4*Cout) weight whose columns are
# (ki, kj, co)-ordered; the output block layout (TH, 2, W, 2*Cout) makes the
# pixel-shuffle a pure addressing trick (free reshape in the wrapper).
# ----------------------------------------------------------------------------
def upconv_bn_relu_kernel(u_ref, w_ref, b_ref, o_ref):
    # u_ref: (TH*W, Cin) bf16     w_ref: (Cin, 4*Cout) bf16 (BN1 scale folded)
    # b_ref: (1, 4*Cout) f32      o_ref: (TH, 2, W, 2*Cout) bf16
    th, _, w, c2 = o_ref.shape
    y = jnp.dot(u_ref[...], w_ref[...], preferred_element_type=jnp.float32)
    y = jnp.maximum(y + b_ref[...], 0.0).astype(o_ref.dtype)   # (TH*W, 4*Cout)
    o_ref[:, 0, :, :] = y[:, :c2].reshape(th, w, c2)            # ki = 0 rows
    o_ref[:, 1, :, :] = y[:, c2:].reshape(th, w, c2)            # ki = 1 rows


# ----------------------------------------------------------------------------
# Kernel 2: conv3x3 (pad=1) over concat([x, up]) + folded BN2 + ReLU.
# Row-tiled with a 1-row halo (top/bottom rows come in as tiny extra blocks).
# x and up are concatenated along the lane axis inside a single bf16 VMEM
# halo slab; 9 taps = 9 matmuls with K = Ccat, accumulated in f32 registers.
# ----------------------------------------------------------------------------
def conv3x3_bn_relu_kernel(xm_ref, xt_ref, xb_ref, um_ref, ut_ref, ub_ref,
                           w_ref, b_ref, o_ref, pad):
    # xm_ref: (1, TR, OW, Cx)   xt/xb_ref: (1, 1, OW, Cx)    bf16
    # um_ref: (1, TR, OW, Cup)  ut/ub_ref: (1, 1, OW, Cup)   bf16
    # w_ref : (9, Ccat, Cout) bf16 (BN2 scale folded)  b_ref: (1, Cout) f32
    # o_ref : (1, TR, OW, Cout) bf16
    # pad   : (TR+2, OW+16, Ccat) bf16 VMEM halo slab, interior at col 8.
    j = pl.program_id(1)
    nrow = pl.num_programs(1)
    tr, ow = xm_ref.shape[1], xm_ref.shape[2]
    ccat = pad.shape[2]
    cout = o_ref.shape[3]

    # Only the two 8-wide column bands the taps read (cols 7 and ow+8 live in
    # them) need to be zero; everything else is fully rewritten below, so the
    # full-scratch zeroing of the previous version is gone.
    pad[:, 0:8, :] = jnp.zeros((tr + 2, 8, ccat), pad.dtype)
    pad[:, 8 + ow:16 + ow, :] = jnp.zeros((tr + 2, 8, ccat), pad.dtype)

    # Interior rows: concat([x, up]) along channels happens here, in VMEM.
    pad[1:1 + tr, 8:8 + ow, :] = jnp.concatenate(
        [xm_ref[0], um_ref[0]], axis=-1)

    # Top / bottom 1-row halos (zero at the image boundary).
    @pl.when(j == 0)
    def _():
        pad[0:1, 8:8 + ow, :] = jnp.zeros((1, ow, ccat), pad.dtype)

    @pl.when(j > 0)
    def _():
        pad[0:1, 8:8 + ow, :] = jnp.concatenate(
            [xt_ref[0], ut_ref[0]], axis=-1)

    @pl.when(j == nrow - 1)
    def _():
        pad[tr + 1:tr + 2, 8:8 + ow, :] = jnp.zeros((1, ow, ccat), pad.dtype)

    @pl.when(j < nrow - 1)
    def _():
        pad[tr + 1:tr + 2, 8:8 + ow, :] = jnp.concatenate(
            [xb_ref[0], ub_ref[0]], axis=-1)

    # 9 taps: the column (dx) shift is hoisted into 3 shifted slabs, the row
    # (dy) shift is an aligned row slice of the flattened slab; everything is
    # accumulated into an f32 register value (no accumulator RMW passes).
    # TODO(synk): swap the odd-offset dx=0/2 slab slices for
    #             pltpu.roll(p, 1 - dx, axis=1) + an 8-aligned slice if the
    #             packed-bf16 repack shows up in the bundle profile.
    p = pad[...]
    acc = None
    for dx in range(3):
        slab = p[:, 7 + dx:7 + dx + ow, :].reshape((tr + 2) * ow, ccat)
        part = None
        for dy in range(3):
            t = dy * 3 + dx
            y = jnp.dot(slab[dy * ow: dy * ow + tr * ow], w_ref[t],
                        preferred_element_type=jnp.float32)
            part = y if part is None else part + y
        acc = part if acc is None else acc + part

    out = jnp.maximum(acc + b_ref[...], 0.0)
    o_ref[0] = out.reshape(tr, ow, cout).astype(o_ref.dtype)


# ----------------------------------------------------------------------------
# Wrapper: layout adaptation (NCHW <-> NHWC), BN folding, the two pallas_calls.
# ----------------------------------------------------------------------------
@jax.jit
def up_block_forward(u_nchw, x_nchw, params):
    n, cin, h, w = u_nchw.shape
    cout = params["upconv_w"].shape[1]        # planes
    cx = x_nchw.shape[1]
    oh, ow = 2 * h, 2 * w
    ccat = cx + cout
    budget = _VMEM_LIMIT

    # ---- stage 1: ConvTranspose2d(k=2, s=2) + BN1 (eval) + ReLU ------------
    s1 = params["bn1_gamma"] * jax.lax.rsqrt(params["bn1_var"] + EPS)
    b1 = params["bn1_beta"] + (params["upconv_b"] - params["bn1_mean"]) * s1
    # torch convT weight (Cin, Cout, ki, kj) -> (Cin, ki, kj, Cout), fold s1,
    # fuse ki into the matmul N dim: (Cin, 4*Cout), columns = (ki, kj, co).
    w1 = (jnp.transpose(params["upconv_w"], (0, 2, 3, 1)) * s1)
    w1 = w1.reshape(cin, 4 * cout).astype(jnp.bfloat16)
    b1t = jnp.tile(b1, 4)[None, :].astype(jnp.float32)

    # TODO(synk): keep the surrounding UNet NHWC end-to-end so these
    #             NCHW<->NHWC boundary transposes (full HBM passes) disappear.
    u_flat = (jnp.transpose(u_nchw, (0, 2, 3, 1))
              .reshape(n * h * w, cin).astype(jnp.bfloat16))

    # Row tile for kernel 1 (no halo): biggest divisor of H that fits the VMEM
    # budget, capped at H/2 so the pipeline / megacore always see >= 2 steps.
    per_row1 = w * (4 * cin + 24 * cout + 16 * cout)      # bytes/row, generous
    th = _pick_tile(h, min(max(1, h // 2), (budget // 2) // max(per_row1, 1)))
    rb1 = h // th

    up4 = pl.pallas_call(
        upconv_bn_relu_kernel,
        out_shape=jax.ShapeDtypeStruct((n * h, 2, w, 2 * cout), jnp.bfloat16),
        grid=(n, rb1),
        in_specs=[
            pl.BlockSpec((th * w, cin), lambda i, r: (i * rb1 + r, 0)),
            pl.BlockSpec((cin, 4 * cout), lambda i, r: (0, 0)),
            pl.BlockSpec((1, 4 * cout), lambda i, r: (0, 0)),
        ],
        out_specs=pl.BlockSpec((th, 2, w, 2 * cout),
                               lambda i, r: (i * rb1 + r, 0, 0, 0)),
        compiler_params=pltpu.CompilerParams(
            dimension_semantics=("parallel", "parallel"),
            vmem_limit_bytes=budget),
    )(u_flat, w1, b1t)

    # (N*H, 2, W, 2*Cout) -> (N, 2H, 2W, Cout): contiguous (free) reshape.
    up_nhwc = up4.reshape(n, oh, ow, cout)

    # ---- stage 2: conv3x3(pad=1) on concat([x, up]) + BN2 (eval) + ReLU ----
    s2 = params["bn2_gamma"] * jax.lax.rsqrt(params["bn2_var"] + EPS)
    b2 = (params["bn2_beta"] - params["bn2_mean"] * s2)[None, :].astype(jnp.float32)
    # torch conv weight (Cout, Ccat, 3, 3) -> (3, 3, Ccat, Cout) -> (9, Ccat, Cout),
    # BN2 scale folded; channel order matches torch.cat([x, up], dim=1).
    w2 = (jnp.transpose(params["conv1_w"], (2, 3, 1, 0)) * s2)
    w2 = w2.reshape(9, ccat, cout).astype(jnp.bfloat16)

    x_nhwc = jnp.transpose(x_nchw, (0, 2, 3, 1)).astype(jnp.bfloat16)

    # Row tile for kernel 2: sized from the VMEM budget (halo slab + double
    # buffered in/out blocks + f32 accumulation headroom), capped at OH/2.
    per_row2 = ow * (2 * ccat          # bf16 halo slab
                     + 4 * ccat        # double-buffered bf16 inputs
                     + 4 * cout        # double-buffered bf16 output
                     + 6 * ccat        # 3 shifted bf16 slabs
                     + 16 * cout)      # f32 accumulation headroom
    tr = _pick_tile(oh, min(max(1, oh // 2), (budget // 2) // max(per_row2, 1)))
    rb2 = oh // tr

    out_nhwc = pl.pallas_call(
        conv3x3_bn_relu_kernel,
        out_shape=jax.ShapeDtypeStruct((n, oh, ow, cout), jnp.bfloat16),
        grid=(n, rb2),
        in_specs=[
            # main row tile + 1-row top/bottom halo blocks, for x and for up.
            pl.BlockSpec((1, tr, ow, cx), lambda i, j: (i, j, 0, 0)),
            pl.BlockSpec((1, 1, ow, cx),
                         lambda i, j: (i, jnp.maximum(j * tr - 1, 0), 0, 0)),
            pl.BlockSpec((1, 1, ow, cx),
                         lambda i, j: (i, jnp.minimum((j + 1) * tr, oh - 1), 0, 0)),
            pl.BlockSpec((1, tr, ow, cout), lambda i, j: (i, j, 0, 0)),
            pl.BlockSpec((1, 1, ow, cout),
                         lambda i, j: (i, jnp.maximum(j * tr - 1, 0), 0, 0)),
            pl.BlockSpec((1, 1, ow, cout),
                         lambda i, j: (i, jnp.minimum((j + 1) * tr, oh - 1), 0, 0)),
            pl.BlockSpec((9, ccat, cout), lambda i, j: (0, 0, 0)),
            pl.BlockSpec((1, cout), lambda i, j: (0, 0)),
        ],
        out_specs=pl.BlockSpec((1, tr, ow, cout), lambda i, j: (i, j, 0, 0)),
        scratch_shapes=[pltpu.VMEM((tr + 2, ow + 16, ccat), jnp.bfloat16)],
        compiler_params=pltpu.CompilerParams(
            dimension_semantics=("parallel", "parallel"),
            vmem_limit_bytes=budget),
    )(x_nhwc, x_nhwc, x_nhwc, up_nhwc, up_nhwc, up_nhwc, w2, b2)

    # NCHW interface of the original module; final cast from bf16 to f32.
    return jnp.transpose(out_nhwc, (0, 3, 1, 2)).astype(jnp.float32)


# ----------------------------------------------------------------------------
# Pure-JAX f32 reference (same math, no Pallas) for validation.
# ----------------------------------------------------------------------------
def reference_forward(u_nchw, x_nchw, params):
    # ConvTranspose2d k=2 s=2: out[n,co,2i+ki,2j+kj] = sum_ci u[n,ci,i,j]*W[ci,co,ki,kj]+b
    up = jnp.einsum("ncij,cokl->noikjl", u_nchw, params["upconv_w"])
    n, co, h, _, w, _ = up.shape
    up = up.reshape(n, co, 2 * h, 2 * w) + params["upconv_b"][None, :, None, None]
    s1 = params["bn1_gamma"] / jnp.sqrt(params["bn1_var"] + EPS)
    up = (up - params["bn1_mean"][None, :, None, None]) * s1[None, :, None, None] \
         + params["bn1_beta"][None, :, None, None]
    up = jnp.maximum(up, 0.0)

    cat = jnp.concatenate([x_nchw, up], axis=1)
    conv = jax.lax.conv_general_dilated(
        cat, params["conv1_w"], window_strides=(1, 1),
        padding=((1, 1), (1, 1)),
        dimension_numbers=("NCHW", "OIHW", "NCHW"))
    s2 = params["bn2_gamma"] / jnp.sqrt(params["bn2_var"] + EPS)
    out = (conv - params["bn2_mean"][None, :, None, None]) * s2[None, :, None, None] \
          + params["bn2_beta"][None, :, None, None]
    return jnp.maximum(out, 0.0)


# ----------------------------------------------------------------------------
# Deterministic parameter init + driver
# ----------------------------------------------------------------------------
def make_params(key, inplanes, planes):
    ks = jax.random.split(key, 12)
    return {
        "upconv_w": 0.1 * jax.random.normal(ks[0], (inplanes, planes, 2, 2), jnp.float32),
        "upconv_b": 0.1 * jax.random.normal(ks[1], (planes,), jnp.float32),
        "bn1_gamma": jax.random.uniform(ks[2], (planes,), jnp.float32, 0.5, 1.5),
        "bn1_beta": 0.1 * jax.random.normal(ks[3], (planes,), jnp.float32),
        "bn1_mean": 0.1 * jax.random.normal(ks[4], (planes,), jnp.float32),
        "bn1_var": jax.random.uniform(ks[5], (planes,), jnp.float32, 0.5, 1.5),
        "conv1_w": 0.1 * jax.random.normal(ks[6], (planes, inplanes, 3, 3), jnp.float32),
        "bn2_gamma": jax.random.uniform(ks[7], (planes,), jnp.float32, 0.5, 1.5),
        "bn2_beta": 0.1 * jax.random.normal(ks[8], (planes,), jnp.float32),
        "bn2_mean": 0.1 * jax.random.normal(ks[9], (planes,), jnp.float32),
        "bn2_var": jax.random.uniform(ks[10], (planes,), jnp.float32, 0.5, 1.5),
    }


if __name__ == "__main__":
    key = jax.random.PRNGKey(0)
    k_u, k_x, k_p = jax.random.split(key, 3)

    # UpBlock(inplanes=8, planes=4): conv1 consumes `inplanes` channels, so the
    # skip connection x carries inplanes - planes channels.
    N, INPLANES, PLANES, H, W = 2, 8, 4, 16, 16
    u = jax.random.normal(k_u, (N, INPLANES, H, W), jnp.float32)
    x = jax.random.normal(k_x, (N, INPLANES - PLANES, 2 * H, 2 * W), jnp.float32)
    params = make_params(k_p, INPLANES, PLANES)

    out = jax.block_until_ready(up_block_forward(u, x, params))
    ref = reference_forward(u, x, params)

    assert out.shape == (N, PLANES, 2 * H, 2 * W), out.shape
    max_err = float(jnp.max(jnp.abs(out - ref)))
    # bf16 activations/weights/output with f32 accumulation -> relaxed tolerance.
    assert jnp.allclose(out, ref, rtol=5e-2, atol=5e-2), max_err

    print("KERNEL_OK")
</pallas_src>

<mosaic_0001>
module attributes {stable_mosaic.version = 11 : i64} {
  func.func @upconv_bn_relu_kernel(%arg0: i32, %arg1: i32, %arg2: memref<128x8xbf16, #tpu.memory_space<vmem>>, %arg3: memref<8x16xbf16, #tpu.memory_space<vmem>>, %arg4: memref<1x16xf32, #tpu.memory_space<vmem>>, %arg5: memref<8x2x16x8xbf16, #tpu.memory_space<vmem>>) attributes {dimension_semantics = [#tpu.dimension_semantics<parallel>, #tpu.dimension_semantics<parallel>], iteration_bounds = array<i64: 2, 2>, scalar_prefetch = 0 : i64, scratch_operands = 0 : i64, tpu.core_type = #tpu.core_type<tc>, window_params = [{transform_indices = @transform_0, window_bounds = array<i64: 128, 8>}, {pipeline_mode = #tpu.pipeline_mode<synchronous>, transform_indices = @transform_1, window_bounds = array<i64: 8, 16>}, {pipeline_mode = #tpu.pipeline_mode<synchronous>, transform_indices = @transform_2, window_bounds = array<i64: 1, 16>}, {transform_indices = @transform_3, window_bounds = array<i64: 8, 2, 16, 8>}]} {
    %c0 = arith.constant 0 : index
    %c0_0 = arith.constant 0 : index
    %0 = vector.load %arg2[%c0, %c0_0] : memref<128x8xbf16, #tpu.memory_space<vmem>>, vector<128x8xbf16>
    %c0_1 = arith.constant 0 : index
    %c0_2 = arith.constant 0 : index
    %1 = vector.load %arg3[%c0_1, %c0_2] : memref<8x16xbf16, #tpu.memory_space<vmem>>, vector<8x16xbf16>
    %cst = arith.constant dense<0.000000e+00> : vector<128x16xf32>
    %2 = tpu.matmul %0, %1, %cst {dimension_numbers = #tpu.dot_dimension_numbers<[1], [0], [0], [1], [0, 0, 1, 1], [], []>} : vector<128x8xbf16>, vector<8x16xbf16>, vector<128x16xf32> -> vector<128x16xf32>
    %c0_3 = arith.constant 0 : index
    %c0_4 = arith.constant 0 : index
    %3 = vector.load %arg4[%c0_3, %c0_4] : memref<1x16xf32, #tpu.memory_space<vmem>>, vector<1x16xf32>
    %4 = vector.broadcast %3 : vector<1x16xf32> to vector<128x16xf32>
    %5 = arith.addf %2, %4 : vector<128x16xf32>
    %cst_5 = arith.constant 0.000000e+00 : f32
    %6 = vector.broadcast %cst_5 : f32 to vector<128x16xf32>
    %7 = arith.maximumf %5, %6 : vector<128x16xf32>
    %8 = arith.truncf %7 : vector<128x16xf32> to vector<128x16xbf16>
    %9 = vector.extract_strided_slice %8 {offsets = [0, 0], sizes = [128, 8], strides = [1, 1]} : vector<128x16xbf16> to vector<128x8xbf16>
    %10 = vector.shape_cast %9 : vector<128x8xbf16> to vector<8x16x8xbf16>
    %c0_6 = arith.constant 0 : index
    %c0_7 = arith.constant 0 : index
    %c0_8 = arith.constant 0 : index
    %c0_9 = arith.constant 0 : index
    %11 = vector.load %arg5[%c0_6, %c0_7, %c0_8, %c0_9] : memref<8x2x16x8xbf16, #tpu.memory_space<vmem>>, vector<8x1x16x8xbf16>
    %12 = vector.shape_cast %11 : vector<8x1x16x8xbf16> to vector<8x16x8xbf16>
    %13 = vector.shape_cast %10 : vector<8x16x8xbf16> to vector<8x1x16x8xbf16>
    tpu.vector_store %arg5[%c0_6, %c0_7, %c0_8, %c0_9], %13 {strides = array<i32>} : memref<8x2x16x8xbf16, #tpu.memory_space<vmem>>, vector<8x1x16x8xbf16>,
    %14 = vector.extract_strided_slice %8 {offsets = [0, 8], sizes = [128, 8], strides = [1, 1]} : vector<128x16xbf16> to vector<128x8xbf16>
    %15 = vector.shape_cast %14 : vector<128x8xbf16> to vector<8x16x8xbf16>
    %c0_10 = arith.constant 0 : index
    %c1 = arith.constant 1 : index
    %c0_11 = arith.constant 0 : index
    %c0_12 = arith.constant 0 : index
    %16 = vector.load %arg5[%c0_10, %c1, %c0_11, %c0_12] : memref<8x2x16x8xbf16, #tpu.memory_space<vmem>>, vector<8x1x16x8xbf16>
    %17 = vector.shape_cast %16 : vector<8x1x16x8xbf16> to vector<8x16x8xbf16>
    %18 = vector.shape_cast %15 : vector<8x16x8xbf16> to vector<8x1x16x8xbf16>
    tpu.vector_store %arg5[%c0_10, %c1, %c0_11, %c0_12], %18 {strides = array<i32>} : memref<8x2x16x8xbf16, #tpu.memory_space<vmem>>, vector<8x1x16x8xbf16>,
    return
  }
  func.func @transform_0(%arg0: i32, %arg1: i32) -> (i32, i32) {
    %c2_i32 = arith.constant 2 : i32
    %0 = arith.muli %arg0, %c2_i32 : i32
    %1 = arith.addi %0, %arg1 : i32
    %c0_i32 = arith.constant 0 : i32
    %c0_i32_0 = arith.constant 0 : i32
    return %1, %c0_i32 : i32, i32
  }
  func.func @transform_1(%arg0: i32, %arg1: i32) -> (i32, i32) {
    %c0_i32 = arith.constant 0 : i32
    %c0_i32_0 = arith.constant 0 : i32
    %c0_i32_1 = arith.constant 0 : i32
    return %c0_i32, %c0_i32_0 : i32, i32
  }
  func.func @transform_2(%arg0: i32, %arg1: i32) -> (i32, i32) {
    %c0_i32 = arith.constant 0 : i32
    %c0_i32_0 = arith.constant 0 : i32
    %c0_i32_1 = arith.constant 0 : i32
    return %c0_i32, %c0_i32_0 : i32, i32
  }
  func.func @transform_3(%arg0: i32, %arg1: i32) -> (i32, i32, i32, i32) {
    %c2_i32 = arith.constant 2 : i32
    %0 = arith.muli %arg0, %c2_i32 : i32
    %1 = arith.addi %0, %arg1 : i32
    %c0_i32 = arith.constant 0 : i32
    %c0_i32_0 = arith.constant 0 : i32
    %c0_i32_1 = arith.constant 0 : i32
    %c0_i32_2 = arith.constant 0 : i32
    return %1, %c0_i32, %c0_i32_0, %c0_i32_1 : i32, i32, i32, i32
  }
}

module attributes {stable_mosaic.version = 11 : i64} {
  func.func @conv3x3_bn_relu_kernel(%arg0: i32, %arg1: i32, %arg2: memref<1x16x32x4xbf16, #tpu.memory_space<vmem>>, %arg3: memref<1x1x32x4xbf16, #tpu.memory_space<vmem>>, %arg4: memref<1x1x32x4xbf16, #tpu.memory_space<vmem>>, %arg5: memref<1x16x32x4xbf16, #tpu.memory_space<vmem>>, %arg6: memref<1x1x32x4xbf16, #tpu.memory_space<vmem>>, %arg7: memref<1x1x32x4xbf16, #tpu.memory_space<vmem>>, %arg8: memref<9x8x4xbf16, #tpu.memory_space<vmem>>, %arg9: memref<1x4xf32, #tpu.memory_space<vmem>>, %arg10: memref<1x16x32x4xbf16, #tpu.memory_space<vmem>>, %arg11: memref<18x48x8xbf16, #tpu.memory_space<vmem>>) attributes {dimension_semantics = [#tpu.dimension_semantics<parallel>, #tpu.dimension_semantics<parallel>], iteration_bounds = array<i64: 2, 2>, scalar_prefetch = 0 : i64, scratch_operands = 1 : i64, tpu.core_type = #tpu.core_type<tc>, window_params = [{transform_indices = @transform_0, window_bounds = array<i64: 1, 16, 32, 4>}, {transform_indices = @transform_1, window_bounds = array<i64: 1, 1, 32, 4>}, {transform_indices = @transform_2, window_bounds = array<i64: 1, 1, 32, 4>}, {transform_indices = @transform_3, window_bounds = array<i64: 1, 16, 32, 4>}, {transform_indices = @transform_4, window_bounds = array<i64: 1, 1, 32, 4>}, {transform_indices = @transform_5, window_bounds = array<i64: 1, 1, 32, 4>}, {pipeline_mode = #tpu.pipeline_mode<synchronous>, transform_indices = @transform_6, window_bounds = array<i64: 9, 8, 4>}, {pipeline_mode = #tpu.pipeline_mode<synchronous>, transform_indices = @transform_7, window_bounds = array<i64: 1, 4>}, {transform_indices = @transform_8, window_bounds = array<i64: 1, 16, 32, 4>}]} {
    %cst = arith.constant 0.000000e+00 : bf16
    %0 = vector.broadcast %cst : bf16 to vector<18x8x8xbf16>
    %c0 = arith.constant 0 : index
    %c0_0 = arith.constant 0 : index
    %c0_1 = arith.constant 0 : index
    %1 = vector.load %arg11[%c0, %c0_0, %c0_1] : memref<18x48x8xbf16, #tpu.memory_space<vmem>>, vector<18x8x8xbf16>
    tpu.vector_store %arg11[%c0, %c0_0, %c0_1], %0 {strides = array<i32>} : memref<18x48x8xbf16, #tpu.memory_space<vmem>>, vector<18x8x8xbf16>,
    %cst_2 = arith.constant 0.000000e+00 : bf16
    %2 = vector.broadcast %cst_2 : bf16 to vector<18x8x8xbf16>
    %c0_3 = arith.constant 0 : index
    %c40 = arith.constant 40 : index
    %c0_4 = arith.constant 0 : index
    %3 = vector.load %arg11[%c0_3, %c40, %c0_4] : memref<18x48x8xbf16, #tpu.memory_space<vmem>>, vector<18x8x8xbf16>
    tpu.vector_store %arg11[%c0_3, %c40, %c0_4], %2 {strides = array<i32>} : memref<18x48x8xbf16, #tpu.memory_space<vmem>>, vector<18x8x8xbf16>,
    %c0_5 = arith.constant 0 : index
    %c0_6 = arith.constant 0 : index
    %c0_7 = arith.constant 0 : index
    %c0_8 = arith.constant 0 : index
    %4 = vector.load %arg2[%c0_5, %c0_6, %c0_7, %c0_8] : memref<1x16x32x4xbf16, #tpu.memory_space<vmem>>, vector<1x16x32x4xbf16>
    %5 = vector.shape_cast %4 : vector<1x16x32x4xbf16> to vector<16x32x4xbf16>
    %c0_9 = arith.constant 0 : index
    %c0_10 = arith.constant 0 : index
    %c0_11 = arith.constant 0 : index
    %c0_12 = arith.constant 0 : index
    %6 = vector.load %arg5[%c0_9, %c0_10, %c0_11, %c0_12] : memref<1x16x32x4xbf16, #tpu.memory_space<vmem>>, vector<1x16x32x4xbf16>
    %7 = vector.shape_cast %6 : vector<1x16x32x4xbf16> to vector<16x32x4xbf16>
    %8 = tpu.concatenate %5, %7 in 2 : vector<16x32x4xbf16>, vector<16x32x4xbf16> -> vector<16x32x8xbf16>
    %c1 = arith.constant 1 : index
    %c8 = arith.constant 8 : index
    %c0_13 = arith.constant 0 : index
    %9 = vector.load %arg11[%c1, %c8, %c0_13] : memref<18x48x8xbf16, #tpu.memory_space<vmem>>, vector<16x32x8xbf16>
    tpu.vector_store %arg11[%c1, %c8, %c0_13], %8 {strides = array<i32>} : memref<18x48x8xbf16, #tpu.memory_space<vmem>>, vector<16x32x8xbf16>,
    %c0_i32 = arith.constant 0 : i32
    %10 = arith.cmpi eq, %arg1, %c0_i32 : i32
    %11 = arith.extui %10 : i1 to i32
    %c0_i32_14 = arith.constant 0 : i32
    %12 = arith.cmpi ne, %11, %c0_i32_14 : i32
    scf.if %12 {
      %cst_60 = arith.constant 0.000000e+00 : bf16
      %83 = vector.broadcast %cst_60 : bf16 to vector<1x32x8xbf16>
      %c0_61 = arith.constant 0 : index
      %c8_62 = arith.constant 8 : index
      %c0_63 = arith.constant 0 : index
      %84 = vector.load %arg11[%c0_61, %c8_62, %c0_63] : memref<18x48x8xbf16, #tpu.memory_space<vmem>>, vector<1x32x8xbf16>
      tpu.vector_store %arg11[%c0_61, %c8_62, %c0_63], %83 {strides = array<i32>} : memref<18x48x8xbf16, #tpu.memory_space<vmem>>, vector<1x32x8xbf16>,
    } else {
    }
    %c0_i32_15 = arith.constant 0 : i32
    %13 = arith.cmpi sgt, %arg1, %c0_i32_15 : i32
    %14 = arith.extui %13 : i1 to i32
    %c0_i32_16 = arith.constant 0 : i32
    %15 = arith.cmpi ne, %14, %c0_i32_16 : i32
    scf.if %15 {
      %c0_60 = arith.constant 0 : index
      %c0_61 = arith.constant 0 : index
      %c0_62 = arith.constant 0 : index
      %c0_63 = arith.constant 0 : index
      %83 = vector.load %arg3[%c0_60, %c0_61, %c0_62, %c0_63] : memref<1x1x32x4xbf16, #tpu.memory_space<vmem>>, vector<1x1x32x4xbf16>
      %84 = vector.shape_cast %83 : vector<1x1x32x4xbf16> to vector<1x32x4xbf16>
      %c0_64 = arith.constant 0 : index
      %c0_65 = arith.constant 0 : index
      %c0_66 = arith.constant 0 : index
      %c0_67 = arith.constant 0 : index
      %85 = vector.load %arg6[%c0_64, %c0_65, %c0_66, %c0_67] : memref<1x1x32x4xbf16, #tpu.memory_space<vmem>>, vector<1x1x32x4xbf16>
      %86 = vector.shape_cast %85 : vector<1x1x32x4xbf16> to vector<1x32x4xbf16>
      %87 = tpu.concatenate %84, %86 in 2 : vector<1x32x4xbf16>, vector<1x32x4xbf16> -> vector<1x32x8xbf16>
      %c0_68 = arith.constant 0 : index
      %c8_69 = arith.constant 8 : index
      %c0_70 = arith.constant 0 : index
      %88 = vector.load %arg11[%c0_68, %c8_69, %c0_70] : memref<18x48x8xbf16, #tpu.memory_space<vmem>>, vector<1x32x8xbf16>
      tpu.vector_store %arg11[%c0_68, %c8_69, %c0_70], %87 {strides = array<i32>} : memref<18x48x8xbf16, #tpu.memory_space<vmem>>, vector<1x32x8xbf16>,
    } else {
    }
    %c1_i32 = arith.constant 1 : i32
    %16 = arith.cmpi eq, %arg1, %c1_i32 : i32
    %17 = arith.extui %16 : i1 to i32
    %c0_i32_17 = arith.constant 0 : i32
    %18 = arith.cmpi ne, %17, %c0_i32_17 : i32
    scf.if %18 {
      %cst_60 = arith.constant 0.000000e+00 : bf16
      %83 = vector.broadcast %cst_60 : bf16 to vector<1x32x8xbf16>
      %c17 = arith.constant 17 : index
      %c8_61 = arith.constant 8 : index
      %c0_62 = arith.constant 0 : index
      %84 = vector.load %arg11[%c17, %c8_61, %c0_62] : memref<18x48x8xbf16, #tpu.memory_space<vmem>>, vector<1x32x8xbf16>
      tpu.vector_store %arg11[%c17, %c8_61, %c0_62], %83 {strides = array<i32>} : memref<18x48x8xbf16, #tpu.memory_space<vmem>>, vector<1x32x8xbf16>,
    } else {
    }
    %c1_i32_18 = arith.constant 1 : i32
    %19 = arith.cmpi slt, %arg1, %c1_i32_18 : i32
    %20 = arith.extui %19 : i1 to i32
    %c0_i32_19 = arith.constant 0 : i32
    %21 = arith.cmpi ne, %20, %c0_i32_19 : i32
    scf.if %21 {
      %c0_60 = arith.constant 0 : index
      %c0_61 = arith.constant 0 : index
      %c0_62 = arith.constant 0 : index
      %c0_63 = arith.constant 0 : index
      %83 = vector.load %arg4[%c0_60, %c0_61, %c0_62, %c0_63] : memref<1x1x32x4xbf16, #tpu.memory_space<vmem>>, vector<1x1x32x4xbf16>
      %84 = vector.shape_cast %83 : vector<1x1x32x4xbf16> to vector<1x32x4xbf16>
      %c0_64 = arith.constant 0 : index
      %c0_65 = arith.constant 0 : index
      %c0_66 = arith.constant 0 : index
      %c0_67 = arith.constant 0 : index
      %85 = vector.load %arg7[%c0_64, %c0_65, %c0_66, %c0_67] : memref<1x1x32x4xbf16, #tpu.memory_space<vmem>>, vector<1x1x32x4xbf16>
      %86 = vector.shape_cast %85 : vector<1x1x32x4xbf16> to vector<1x32x4xbf16>
      %87 = tpu.concatenate %84, %86 in 2 : vector<1x32x4xbf16>, vector<1x32x4xbf16> -> vector<1x32x8xbf16>
      %c17 = arith.constant 17 : index
      %c8_68 = arith.constant 8 : index
      %c0_69 = arith.constant 0 : index
      %88 = vector.load %arg11[%c17, %c8_68, %c0_69] : memref<18x48x8xbf16, #tpu.memory_space<vmem>>, vector<1x32x8xbf16>
      tpu.vector_store %arg11[%c17, %c8_68, %c0_69], %87 {strides = array<i32>} : memref<18x48x8xbf16, #tpu.memory_space<vmem>>, vector<1x32x8xbf16>,
    } else {
    }
    %c0_20 = arith.constant 0 : index
    %c0_21 = arith.constant 0 : index
    %c0_22 = arith.constant 0 : index
    %22 = vector.load %arg11[%c0_20, %c0_21, %c0_22] : memref<18x48x8xbf16, #tpu.memory_space<vmem>>, vector<18x48x8xbf16>
    %23 = vector.extract_strided_slice %22 {offsets = [0, 7, 0], sizes = [18, 32, 8], strides = [1, 1, 1]} : vector<18x48x8xbf16> to vector<18x32x8xbf16>
    %24 = vector.shape_cast %23 : vector<18x32x8xbf16> to vector<576x8xbf16>
    %25 = vector.extract_strided_slice %24 {offsets = [0, 0], sizes = [512, 8], strides = [1, 1]} : vector<576x8xbf16> to vector<512x8xbf16>
    %c0_23 = arith.constant 0 : index
    %c0_24 = arith.constant 0 : index
    %c0_25 = arith.constant 0 : index
    %26 = vector.load %arg8[%c0_23, %c0_24, %c0_25] : memref<9x8x4xbf16, #tpu.memory_space<vmem>>, vector<1x8x4xbf16>
    %27 = vector.shape_cast %26 : vector<1x8x4xbf16> to vector<8x4xbf16>
    %cst_26 = arith.constant dense<0.000000e+00> : vector<512x4xf32>
    %28 = tpu.matmul %25, %27, %cst_26 {dimension_numbers = #tpu.dot_dimension_numbers<[1], [0], [0], [1], [0, 0, 1, 1], [], []>} : vector<512x8xbf16>, vector<8x4xbf16>, vector<512x4xf32> -> vector<512x4xf32>
    %29 = vector.extract_strided_slice %24 {offsets = [32, 0], sizes = [512, 8], strides = [1, 1]} : vector<576x8xbf16> to vector<512x8xbf16>
    %c3 = arith.constant 3 : index
    %c0_27 = arith.constant 0 : index
    %c0_28 = arith.constant 0 : index
    %30 = vector.load %arg8[%c3, %c0_27, %c0_28] : memref<9x8x4xbf16, #tpu.memory_space<vmem>>, vector<1x8x4xbf16>
    %31 = vector.shape_cast %30 : vector<1x8x4xbf16> to vector<8x4xbf16>
    %cst_29 = arith.constant dense<0.000000e+00> : vector<512x4xf32>
    %32 = tpu.matmul %29, %31, %cst_29 {dimension_numbers = #tpu.dot_dimension_numbers<[1], [0], [0], [1], [0, 0, 1, 1], [], []>} : vector<512x8xbf16>, vector<8x4xbf16>, vector<512x4xf32> -> vector<512x4xf32>
    %33 = arith.addf %28, %32 : vector<512x4xf32>
    %34 = vector.extract_strided_slice %24 {offsets = [64, 0], sizes = [512, 8], strides = [1, 1]} : vector<576x8xbf16> to vector<512x8xbf16>
    %c6 = arith.constant 6 : index
    %c0_30 = arith.constant 0 : index
    %c0_31 = arith.constant 0 : index
    %35 = vector.load %arg8[%c6, %c0_30, %c0_31] : memref<9x8x4xbf16, #tpu.memory_space<vmem>>, vector<1x8x4xbf16>
    %36 = vector.shape_cast %35 : vector<1x8x4xbf16> to vector<8x4xbf16>
    %cst_32 = arith.constant dense<0.000000e+00> : vector<512x4xf32>
    %37 = tpu.matmul %34, %36, %cst_32 {dimension_numbers = #tpu.dot_dimension_numbers<[1], [0], [0], [1], [0, 0, 1, 1], [], []>} : vector<512x8xbf16>, vector<8x4xbf16>, vector<512x4xf32> -> vector<512x4xf32>
    %38 = arith.addf %33, %37 : vector<512x4xf32>
    %39 = vector.extract_strided_slice %22 {offsets = [0, 8, 0], sizes = [18, 32, 8], strides = [1, 1, 1]} : vector<18x48x8xbf16> to vector<18x32x8xbf16>
    %40 = vector.shape_cast %39 : vector<18x32x8xbf16> to vector<576x8xbf16>
    %41 = vector.extract_strided_slice %40 {offsets = [0, 0], sizes = [512, 8], strides = [1, 1]} : vector<576x8xbf16> to vector<512x8xbf16>
    %c1_33 = arith.constant 1 : index
    %c0_34 = arith.constant 0 : index
    %c0_35 = arith.constant 0 : index
    %42 = vector.load %arg8[%c1_33, %c0_34, %c0_35] : memref<9x8x4xbf16, #tpu.memory_space<vmem>>, vector<1x8x4xbf16>
    %43 = vector.shape_cast %42 : vector<1x8x4xbf16> to vector<8x4xbf16>
    %cst_36 = arith.constant dense<0.000000e+00> : vector<512x4xf32>
    %44 = tpu.matmul %41, %43, %cst_36 {dimension_numbers = #tpu.dot_dimension_numbers<[1], [0], [0], [1], [0, 0, 1, 1], [], []>} : vector<512x8xbf16>, vector<8x4xbf16>, vector<512x4xf32> -> vector<512x4xf32>
    %45 = vector.extract_strided_slice %40 {offsets = [32, 0], sizes = [512, 8], strides = [1, 1]} : vector<576x8xbf16> to vector<512x8xbf16>
    %c4 = arith.constant 4 : index
    %c0_37 = arith.constant 0 : index
    %c0_38 = arith.constant 0 : index
    %46 = vector.load %arg8[%c4, %c0_37, %c0_38] : memref<9x8x4xbf16, #tpu.memory_space<vmem>>, vector<1x8x4xbf16>
    %47 = vector.shape_cast %46 : vector<1x8x4xbf16> to vector<8x4xbf16>
    %cst_39 = arith.constant dense<0.000000e+00> : vector<512x4xf32>
    %48 = tpu.matmul %45, %47, %cst_39 {dimension_numbers = #tpu.dot_dimension_numbers<[1], [0], [0], [1], [0, 0, 1, 1], [], []>} : vector<512x8xbf16>, vector<8x4xbf16>, vector<512x4xf32> -> vector<512x4xf32>
    %49 = arith.addf %44, %48 : vector<512x4xf32>
    %50 = vector.extract_strided_slice %40 {offsets = [64, 0], sizes = [512, 8], strides = [1, 1]} : vector<576x8xbf16> to vector<512x8xbf16>
    %c7 = arith.constant 7 : index
    %c0_40 = arith.constant 0 : index
    %c0_41 = arith.constant 0 : index
    %51 = vector.load %arg8[%c7, %c0_40, %c0_41] : memref<9x8x4xbf16, #tpu.memory_space<vmem>>, vector<1x8x4xbf16>
    %52 = vector.shape_cast %51 : vector<1x8x4xbf16> to vector<8x4xbf16>
    %cst_42 = arith.constant dense<0.000000e+00> : vector<512x4xf32>
    %53 = tpu.matmul %50, %52, %cst_42 {dimension_numbers = #tpu.dot_dimension_numbers<[1], [0], [0], [1], [0, 0, 1, 1], [], []>} : vector<512x8xbf16>, vector<8x4xbf16>, vector<512x4xf32> -> vector<512x4xf32>
    %54 = arith.addf %49, %53 : vector<512x4xf32>
    %55 = arith.addf %38, %54 : vector<512x4xf32>
    %56 = vector.extract_strided_slice %22 {offsets = [0, 9, 0], sizes = [18, 32, 8], strides = [1, 1, 1]} : vector<18x48x8xbf16> to vector<18x32x8xbf16>
    %57 = vector.shape_cast %56 : vector<18x32x8xbf16> to vector<576x8xbf16>
    %58 = vector.extract_strided_slice %57 {offsets = [0, 0], sizes = [512, 8], strides = [1, 1]} : vector<576x8xbf16> to vector<512x8xbf16>
    %c2 = arith.constant 2 : index
    %c0_43 = arith.constant 0 : index
    %c0_44 = arith.constant 0 : index
    %59 = vector.load %arg8[%c2, %c0_43, %c0_44] : memref<9x8x4xbf16, #tpu.memory_space<vmem>>, vector<1x8x4xbf16>
    %60 = vector.shape_cast %59 : vector<1x8x4xbf16> to vector<8x4xbf16>
    %cst_45 = arith.constant dense<0.000000e+00> : vector<512x4xf32>
    %61 = tpu.matmul %58, %60, %cst_45 {dimension_numbers = #tpu.dot_dimension_numbers<[1], [0], [0], [1], [0, 0, 1, 1], [], []>} : vector<512x8xbf16>, vector<8x4xbf16>, vector<512x4xf32> -> vector<512x4xf32>
    %62 = vector.extract_strided_slice %57 {offsets = [32, 0], sizes = [512, 8], strides = [1, 1]} : vector<576x8xbf16> to vector<512x8xbf16>
    %c5 = arith.constant 5 : index
    %c0_46 = arith.constant 0 : index
    %c0_47 = arith.constant 0 : index
    %63 = vector.load %arg8[%c5, %c0_46, %c0_47] : memref<9x8x4xbf16, #tpu.memory_space<vmem>>, vector<1x8x4xbf16>
    %64 = vector.shape_cast %63 : vector<1x8x4xbf16> to vector<8x4xbf16>
    %cst_48 = arith.constant dense<0.000000e+00> : vector<512x4xf32>
    %65 = tpu.matmul %62, %64, %cst_48 {dimension_numbers = #tpu.dot_dimension_numbers<[1], [0], [0], [1], [0, 0, 1, 1], [], []>} : vector<512x8xbf16>, vector<8x4xbf16>, vector<512x4xf32> -> vector<512x4xf32>
    %66 = arith.addf %61, %65 : vector<512x4xf32>
    %67 = vector.extract_strided_slice %57 {offsets = [64, 0], sizes = [512, 8], strides = [1, 1]} : vector<576x8xbf16> to vector<512x8xbf16>
    %c8_49 = arith.constant 8 : index
    %c0_50 = arith.constant 0 : index
    %c0_51 = arith.constant 0 : index
    %68 = vector.load %arg8[%c8_49, %c0_50, %c0_51] : memref<9x8x4xbf16, #tpu.memory_space<vmem>>, vector<1x8x4xbf16>
    %69 = vector.shape_cast %68 : vector<1x8x4xbf16> to vector<8x4xbf16>
    %cst_52 = arith.constant dense<0.000000e+00> : vector<512x4xf32>
    %70 = tpu.matmul %67, %69, %cst_52 {dimension_numbers = #tpu.dot_dimension_numbers<[1], [0], [0], [1], [0, 0, 1, 1], [], []>} : vector<512x8xbf16>, vector<8x4xbf16>, vector<512x4xf32> -> vector<512x4xf32>
    %71 = arith.addf %66, %70 : vector<512x4xf32>
    %72 = arith.addf %55, %71 : vector<512x4xf32>
    %c0_53 = arith.constant 0 : index
    %c0_54 = arith.constant 0 : index
    %73 = vector.load %arg9[%c0_53, %c0_54] : memref<1x4xf32, #tpu.memory_space<vmem>>, vector<1x4xf32>
    %74 = vector.broadcast %73 : vector<1x4xf32> to vector<512x4xf32>
    %75 = arith.addf %72, %74 : vector<512x4xf32>
    %cst_55 = arith.constant 0.000000e+00 : f32
    %76 = vector.broadcast %cst_55 : f32 to vector<512x4xf32>
    %77 = arith.maximumf %75, %76 : vector<512x4xf32>
    %78 = vector.shape_cast %77 : vector<512x4xf32> to vector<16x32x4xf32>
    %79 = arith.truncf %78 : vector<16x32x4xf32> to vector<16x32x4xbf16>
    %c0_56 = arith.constant 0 : index
    %c0_57 = arith.constant 0 : index
    %c0_58 = arith.constant 0 : index
    %c0_59 = arith.constant 0 : index
    %80 = vector.load %arg10[%c0_56, %c0_57, %c0_58, %c0_59] : memref<1x16x32x4xbf16, #tpu.memory_space<vmem>>, vector<1x16x32x4xbf16>
    %81 = vector.shape_cast %80 : vector<1x16x32x4xbf16> to vector<16x32x4xbf16>
    %82 = vector.shape_cast %79 : vector<16x32x4xbf16> to vector<1x16x32x4xbf16>
    tpu.vector_store %arg10[%c0_56, %c0_57, %c0_58, %c0_59], %82 {strides = array<i32>} : memref<1x16x32x4xbf16, #tpu.memory_space<vmem>>, vector<1x16x32x4xbf16>,
    return
  }
  func.func @transform_0(%arg0: i32, %arg1: i32) -> (i32, i32, i32, i32) {
    %c0_i32 = arith.constant 0 : i32
    %c0_i32_0 = arith.constant 0 : i32
    %c0_i32_1 = arith.constant 0 : i32
    return %arg0, %arg1, %c0_i32, %c0_i32_0 : i32, i32, i32, i32
  }
  func.func @transform_1(%arg0: i32, %arg1: i32) -> (i32, i32, i32, i32) {
    %c16_i32 = arith.constant 16 : i32
    %0 = arith.muli %arg1, %c16_i32 : i32
    %c1_i32 = arith.constant 1 : i32
    %1 = arith.subi %0, %c1_i32 : i32
    %c0_i32 = arith.constant 0 : i32
    %2 = arith.maxsi %1, %c0_i32 : i32
    %c0_i32_0 = arith.constant 0 : i32
    %c0_i32_1 = arith.constant 0 : i32
    %c0_i32_2 = arith.constant 0 : i32
    return %arg0, %2, %c0_i32_0, %c0_i32_1 : i32, i32, i32, i32
  }
  func.func @transform_2(%arg0: i32, %arg1: i32) -> (i32, i32, i32, i32) {
    %c1_i32 = arith.constant 1 : i32
    %0 = arith.addi %arg1, %c1_i32 : i32
    %c16_i32 = arith.constant 16 : i32
    %1 = arith.muli %0, %c16_i32 : i32
    %c31_i32 = arith.constant 31 : i32
    %2 = arith.minsi %1, %c31_i32 : i32
    %c0_i32 = arith.constant 0 : i32
    %c0_i32_0 = arith.constant 0 : i32
    %c0_i32_1 = arith.constant 0 : i32
    return %arg0, %2, %c0_i32, %c0_i32_0 : i32, i32, i32, i32
  }
  func.func @transform_3(%arg0: i32, %arg1: i32) -> (i32, i32, i32, i32) {
    %c0_i32 = arith.constant 0 : i32
    %c0_i32_0 = arith.constant 0 : i32
    %c0_i32_1 = arith.constant 0 : i32
    return %arg0, %arg1, %c0_i32, %c0_i32_0 : i32, i32, i32, i32
  }
  func.func @transform_4(%arg0: i32, %arg1: i32) -> (i32, i32, i32, i32) {
    %c16_i32 = arith.constant 16 : i32
    %0 = arith.muli %arg1, %c16_i32 : i32
    %c1_i32 = arith.constant 1 : i32
    %1 = arith.subi %0, %c1_i32 : i32
    %c0_i32 = arith.constant 0 : i32
    %2 = arith.maxsi %1, %c0_i32 : i32
    %c0_i32_0 = arith.constant 0 : i32
    %c0_i32_1 = arith.constant 0 : i32
    %c0_i32_2 = arith.constant 0 : i32
    return %arg0, %2, %c0_i32_0, %c0_i32_1 : i32, i32, i32, i32
  }
  func.func @transform_5(%arg0: i32, %arg1: i32) -> (i32, i32, i32, i32) {
    %c1_i32 = arith.constant 1 : i32
    %0 = arith.addi %arg1, %c1_i32 : i32
    %c16_i32 = arith.constant 16 : i32
    %1 = arith.muli %0, %c16_i32 : i32
    %c31_i32 = arith.constant 31 : i32
    %2 = arith.minsi %1, %c31_i32 : i32
    %c0_i32 = arith.constant 0 : i32
    %c0_i32_0 = arith.constant 0 : i32
    %c0_i32_1 = arith.constant 0 : i32
    return %arg0, %2, %c0_i32, %c0_i32_0 : i32, i32, i32, i32
  }
  func.func @transform_6(%arg0: i32, %arg1: i32) -> (i32, i32, i32) {
    %c0_i32 = arith.constant 0 : i32
    %c0_i32_0 = arith.constant 0 : i32
    %c0_i32_1 = arith.constant 0 : i32
    %c0_i32_2 = arith.constant 0 : i32
    return %c0_i32, %c0_i32_0, %c0_i32_1 : i32, i32, i32
  }
  func.func @transform_7(%arg0: i32, %arg1: i32) -> (i32, i32) {
    %c0_i32 = arith.constant 0 : i32
    %c0_i32_0 = arith.constant 0 : i32
    %c0_i32_1 = arith.constant 0 : i32
    return %c0_i32, %c0_i32_0 : i32, i32
  }
  func.func @transform_8(%arg0: i32, %arg1: i32) -> (i32, i32, i32, i32) {
    %c0_i32 = arith.constant 0 : i32
    %c0_i32_0 = arith.constant 0 : i32
    %c0_i32_1 = arith.constant 0 : i32
    return %arg0, %arg1, %c0_i32, %c0_i32_0 : i32, i32, i32, i32
  }
}

</mosaic_0001>

<bundles_post_ra>
// kernel: tile.9
= control target key start
LH: loop header
LB: loop body
LE: loop exit
PB: predicated region body
PF: predicated region fallthrough
CT: control target
= control target key end

     0   :  { %vm7_vm0 = vcmask 31744   ;;  %s37_s8 = smov 4   ;;  %s38_s9 = smov 8   ;;  %vm13_vm1 = vcmask 130144   ;;  %vm19_vm2 = vcmask 97344   ;;  %vm25_vm3 = vcmask 64544   ;;  %s55_s0 = inlined_call_operand.vmem [shape: f32[4,4], index: 0, kind: input, shape index: {}]   ;;  %s56_s1 = inlined_call_operand.vmem [shape: f32[1,16], index: 1, kind: output, shape index: {}]  }
   0x1   :  { %v4_v0 = vld [vmem:[%s55_s0] sm:$0xf]  ;;  %s36_s0 = smov 12  }
   0x2   :  { %5 = vst [vmem:[#allocation1] sm:$0xf] %v4_v0 }
   0x9   :  { %v10_v1 = vld [vmem:[#allocation1 + $0x3] sm:$0x1]   ;;  %v22_v2 = vld [vmem:[#allocation1 + $0x1] sm:$0x1]   ;;  %v6_v3 = vld [vmem:[#allocation1] sm:$0x1]  }
   0xa   :  { %11 = vrot.lane.b32.xlu0 %v10_v1, %s36_s0  ;;  %23 = vrot.lane.b32.xlu1 %v22_v2, %s37_s8  ;;  %v16_v4 = vld [vmem:[#allocation1 + $0x2] sm:$0x1]   ;;  %8 = vst.msk [vmem:[#allocation0] sm:$0x1] %vm7_vm0, %v6_v3  }
   0xe   :  { %17 = vrot.lane.b32.xlu0 %v16_v4, %s38_s9 }
  0x7c   :  { %v12_v5 = vpop.permute.xlu0 %11   ;;  %v24_v6 = vpop.permute.xlu1 %23  }
  0x7d   :  { %14 = vst.msk [vmem:[#allocation0] sm:$0x1] %vm13_vm1, %v12_v5  }
  0x80   :  { %v18_v7 = vpop.permute.xlu0 %17  }
  0x81   :  { %20 = vst.msk [vmem:[#allocation0] sm:$0x1] %vm19_vm2, %v18_v7  }
  0x82   :  { %26 = vst.msk [vmem:[#allocation0] sm:$0x1] %vm25_vm3, %v24_v6  }
  0x89   :  { %v30_v8 = vld [vmem:[#allocation0] sm:$0x1] }
  0x8a   :  { %32 = vst [vmem:[%s56_s1] sm:$0x1] %v30_v8 }

// kernel: tile.8
= control target key start
LH: loop header
LB: loop body
LE: loop exit
PB: predicated region body
PF: predicated region fallthrough
CT: control target
= control target key end

     0   :  { %s22_s0 = inlined_call_operand.vmem [shape: f32[4], index: 0, kind: input, shape index: {}]   ;;  %s23_s1 = inlined_call_operand.vmem [shape: f32[4,4], index: 1, kind: output, shape index: {}]  }
   0x1   :  { %v4_v0 = vld [vmem:[%s22_s0] ss:$0 sm:$0xff] }
   0x2   :  { %5 = vst [vmem:[%s23_s1] sm:$0xf] %v4_v0 }

// kernel: up_block_forward.2
= control target key start
LH: loop header
LB: loop body
LE: loop exit
PB: predicated region body
PF: predicated region fallthrough
CT: control target
= control target key end

     0   :  { %s866_s12 = smov 0   ;;  %s868_s13 = smov 0   ;;  %s1031_s0 = inlined_call_operand.vmem [shape: bf16[512,8], index: 0, kind: input, shape index: {}]   ;;  %s1032_s1 = inlined_call_operand.vmem [shape: bf16[8,16], index: 1, kind: input, shape index: {}]   ;;  %s1033_s2 = inlined_call_operand.vmem [shape: f32[1,16], index: 2, kind: input, shape index: {}]   ;;  %s1034_s3 = inlined_call_operand.vmem [shape: bf16[32,2,16,8], index: 3, kind: output, shape index: {}]  }
   0x1   :  { %s870_s14 = smov 0   ;;  %s872_s15 = smov 0  }
   0x2   :  { %s874_s16 = smov 0  }
   0x3 LB: > { %s22_s17 = sadd.s32 1, %s835_s14  ;;  %s25_s18 = sadd.s32 1, %s839_s15  ;;  %s843_s16 = sphi %s874_s16, %s13_s16   ;;  %s839_s15 = sphi %s872_s15, %s1038_s15   ;;  %s835_s14 = sphi %s870_s14, %s1037_s14   ;;  %s831_s13 = sphi %s868_s13, %s1036_s13   ;;  %s827_s12 = sphi %s866_s12, %s1035_s12  }
   0x4   : > { %p23_p0 = scmp.ge.s32.totalorder %s22_s17, 2  ;;  %p649_p1 = scmp.ge.s32.totalorder %s843_s16, 1 }
   0x5   : > { %p162_p2 = scmp.lt.s32.totalorder %s843_s16, 5 }
   0x6   : > { %s1040_s17 = smov (%p23_p0, %s22_s17), 0  ;;  %s1042_s18 = smov (!%p23_p0, %s25_s18), %s839_s15 }
   0x7   : > { %p163_p3 = pnand %p649_p1, %p162_p2  ;;  %p27_p4 = scmp.ge.s32.totalorder %s1042_s18, 2 }
   0x8   : > { %v229_v0 = vld [vmem:[%s1032_s1] sm:$0xf] (!%p163_p3)  ;;  %vm302_vm0 = vcmask (!%p163_p3), 1043456   ;;  %s650_s21 = sshll.u32 (!%p163_p3), %s831_s13, 1  ;;  %vm277_vm1 = vcmask (!%p163_p3), 64512   ;;  %vm483_vm2 = vcmask (!%p163_p3), 60416  }
   0x9   : > { %s1044_s18 = smov (%p27_p4, %s1042_s18), 0  ;;  %166 = sbr.rel (%p163_p3) target bundleno = 384 (0x180), region = 32 }
   0xa   : > { %754 = vmatprep.subr.msk.bf16.mxu0 (!%p163_p3), %vm302_vm0, %v229_v0  ;;  %755 = vmatprep.subr.msk.bf16.mxu1 (!%p163_p3), %vm302_vm0, %v229_v0  ;;  %v304_v1 = vsel (!%p163_p3), %vm302_vm0, %v229_v0, 0  ;;  %s192_s22 = sadd.s32 (!%p163_p3), %s827_s12, %s650_s21  ;;  %v913_v10 = vld [vmem:[%s1033_s2] ss:$0 sm:$0xff] (!%p163_p3)  ;;  %s845_s8 = smov (!%p163_p3), 120  }
   0xb   : > { %735 = vmatpush3.bf16.msra.mxu0 (!%p163_p3), %v304_v1  ;;  %753 = vmatpush3.bf16.msra.mxu1 (!%p163_p3), %v304_v1  ;;  %s651_s23 = sshll.u32 (!%p163_p3), %s192_s22, 4  ;;  %s654_s28 = sshll.u32 (!%p163_p3), %s192_s22, 3 }
   0xc   : > { %p194_p5 = scmp.lt.s32.totalorder (!%p163_p3), %s651_s23, 63  ;;  %p204_p6 = scmp.lt.s32.totalorder (!%p163_p3), %s654_s28, 31 }
  0x10   : > { %s1046_s23 = smov (!%p194_p5, %s651_s23), 63  ;;  %s1048_s28 = smov (!%p204_p6, %s654_s28), 31 }
  0x11   : > { %s652_s24 = sshll.u32 %s1046_s23, 2  ;;  %s708_s4 = sshll.u32 %s1048_s28, 4 }
  0x12   : > { %s197_s27 = scalar_lea.vmem %s1031_s0, %s652_s24  ;;  %s923_s7 = scalar_lea.vmem %s1034_s3, %s708_s4 }
  0x13   : > { %v797_v2 = vld [vmem:[%s197_s27] sm:$0xff]   ;;  %v799_v4 = vld [vmem:[%s197_s27 + $0x8] sm:$0xff]   ;;  %v801_v6 = vld [vmem:[%s197_s27 + $0x10] sm:$0xff]  }
  0x14   : > { %v798_v3 = vld [vmem:[%s197_s27 + $0x20] sm:$0xff]   ;;  %736 = vmatprep.mubr.msk.bf16.mxu0 %vm277_vm1, %v797_v2  ;;  %v800_v5 = vld [vmem:[%s197_s27 + $0x28] sm:$0xff]   ;;  %v803_v7 = vld [vmem:[%s197_s27 + $0x30] sm:$0xff]  }
  0x15   : > { %744 = vmatprep.mubr.msk.bf16.mxu1 %vm277_vm1, %v798_v3  ;;  %737 = vmatmul.mubr.msk.bf16.vlgmr.msra.gmra.mrb[0].mxu0 %vm277_vm1, %v799_v4  ;;  %v802_v8 = vld [vmem:[%s197_s27 + $0x18] sm:$0xff]  }
  0x16   : > { %745 = vmatmul.mubr.msk.bf16.vlgmr.msra.gmra.mrb[0].mxu1 %vm277_vm1, %v800_v5  ;;  %740 = vmatprep.mubr.msk.bf16.mxu0 %vm277_vm1, %v801_v6  ;;  %v804_v9 = vld [vmem:[%s197_s27 + $0x38] sm:$0xff]  }
  0x17   : > { %748 = vmatprep.mubr.msk.bf16.mxu1 %vm277_vm1, %v803_v7 }
  0x1d   : > { %741 = vmatmul.mubr.msk.bf16.gmra.mrb[4].mxu0 %vm277_vm1, %v802_v8 }
  0x1e   : > { %749 = vmatmul.mubr.msk.bf16.gmra.mrb[4].mxu1 %vm277_vm1, %v804_v9 }
  0xe8   : > { %v738_v11 = vpop.f32.mrb[0].mxu0 }
  0xe9   : > { %v349_v12 = vadd.f32 %v738_v11, %v913_v10  ;;  %v746_v13 = vpop.f32.mrb[0].mxu1  ;;  %v340_v14 = vpop.f32.mrb[1].mxu0 }
  0xea   : > { %v381_v15 = vadd.f32 %v746_v13, %v913_v10  ;;  %v341_v16 = vadd.f32 %v913_v10, %v340_v14  ;;  %v372_v17 = vpop.f32.mrb[1].mxu1  ;;  %v739_v18 = vpop.f32.mrb[2].mxu0 }
  0xeb   : > { %v405_v19 = vmax.f32 %v349_v12, 0.0  ;;  %v373_v20 = vadd.f32 %v913_v10, %v372_v17  ;;  %v352_v21 = vadd.f32 %v739_v18, %v913_v10  ;;  %v747_v22 = vpop.f32.mrb[2].mxu1  ;;  %v343_v23 = vpop.f32.mrb[3].mxu0 }
  0xec   : > { %v413_v24 = vmax.f32 %v381_v15, 0.0  ;;  %v403_v25 = vmax.f32 %v341_v16, 0.0  ;;  %v384_v26 = vadd.f32 %v747_v22, %v913_v10  ;;  %v344_v27 = vadd.f32 %v913_v10, %v343_v23  ;;  %v375_v28 = vpop.f32.mrb[3].mxu1 }
  0xed   : > { %v411_v29 = vmax.f32 %v373_v20, 0.0  ;;  %v406_v30 = vmax.f32 %v352_v21, 0.0  ;;  %v376_v31 = vadd.f32 %v913_v10, %v375_v28  ;;  %v711_v32 = vpack.c.bf16 %v405_v19, %v405_v19 }
  0xee   : > { %v709_v33 = vpack.c.bf16 %v403_v25, %v403_v25  ;;  %v414_v34 = vmax.f32 %v384_v26, 0.0  ;;  %v404_v35 = vmax.f32 %v344_v27, 0.0  ;;  %v719_v36 = vpack.c.bf16 %v413_v24, %v413_v24 }
  0xef   : > { %v717_v37 = vpack.c.bf16 %v411_v29, %v411_v29  ;;  %v712_v38 = vpack.c.bf16 %v406_v30, %v406_v30  ;;  %v412_v39 = vmax.f32 %v376_v31, 0.0  ;;  %504 = vrot.lane.b32.xlu1 %v711_v32, %s845_s8  ;;  %486 = vst.msk [vmem:[%s923_s7 + $0x10] sm:$0xf] %vm483_vm2, %v711_v32 }
  0xf0   : > { %484 = vst.msk [vmem:[%s923_s7] sm:$0xf] %vm483_vm2, %v709_v33  ;;  %v720_v40 = vpack.c.bf16 %v414_v34, %v414_v34  ;;  %v710_v41 = vpack.c.bf16 %v404_v35, %v404_v35  ;;  %520 = vrot.lane.b32.xlu0 %v719_v36, %s845_s8  ;;  %494 = vst.msk [vmem:[%s923_s7 + $0x50] sm:$0xf] %vm483_vm2, %v719_v36  ;;  %v742_v42 = vpop.f32.mrb[4].mxu0 }
  0xf1   : > { %492 = vst.msk [vmem:[%s923_s7 + $0x40] sm:$0xf] %vm483_vm2, %v717_v37  ;;  %487 = vst.msk [vmem:[%s923_s7 + $0x14] sm:$0xf] %vm483_vm2, %v712_v38  ;;  %v718_v43 = vpack.c.bf16 %v412_v39, %v412_v39  ;;  %v365_v44 = vadd.f32 %v742_v42, %v913_v10  ;;  %v356_v45 = vpop.f32.mrb[5].mxu0  ;;  %v750_v46 = vpop.f32.mrb[4].mxu1 }
  0xf2   : > { %495 = vst.msk [vmem:[%s923_s7 + $0x54] sm:$0xf] %vm483_vm2, %v720_v40  ;;  %485 = vst.msk [vmem:[%s923_s7 + $0x4] sm:$0xf] %vm483_vm2, %v710_v41  ;;  %v357_v47 = vadd.f32 %v913_v10, %v356_v45  ;;  %v743_v48 = vpop.f32.mrb[6].mxu0  ;;  %v397_v49 = vadd.f32 %v750_v46, %v913_v10  ;;  %v388_v50 = vpop.f32.mrb[5].mxu1 }
  0xf3   : > { %493 = vst.msk [vmem:[%s923_s7 + $0x44] sm:$0xf] %vm483_vm2, %v718_v43  ;;  %506 = vrot.lane.b32.xlu1 %v712_v38, %s845_s8  ;;  %v409_v51 = vmax.f32 %v365_v44, 0.0  ;;  %v368_v52 = vadd.f32 %v743_v48, %v913_v10  ;;  %v359_v53 = vpop.f32.mrb[7].mxu0  ;;  %v389_v54 = vadd.f32 %v913_v10, %v388_v50  ;;  %v751_v55 = vpop.f32.mrb[6].mxu1 }
  0xf4   : > { %500 = vrot.lane.b32.xlu0 %v709_v33, %s845_s8  ;;  %v407_v56 = vmax.f32 %v357_v47, 0.0  ;;  %v360_v57 = vadd.f32 %v913_v10, %v359_v53  ;;  %v417_v58 = vmax.f32 %v397_v49, 0.0  ;;  %v400_v59 = vadd.f32 %v751_v55, %v913_v10  ;;  %v391_v60 = vpop.f32.mrb[7].mxu1 }
  0xf5   : > { %v715_v61 = vpack.c.bf16 %v409_v51, %v409_v51  ;;  %v410_v62 = vmax.f32 %v368_v52, 0.0  ;;  %v415_v63 = vmax.f32 %v389_v54, 0.0  ;;  %v392_v0 = vadd.f32 %v913_v10, %v391_v60 }
  0xf6   : > { %v713_v1 = vpack.c.bf16 %v407_v56, %v407_v56  ;;  %v408_v2 = vmax.f32 %v360_v57, 0.0  ;;  %v723_v3 = vpack.c.bf16 %v417_v58, %v417_v58  ;;  %v418_v4 = vmax.f32 %v400_v59, 0.0 }
  0xf7   : > { %490 = vst.msk [vmem:[%s923_s7 + $0x30] sm:$0xf] %vm483_vm2, %v715_v61  ;;  %v716_v5 = vpack.c.bf16 %v410_v62, %v410_v62  ;;  %522 = vrot.lane.b32.xlu1 %v720_v40, %s845_s8  ;;  %v721_v6 = vpack.c.bf16 %v415_v63, %v415_v63  ;;  %v416_v7 = vmax.f32 %v392_v0, 0.0 }
  0xf8   : > { %488 = vst.msk [vmem:[%s923_s7 + $0x20] sm:$0xf] %vm483_vm2, %v713_v1  ;;  %v714_v8 = vpack.c.bf16 %v408_v2, %v408_v2  ;;  %516 = vrot.lane.b32.xlu0 %v717_v37, %s845_s8  ;;  %498 = vst.msk [vmem:[%s923_s7 + $0x70] sm:$0xf] %vm483_vm2, %v723_v3  ;;  %v724_v9 = vpack.c.bf16 %v418_v4, %v418_v4 }
  0xf9   : > { %491 = vst.msk [vmem:[%s923_s7 + $0x34] sm:$0xf] %vm483_vm2, %v716_v5  ;;  %496 = vst.msk [vmem:[%s923_s7 + $0x60] sm:$0xf] %vm483_vm2, %v721_v6  ;;  %v722_v10 = vpack.c.bf16 %v416_v7, %v416_v7 }
  0xfa   : > { %489 = vst.msk [vmem:[%s923_s7 + $0x24] sm:$0xf] %vm483_vm2, %v714_v8  ;;  %499 = vst.msk [vmem:[%s923_s7 + $0x74] sm:$0xf] %vm483_vm2, %v724_v9 }
  0xfb   : > { %518 = vrot.lane.b32.xlu1 %v718_v43, %s845_s8  ;;  %497 = vst.msk [vmem:[%s923_s7 + $0x64] sm:$0xf] %vm483_vm2, %v722_v10 }
  0xfc   : > { %502 = vrot.lane.b32.xlu0 %v710_v41, %s845_s8 }
  0xff   : > { %514 = vrot.lane.b32.xlu1 %v716_v5, %s845_s8 }
 0x100   : > { %512 = vrot.lane.b32.xlu0 %v715_v61, %s845_s8 }
 0x103   : > { %510 = vrot.lane.b32.xlu1 %v714_v8, %s845_s8 }
 0x104   : > { %508 = vrot.lane.b32.xlu0 %v713_v1, %s845_s8 }
 0x107   : > { %526 = vrot.lane.b32.xlu1 %v722_v10, %s845_s8 }
 0x108   : > { %524 = vrot.lane.b32.xlu0 %v721_v6, %s845_s8 }
 0x10b   : > { %530 = vrot.lane.b32.xlu1 %v724_v9, %s845_s8 }
 0x10c   : > { %528 = vrot.lane.b32.xlu0 %v723_v3, %s845_s8 }
 0x161   : > { %v505_v11 = vpop.permute.xlu1 %504 }
 0x162   : > { %v521_v12 = vpop.permute.xlu0 %520  ;;  %692 = vst.msk [vmem:[%s923_s7 + $0x18] sm:$0xf] %vm483_vm2, %v505_v11 }
 0x163   : > { %700 = vst.msk [vmem:[%s923_s7 + $0x58] sm:$0xf] %vm483_vm2, %v521_v12 }
 0x165   : > { %v507_v13 = vpop.permute.xlu1 %506 }
 0x166   : > { %693 = vst.msk [vmem:[%s923_s7 + $0x1c] sm:$0xf] %vm483_vm2, %v507_v13  ;;  %v501_v14 = vpop.permute.xlu0 %500 }
 0x167   : > { %690 = vst.msk [vmem:[%s923_s7 + $0x8] sm:$0xf] %vm483_vm2, %v501_v14 }
 0x169   : > { %v523_v15 = vpop.permute.xlu1 %522 }
 0x16a   : > { %701 = vst.msk [vmem:[%s923_s7 + $0x5c] sm:$0xf] %vm483_vm2, %v523_v15  ;;  %v517_v16 = vpop.permute.xlu0 %516 }
 0x16b   : > { %698 = vst.msk [vmem:[%s923_s7 + $0x48] sm:$0xf] %vm483_vm2, %v517_v16 }
 0x16d   : > { %v519_v17 = vpop.permute.xlu1 %518 }
 0x16e   : > { %699 = vst.msk [vmem:[%s923_s7 + $0x4c] sm:$0xf] %vm483_vm2, %v519_v17  ;;  %v503_v18 = vpop.permute.xlu0 %502 }
 0x16f   : > { %691 = vst.msk [vmem:[%s923_s7 + $0xc] sm:$0xf] %vm483_vm2, %v503_v18 }
 0x171   : > { %v515_v19 = vpop.permute.xlu1 %514 }
 0x172   : > { %697 = vst.msk [vmem:[%s923_s7 + $0x3c] sm:$0xf] %vm483_vm2, %v515_v19  ;;  %v513_v20 = vpop.permute.xlu0 %512 }
 0x173   : > { %696 = vst.msk [vmem:[%s923_s7 + $0x38] sm:$0xf] %vm483_vm2, %v513_v20 }
 0x175   : > { %v511_v21 = vpop.permute.xlu1 %510 }
 0x176   : > { %695 = vst.msk [vmem:[%s923_s7 + $0x2c] sm:$0xf] %vm483_vm2, %v511_v21  ;;  %v509_v22 = vpop.permute.xlu0 %508 }
 0x177   : > { %694 = vst.msk [vmem:[%s923_s7 + $0x28] sm:$0xf] %vm483_vm2, %v509_v22 }
 0x179   : > { %v527_v23 = vpop.permute.xlu1 %526 }
 0x17a   : > { %703 = vst.msk [vmem:[%s923_s7 + $0x6c] sm:$0xf] %vm483_vm2, %v527_v23  ;;  %v525_v24 = vpop.permute.xlu0 %524 }
 0x17b   : > { %702 = vst.msk [vmem:[%s923_s7 + $0x68] sm:$0xf] %vm483_vm2, %v525_v24 }
 0x17d   : > { %v531_v25 = vpop.permute.xlu1 %530 }
 0x17e   : > { %705 = vst.msk [vmem:[%s923_s7 + $0x7c] sm:$0xf] %vm483_vm2, %v531_v25  ;;  %v529_v26 = vpop.permute.xlu0 %528 }
 0x17f   : > { %704 = vst.msk [vmem:[%s923_s7 + $0x78] sm:$0xf] %vm483_vm2, %v529_v26 }
 0x180 PF: > { %s13_s16 = sadd.s32 1, %s843_s16   ;;  %s1035_s12 = smov %s835_s14 }
 0x181   : > { %p10_p7 = scmp.ge.s32.totalorder %s13_s16, 6   ;;  %s1036_s13 = smov %s839_s15 }
 0x182   : > { %s1037_s14 = smov %s1040_s17  ;;  %s1038_s15 = smov %s1044_s18 }
 0x183   :  { %12 = sbr.rel (!%p10_p7) target bundleno = 3 (0x3), region = 63 }

// kernel: up_block_forward.3
= control target key start
LH: loop header
LB: loop body
LE: loop exit
PB: predicated region body
PF: predicated region fallthrough
CT: control target
= control target key end

     0   :  { %s8609_s27 = smov 0   ;;  %s8611_s28 = smov 0   ;;  %s10904_s0 = inlined_call_operand.vmem [shape: bf16[2,32,32,4], index: 0, kind: input, shape index: {}, may-alias: {0,1,2}]   ;;  %s10905_s1 = inlined_call_operand.vmem [shape: bf16[2,32,32,4], index: 1, kind: input, shape index: {}, may-alias: {0,1,2}]   ;;  %s10906_s2 = inlined_call_operand.vmem [shape: bf16[2,32,32,4], index: 2, kind: input, shape index: {}, may-alias: {0,1,2}]   ;;  %s10907_s3 = inlined_call_operand.vmem [shape: bf16[2,32,32,4], index: 3, kind: input, shape index: {}, may-alias: {3,4,5}]   ;;  %s10908_s4 = inlined_call_operand.vmem [shape: bf16[2,32,32,4], index: 4, kind: input, shape index: {}, may-alias: {3,4,5}]   ;;  %s10909_s5 = inlined_call_operand.vmem [shape: bf16[2,32,32,4], index: 5, kind: input, shape index: {}, may-alias: {3,4,5}]   ;;  %s10910_s6 = inlined_call_operand.vmem [shape: bf16[9,8,4], index: 6, kind: input, shape index: {}]   ;;  %s10911_s7 = inlined_call_operand.vmem [shape: f32[1,4], index: 7, kind: input, shape index: {}]   ;;  %s10912_s8 = inlined_call_operand.vmem [shape: bf16[2,32,32,4], index: 8, kind: output, shape index: {}]  }
   0x1   :  { %11150 = sst [smem:[#allocation82_spill]] %s10905_s1  ;;  %s8613_s29 = smov 0  }
   0x2   :  { %s8615_s30 = smov 0   ;;  %s8617_s9 = smov 0  }
   0x3 LB: > { %s27_s10 = sadd.s32 1, %s8548_s29  ;;  %s30_s11 = sadd.s32 1, %s8552_s30  ;;  %s8556_s9 = sphi %s8617_s9, %s18_s9   ;;  %s8552_s30 = sphi %s8615_s30, %s11484_s30   ;;  %s8548_s29 = sphi %s8613_s29, %s11483_s29   ;;  %s8544_s28 = sphi %s8611_s28, %s11482_s28   ;;  %s8540_s27 = sphi %s8609_s27, %s11481_s27  }
   0x4   : > { %p28_p0 = scmp.ge.s32.totalorder %s27_s10, 2  ;;  %p6418_p1 = scmp.ge.s32.totalorder %s8556_s9, 1 }
   0x5   : > { %p430_p2 = scmp.lt.s32.totalorder %s8556_s9, 5 }
   0x6   : > { %s11486_s10 = smov (%p28_p0, %s27_s10), 0  ;;  %s11488_s11 = smov (!%p28_p0, %s30_s11), %s8552_s30 }
   0x7   : > { %p431_p3 = pnand %p6418_p1, %p430_p2  ;;  %p32_p4 = scmp.ge.s32.totalorder %s11488_s11, 2 }
   0x9   : > { %s11490_s11 = smov (%p32_p4, %s11488_s11), 0  ;;  %434 = sbr.rel (%p431_p3) target bundleno = 1279 (0x4ff), region = 52 }
  0x10   : > { %s8644_s12 = sshll.u32 %s8540_s27, 4  ;;  %p537_p5 = scmp.lt.s32.totalorder %s8544_s28, 1  ;;  %vm657_vm0 = vcmask 64516   ;;  %v8558_v0 = vmov 0   ;;  %vm638_vm1 = vcmask 60416   ;;  %vm1188_vm2 = vcmask 31744  }
  0x11   : > { %p539_p6 = scmp.lt.s32.totalorder %s8644_s12, 31  ;;  %s8649_s13 = sadd.s32 4294967295, %s8644_s12  ;;  %658 = vst.msk [vmem:[#allocation2 + $0x10] sm:$0xf0] %vm657_vm0, %v8558_v0  ;;  %659 = vst.msk [vmem:[#allocation2 + $0x28] sm:$0xf0] %vm657_vm0, %v8558_v0 }
  0x12   : > { %660 = vst.msk [vmem:[#allocation2 + $0x40] sm:$0xf0] %vm657_vm0, %v8558_v0  ;;  %661 = vst.msk [vmem:[#allocation2 + $0x58] sm:$0xf0] %vm657_vm0, %v8558_v0  ;;  %s11492_s28 = smov (!%p537_p5, %s8544_s28), 1  ;;  %p549_p7 = scmp.gt.s32.totalorder %s8649_s13, 0 }
  0x13   : > { %662 = vst.msk [vmem:[#allocation2 + $0x70] sm:$0xf0] %vm657_vm0, %v8558_v0  ;;  %663 = vst.msk [vmem:[#allocation2 + $0x88] sm:$0xf0] %vm657_vm0, %v8558_v0  ;;  %s540_s14 = scalar_select %p539_p6, %s8644_s12, 31  ;;  %vm1317_vm3 = vcmask 1043456  }
  0x14   : > { %664 = vst.msk [vmem:[#allocation2 + $0xa0] sm:$0xf0] %vm657_vm0, %v8558_v0  ;;  %665 = vst.msk [vmem:[#allocation2 + $0xb8] sm:$0xf0] %vm657_vm0, %v8558_v0  ;;  %s8675_s15 = sshll.u32 %s11492_s28, 7  ;;  %p6425_p8 = scmp.lt.s32.totalorder %s8649_s13, 31 }
  0x15   : > { %666 = vst.msk [vmem:[#allocation2 + $0xd0] sm:$0xf0] %vm657_vm0, %v8558_v0  ;;  %667 = vst.msk [vmem:[#allocation2 + $0xe8] sm:$0xf0] %vm657_vm0, %v8558_v0  ;;  %s6420_s16 = sshll.u32 %s540_s14, 2  ;;  %s6915_s18 = sadd.s32 16, %s8644_s12 }
  0x16   : > { %668 = vst.msk [vmem:[#allocation2 + $0x100] sm:$0xf0] %vm657_vm0, %v8558_v0  ;;  %669 = vst.msk [vmem:[#allocation2 + $0x118] sm:$0xf0] %vm657_vm0, %v8558_v0  ;;  %s543_s17 = sadd.s32 %s8675_s15, %s6420_s16  ;;  %p8683_p9 = scmp.lt.s32.totalorder %s6915_s18, 31  ;;  %vm1416_vm4 = vcmask 64512  }
  0x17   : > { %670 = vst.msk [vmem:[#allocation2 + $0x130] sm:$0xf0] %vm657_vm0, %v8558_v0  ;;  %671 = vst.msk [vmem:[#allocation2 + $0x148] sm:$0xf0] %vm657_vm0, %v8558_v0  ;;  %s8681_s19 = sshll.u32 %s543_s17, 2  ;;  %s11494_s13 = smov (!%p549_p7, %s8649_s13), 0 }
  0x18   : > { %672 = vst.msk [vmem:[#allocation2 + $0x160] sm:$0xf0] %vm657_vm0, %v8558_v0  ;;  %673 = vst.msk [vmem:[#allocation2 + $0x178] sm:$0xf0] %vm657_vm0, %v8558_v0  ;;  %s11496_s18 = smov (!%p8683_p9, %s6915_s18), 31  ;;  %s11498_s13 = smov (!%p6425_p8, %s11494_s13), 31 }
  0x19   : > { %674 = vst.msk [vmem:[#allocation2 + $0x190] sm:$0xf0] %vm657_vm0, %v8558_v0  ;;  %675 = vst.msk [vmem:[#allocation2 + $0x1a8] sm:$0xf0] %vm657_vm0, %v8558_v0  ;;  %s11500_s18 = smov (!%p8683_p9, %s11496_s18), 31  ;;  %s6430_s21 = sshll.u32 %s11498_s13, 2 }
  0x1a   : > { %639 = vst.msk [vmem:[#allocation2] sm:$0xf] %vm638_vm1, %v8558_v0  ;;  %640 = vst.msk [vmem:[#allocation2 + $0x18] sm:$0xf] %vm638_vm1, %v8558_v0  ;;  %s8714_s24 = scalar_lea.vmem %s10907_s3, %s8681_s19  ;;  %s557_s25 = sadd.s32 %s6430_s21, %s8675_s15 }
  0x1b   : > { %641 = vst.msk [vmem:[#allocation2 + $0x30] sm:$0xf] %vm638_vm1, %v8558_v0  ;;  %642 = vst.msk [vmem:[#allocation2 + $0x48] sm:$0xf] %vm638_vm1, %v8558_v0  ;;  %s6437_s26 = sshll.u32 %s11500_s18, 2  ;;  %s6432_s28 = sshll.u32 %s557_s25, 2 }
  0x1c   : > { %643 = vst.msk [vmem:[#allocation2 + $0x60] sm:$0xf] %vm638_vm1, %v8558_v0  ;;  %644 = vst.msk [vmem:[#allocation2 + $0x78] sm:$0xf] %vm638_vm1, %v8558_v0  ;;  %s574_s12 = sadd.s32 %s6437_s26, %s8675_s15  ;;  %v8445_v1 = vld [vmem:[%s8714_s24 + $0x10] sm:$0xff]   ;;  %s11152_s1 = sld [smem:[#allocation82_spill]] }
  0x1d   : > { %645 = vst.msk [vmem:[#allocation2 + $0x90] sm:$0xf] %vm638_vm1, %v8558_v0  ;;  %646 = vst.msk [vmem:[#allocation2 + $0xa8] sm:$0xf] %vm638_vm1, %v8558_v0  ;;  %s6439_s17 = sshll.u32 %s574_s12, 2  ;;  %v8446_v2 = vld [vmem:[%s8714_s24] sm:$0xff]   ;;  %s8733_s15 = scalar_lea.vmem %s10908_s4, %s6432_s28 }
  0x1e   : > { %647 = vst.msk [vmem:[#allocation2 + $0xc0] sm:$0xf] %vm638_vm1, %v8558_v0  ;;  %648 = vst.msk [vmem:[#allocation2 + $0xd8] sm:$0xf] %vm638_vm1, %v8558_v0  ;;  %s8728_s23 = scalar_lea.vmem %s10906_s2, %s6439_s17  ;;  %s8738_s14 = scalar_lea.vmem %s10909_s5, %s6439_s17  ;;  %v8447_v3 = vld [vmem:[%s8714_s24 + $0x18] sm:$0xff]   ;;  %v8448_v4 = vld [vmem:[%s8714_s24 + $0x8] sm:$0xff]  }
  0x1f   : > { %649 = vst.msk [vmem:[#allocation2 + $0xf0] sm:$0xf] %vm638_vm1, %v8558_v0  ;;  %650 = vst.msk [vmem:[#allocation2 + $0x108] sm:$0xf] %vm638_vm1, %v8558_v0  ;;  %s8559_s20 = smov 4   ;;  %v8449_v5 = vld [vmem:[%s8714_s24 + $0x28] sm:$0xff]   ;;  %s8778_s22 = scalar_lea.vmem %s10904_s0, %s8681_s19 }
  0x20   : > { %651 = vst.msk [vmem:[#allocation2 + $0x120] sm:$0xf] %vm638_vm1, %v8558_v0  ;;  %652 = vst.msk [vmem:[#allocation2 + $0x138] sm:$0xf] %vm638_vm1, %v8558_v0  ;;  %1128 = vrot.lane.b32.xlu1 %v8445_v1, %s8559_s20  ;;  %1124 = vrot.lane.b32.xlu0 %v8446_v2, %s8559_s20  ;;  %v8450_v6 = vld [vmem:[%s8714_s24 + $0x20] sm:$0xff]   ;;  %v8451_v7 = vld [vmem:[%s8714_s24 + $0x38] sm:$0xff]  }
  0x21   : > { %653 = vst.msk [vmem:[#allocation2 + $0x150] sm:$0xf] %vm638_vm1, %v8558_v0  ;;  %654 = vst.msk [vmem:[#allocation2 + $0x168] sm:$0xf] %vm638_vm1, %v8558_v0  ;;  %v8452_v8 = vld [vmem:[%s8714_s24 + $0x30] sm:$0xff]   ;;  %v8453_v9 = vld [vmem:[%s8714_s24 + $0x48] sm:$0xff]  }
  0x22   : > { %655 = vst.msk [vmem:[#allocation2 + $0x180] sm:$0xf] %vm638_vm1, %v8558_v0  ;;  %656 = vst.msk [vmem:[#allocation2 + $0x198] sm:$0xf] %vm638_vm1, %v8558_v0  ;;  %s8722_s13 = scalar_lea.vmem %s11152_s1, %s6432_s28  ;;  %s8744_s1 = scalar_lea.vmem %s10912_s8, %s8681_s19  ;;  %v8454_v10 = vld [vmem:[%s8714_s24 + $0x40] sm:$0xff]   ;;  %v8455_v11 = vld [vmem:[%s8714_s24 + $0x58] sm:$0xff]  }
  0x23   : > { %v8456_v12 = vld [vmem:[%s8714_s24 + $0x50] sm:$0xff]   ;;  %v8457_v13 = vld [vmem:[%s8714_s24 + $0x68] sm:$0xff]   ;;  %v8458_v14 = vld [vmem:[%s8714_s24 + $0x60] sm:$0xff]   ;;  %p6529_p10 = scmp.ne.s32.totalorder %s8540_s27, 0 }
  0x24   : > { %1130 = vrot.lane.b32.xlu1 %v8447_v3, %s8559_s20  ;;  %1126 = vrot.lane.b32.xlu0 %v8448_v4, %s8559_s20  ;;  %v8459_v15 = vld [vmem:[%s8714_s24 + $0x78] sm:$0xff]   ;;  %v8460_v16 = vld [vmem:[%s8714_s24 + $0x70] sm:$0xff]  }
  0x25   : > { %v8461_v17 = vld [vmem:[%s8714_s24 + $0x88] sm:$0xff]   ;;  %v8462_v18 = vld [vmem:[%s8714_s24 + $0x80] sm:$0xff]   ;;  %v8463_v19 = vld [vmem:[%s8714_s24 + $0x98] sm:$0xff]  }
  0x26   : > { %v8464_v20 = vld [vmem:[%s8714_s24 + $0x90] sm:$0xff]   ;;  %v8465_v21 = vld [vmem:[%s8714_s24 + $0xa8] sm:$0xff]   ;;  %v8466_v22 = vld [vmem:[%s8714_s24 + $0xa0] sm:$0xff]  }
  0x27   : > { %v8467_v23 = vld [vmem:[%s8714_s24 + $0xb8] sm:$0xff]   ;;  %v8468_v24 = vld [vmem:[%s8714_s24 + $0xb0] sm:$0xff]   ;;  %v8469_v25 = vld [vmem:[%s8714_s24 + $0xc8] sm:$0xff]  }
  0x28   : > { %1134 = vrot.lane.b32.xlu1 %v8449_v5, %s8559_s20  ;;  %1132 = vrot.lane.b32.xlu0 %v8450_v6, %s8559_s20  ;;  %v8470_v26 = vld [vmem:[%s8714_s24 + $0xc0] sm:$0xff]   ;;  %v8471_v27 = vld [vmem:[%s8714_s24 + $0xd8] sm:$0xff]  }
  0x29   : > { %v8472_v28 = vld [vmem:[%s8714_s24 + $0xd0] sm:$0xff]   ;;  %v8473_v29 = vld [vmem:[%s8714_s24 + $0xe8] sm:$0xff]   ;;  %v8474_v30 = vld [vmem:[%s8714_s24 + $0xe0] sm:$0xff]  }
  0x2a   : > { %v8475_v31 = vld [vmem:[%s8714_s24 + $0xf8] sm:$0xff]   ;;  %v8476_v32 = vld [vmem:[%s8714_s24 + $0xf0] sm:$0xff]   ;;  %v8478_v34 = vld [vmem:[%s8778_s22] sm:$0xff]  }
  0x2b   : > { %v8477_v33 = vld [vmem:[%s8778_s22 + $0x10] sm:$0xff]   ;;  %v8479_v39 = vld [vmem:[%s8778_s22 + $0x18] sm:$0xff]   ;;  %v8480_v40 = vld [vmem:[%s8778_s22 + $0x8] sm:$0xff]  }
  0x2c   : > { %1138 = vrot.lane.b32.xlu1 %v8451_v7, %s8559_s20  ;;  %1136 = vrot.lane.b32.xlu0 %v8452_v8, %s8559_s20  ;;  %v8481_v47 = vld [vmem:[%s8778_s22 + $0x28] sm:$0xff]   ;;  %v8482_v48 = vld [vmem:[%s8778_s22 + $0x20] sm:$0xff]  }
  0x2d   : > { %v8483_v57 = vld [vmem:[%s8778_s22 + $0x38] sm:$0xff]   ;;  %v8484_v58 = vld [vmem:[%s8778_s22 + $0x30] sm:$0xff]   ;;  %v8485_v2 = vld [vmem:[%s8778_s22 + $0x48] sm:$0xff]  }
  0x2e   : > { %v8486_v3 = vld [vmem:[%s8778_s22 + $0x40] sm:$0xff]  }
  0x30   : > { %1142 = vrot.lane.b32.xlu1 %v8453_v9, %s8559_s20  ;;  %1140 = vrot.lane.b32.xlu0 %v8454_v10, %s8559_s20 }
  0x34   : > { %1146 = vrot.lane.b32.xlu1 %v8455_v11, %s8559_s20  ;;  %1144 = vrot.lane.b32.xlu0 %v8456_v12, %s8559_s20  ;;  %v8487_v11 = vld [vmem:[%s8778_s22 + $0x58] sm:$0xff]   ;;  %v8488_v12 = vld [vmem:[%s8778_s22 + $0x50] sm:$0xff]  }
  0x38   : > { %1150 = vrot.lane.b32.xlu1 %v8457_v13, %s8559_s20  ;;  %1148 = vrot.lane.b32.xlu0 %v8458_v14, %s8559_s20 }
  0x3c   : > { %1154 = vrot.lane.b32.xlu1 %v8459_v15, %s8559_s20  ;;  %1152 = vrot.lane.b32.xlu0 %v8460_v16, %s8559_s20 }
  0x40   : > { %1158 = vrot.lane.b32.xlu1 %v8461_v17, %s8559_s20  ;;  %1156 = vrot.lane.b32.xlu0 %v8462_v18, %s8559_s20 }
  0x44   : > { %1162 = vrot.lane.b32.xlu1 %v8463_v19, %s8559_s20  ;;  %1160 = vrot.lane.b32.xlu0 %v8464_v20, %s8559_s20  ;;  %v8489_v20 = vld [vmem:[%s8778_s22 + $0x68] sm:$0xff]  }
  0x48   : > { %1166 = vrot.lane.b32.xlu1 %v8465_v21, %s8559_s20  ;;  %1164 = vrot.lane.b32.xlu0 %v8466_v22, %s8559_s20  ;;  %v8490_v21 = vld [vmem:[%s8778_s22 + $0x60] sm:$0xff]  }
  0x4c   : > { %1170 = vrot.lane.b32.xlu1 %v8467_v23, %s8559_s20  ;;  %1168 = vrot.lane.b32.xlu0 %v8468_v24, %s8559_s20 }
  0x50   : > { %1174 = vrot.lane.b32.xlu1 %v8469_v25, %s8559_s20  ;;  %1172 = vrot.lane.b32.xlu0 %v8470_v26, %s8559_s20 }
  0x54   : > { %1178 = vrot.lane.b32.xlu1 %v8471_v27, %s8559_s20  ;;  %1176 = vrot.lane.b32.xlu0 %v8472_v28, %s8559_s20 }
  0x58   : > { %1182 = vrot.lane.b32.xlu1 %v8473_v29, %s8559_s20  ;;  %1180 = vrot.lane.b32.xlu0 %v8474_v30, %s8559_s20  ;;  %v8491_v29 = vld [vmem:[%s8778_s22 + $0x78] sm:$0xff]   ;;  %v8492_v30 = vld [vmem:[%s8778_s22 + $0x70] sm:$0xff]  }
  0x5c   : > { %1186 = vrot.lane.b32.xlu1 %v8475_v31, %s8559_s20  ;;  %1184 = vrot.lane.b32.xlu0 %v8476_v32, %s8559_s20 }
  0x92   : > { %v1129_v35 = vpop.permute.xlu1 %1128  ;;  %v1125_v36 = vpop.permute.xlu0 %1124 }
  0x93   : > { %v1197_v37 = vsel %vm1188_vm2, %v8477_v33, %v1129_v35  ;;  %v1191_v38 = vsel %vm1188_vm2, %v8478_v34, %v1125_v36 }
  0x94   : > { %v1321_v41 = vrot.slane %v1197_v37, 4  ;;  %v1318_v42 = vrot.slane %v1191_v38, 4  ;;  %v8493_v38 = vld [vmem:[%s8778_s22 + $0x88] sm:$0xff]  }
  0x96   : > { %1419 = vst.msk [vmem:[#allocation2 + $0x30] sm:$0xf0] %vm657_vm0, %v1321_v41  ;;  %1415 = vst.msk [vmem:[#allocation2 + $0x18] sm:$0xf0] %vm657_vm0, %v1318_v42  ;;  %v1131_v43 = vpop.permute.xlu1 %1130  ;;  %v1127_v44 = vpop.permute.xlu0 %1126 }
  0x97   : > { %v1200_v45 = vsel %vm1188_vm2, %v8479_v39, %v1131_v43  ;;  %v1194_v46 = vsel %vm1188_vm2, %v8480_v40, %v1127_v44  ;;  %v8494_v39 = vld [vmem:[%s8778_s22 + $0x80] sm:$0xff]  }
  0x98   : > { %v1322_v49 = vrot.slane %v1200_v45, 4  ;;  %v1319_v50 = vrot.slane %v1194_v46, 4 }
  0x9a   : > { %v1323_v51 = vsel %vm1317_vm3, %v1321_v41, %v1322_v49  ;;  %1421 = vst.msk [vmem:[#allocation2 + $0x40] sm:$0xf] %vm638_vm1, %v1322_v49  ;;  %v1320_v52 = vsel %vm1317_vm3, %v1318_v42, %v1319_v50  ;;  %1418 = vst.msk [vmem:[#allocation2 + $0x28] sm:$0xf] %vm638_vm1, %v1319_v50  ;;  %v1135_v53 = vpop.permute.xlu1 %1134  ;;  %v1133_v54 = vpop.permute.xlu0 %1132 }
  0x9b   : > { %1420 = vst.msk [vmem:[#allocation2 + $0x38] sm:$0xff] %vm1416_vm4, %v1323_v51  ;;  %1417 = vst.msk [vmem:[#allocation2 + $0x20] sm:$0xff] %vm1416_vm4, %v1320_v52  ;;  %v1206_v55 = vsel %vm1188_vm2, %v8481_v47, %v1135_v53  ;;  %v1203_v56 = vsel %vm1188_vm2, %v8482_v48, %v1133_v54  ;;  %v8495_v47 = vld [vmem:[%s8778_s22 + $0x98] sm:$0xff]   ;;  %v8496_v48 = vld [vmem:[%s8778_s22 + $0x90] sm:$0xff]  }
  0x9c   : > { %v1325_v59 = vrot.slane %v1206_v55, 4  ;;  %v1324_v60 = vrot.slane %v1203_v56, 4  ;;  %v8497_v56 = vld [vmem:[%s8778_s22 + $0xa8] sm:$0xff]  }
  0x9e   : > { %1424 = vst.msk [vmem:[#allocation2 + $0x58] sm:$0xf] %vm638_vm1, %v1325_v59  ;;  %v1326_v61 = vsel %vm1317_vm3, %v1324_v60, %v1325_v59  ;;  %v1139_v62 = vpop.permute.xlu1 %1138  ;;  %v1137_v63 = vpop.permute.xlu0 %1136 }
  0x9f   : > { %1422 = vst.msk [vmem:[#allocation2 + $0x48] sm:$0xf0] %vm657_vm0, %v1324_v60  ;;  %v1212_v0 = vsel %vm1188_vm2, %v8483_v57, %v1139_v62  ;;  %v1209_v1 = vsel %vm1188_vm2, %v8484_v58, %v1137_v63  ;;  %v8498_v57 = vld [vmem:[%s8778_s22 + $0xa0] sm:$0xff]  }
  0xa0   : > { %1423 = vst.msk [vmem:[#allocation2 + $0x50] sm:$0xff] %vm1416_vm4, %v1326_v61  ;;  %v1328_v4 = vrot.slane %v1212_v0, 4  ;;  %v1327_v5 = vrot.slane %v1209_v1, 4  ;;  %v8499_v1 = vld [vmem:[%s8778_s22 + $0xb8] sm:$0xff]  }
  0xa2   : > { %1427 = vst.msk [vmem:[#allocation2 + $0x70] sm:$0xf] %vm638_vm1, %v1328_v4  ;;  %v1329_v6 = vsel %vm1317_vm3, %v1327_v5, %v1328_v4  ;;  %v1143_v7 = vpop.permute.xlu1 %1142  ;;  %v1141_v8 = vpop.permute.xlu0 %1140 }
  0xa3   : > { %1425 = vst.msk [vmem:[#allocation2 + $0x60] sm:$0xf0] %vm657_vm0, %v1327_v5  ;;  %v1218_v9 = vsel %vm1188_vm2, %v8485_v2, %v1143_v7  ;;  %v1215_v10 = vsel %vm1188_vm2, %v8486_v3, %v1141_v8  ;;  %v8500_v2 = vld [vmem:[%s8778_s22 + $0xb0] sm:$0xff]  }
  0xa4   : > { %1426 = vst.msk [vmem:[#allocation2 + $0x68] sm:$0xff] %vm1416_vm4, %v1329_v6  ;;  %v1331_v13 = vrot.slane %v1218_v9, 4  ;;  %v1330_v14 = vrot.slane %v1215_v10, 4  ;;  %v8501_v10 = vld [vmem:[%s8778_s22 + $0xc8] sm:$0xff]  }
  0xa6   : > { %1430 = vst.msk [vmem:[#allocation2 + $0x88] sm:$0xf] %vm638_vm1, %v1331_v13  ;;  %v1332_v15 = vsel %vm1317_vm3, %v1330_v14, %v1331_v13  ;;  %v1147_v16 = vpop.permute.xlu1 %1146  ;;  %v1145_v17 = vpop.permute.xlu0 %1144 }
  0xa7   : > { %1428 = vst.msk [vmem:[#allocation2 + $0x78] sm:$0xf0] %vm657_vm0, %v1330_v14  ;;  %v1224_v18 = vsel %vm1188_vm2, %v8487_v11, %v1147_v16  ;;  %v1221_v19 = vsel %vm1188_vm2, %v8488_v12, %v1145_v17  ;;  %v8502_v11 = vld [vmem:[%s8778_s22 + $0xc0] sm:$0xff]  }
  0xa8   : > { %1429 = vst.msk [vmem:[#allocation2 + $0x80] sm:$0xff] %vm1416_vm4, %v1332_v15  ;;  %v1334_v22 = vrot.slane %v1224_v18, 4  ;;  %v1333_v23 = vrot.slane %v1221_v19, 4  ;;  %v8503_v19 = vld [vmem:[%s8778_s22 + $0xd8] sm:$0xff]  }
  0xaa   : > { %1433 = vst.msk [vmem:[#allocation2 + $0xa0] sm:$0xf] %vm638_vm1, %v1334_v22  ;;  %v1335_v24 = vsel %vm1317_vm3, %v1333_v23, %v1334_v22  ;;  %v1151_v25 = vpop.permute.xlu1 %1150  ;;  %v1149_v26 = vpop.permute.xlu0 %1148 }
  0xab   : > { %1431 = vst.msk [vmem:[#allocation2 + $0x90] sm:$0xf0] %vm657_vm0, %v1333_v23  ;;  %v1230_v27 = vsel %vm1188_vm2, %v8489_v20, %v1151_v25  ;;  %v1227_v28 = vsel %vm1188_vm2, %v8490_v21, %v1149_v26  ;;  %v8504_v20 = vld [vmem:[%s8778_s22 + $0xd0] sm:$0xff]  }
  0xac   : > { %1432 = vst.msk [vmem:[#allocation2 + $0x98] sm:$0xff] %vm1416_vm4, %v1335_v24  ;;  %v1337_v31 = vrot.slane %v1230_v27, 4  ;;  %v1336_v32 = vrot.slane %v1227_v28, 4  ;;  %v8505_v28 = vld [vmem:[%s8778_s22 + $0xe8] sm:$0xff]  }
  0xae   : > { %1436 = vst.msk [vmem:[#allocation2 + $0xb8] sm:$0xf] %vm638_vm1, %v1337_v31  ;;  %v1338_v33 = vsel %vm1317_vm3, %v1336_v32, %v1337_v31  ;;  %v1155_v34 = vpop.permute.xlu1 %1154  ;;  %v1153_v35 = vpop.permute.xlu0 %1152 }
  0xaf   : > { %1434 = vst.msk [vmem:[#allocation2 + $0xa8] sm:$0xf0] %vm657_vm0, %v1336_v32  ;;  %v1236_v36 = vsel %vm1188_vm2, %v8491_v29, %v1155_v34  ;;  %v1233_v37 = vsel %vm1188_vm2, %v8492_v30, %v1153_v35  ;;  %v8506_v29 = vld [vmem:[%s8778_s22 + $0xe0] sm:$0xff]  }
  0xb0   : > { %1435 = vst.msk [vmem:[#allocation2 + $0xb0] sm:$0xff] %vm1416_vm4, %v1338_v33  ;;  %v1340_v40 = vrot.slane %v1236_v36, 4  ;;  %v1339_v41 = vrot.slane %v1233_v37, 4  ;;  %v8507_v37 = vld [vmem:[%s8778_s22 + $0xf8] sm:$0xff]  }
  0xb2   : > { %1439 = vst.msk [vmem:[#allocation2 + $0xd0] sm:$0xf] %vm638_vm1, %v1340_v40  ;;  %v1341_v42 = vsel %vm1317_vm3, %v1339_v41, %v1340_v40  ;;  %v1159_v43 = vpop.permute.xlu1 %1158  ;;  %v1157_v44 = vpop.permute.xlu0 %1156 }
  0xb3   : > { %1437 = vst.msk [vmem:[#allocation2 + $0xc0] sm:$0xf0] %vm657_vm0, %v1339_v41  ;;  %v1242_v45 = vsel %vm1188_vm2, %v8493_v38, %v1159_v43  ;;  %v1239_v46 = vsel %vm1188_vm2, %v8494_v39, %v1157_v44  ;;  %v8508_v38 = vld [vmem:[%s8778_s22 + $0xf0] sm:$0xff]  }
  0xb4   : > { %1438 = vst.msk [vmem:[#allocation2 + $0xc8] sm:$0xff] %vm1416_vm4, %v1341_v42  ;;  %v1343_v49 = vrot.slane %v1242_v45, 4  ;;  %v1342_v50 = vrot.slane %v1239_v46, 4 }
  0xb6   : > { %1442 = vst.msk [vmem:[#allocation2 + $0xe8] sm:$0xf] %vm638_vm1, %v1343_v49  ;;  %v1344_v51 = vsel %vm1317_vm3, %v1342_v50, %v1343_v49  ;;  %v1163_v52 = vpop.permute.xlu1 %1162  ;;  %v1161_v53 = vpop.permute.xlu0 %1160  ;;  %v8560_v49 = vmov (!%p6529_p10), 0  }
  0xb7   : > { %1440 = vst.msk [vmem:[#allocation2 + $0xd8] sm:$0xf0] %vm657_vm0, %v1342_v50  ;;  %v1248_v54 = vsel %vm1188_vm2, %v8495_v47, %v1163_v52  ;;  %v1245_v55 = vsel %vm1188_vm2, %v8496_v48, %v1161_v53  ;;  %1468 = vst.msk [vmem:[#allocation2] sm:$0xf0] (!%p6529_p10), %vm657_vm0, %v8560_v49 }
  0xb8   : > { %1441 = vst.msk [vmem:[#allocation2 + $0xe0] sm:$0xff] %vm1416_vm4, %v1344_v51  ;;  %v1346_v58 = vrot.slane %v1248_v54, 4  ;;  %v1345_v59 = vrot.slane %v1245_v55, 4  ;;  %1469 = vst.msk [vmem:[#allocation2 + $0x8] sm:$0xff] (!%p6529_p10), %vm1416_vm4, %v8560_v49 }
  0xb9   : > { %1470 = vst.msk [vmem:[#allocation2 + $0x10] sm:$0xf] (!%p6529_p10), %vm638_vm1, %v8560_v49 }
  0xba   : > { %1445 = vst.msk [vmem:[#allocation2 + $0x100] sm:$0xf] %vm638_vm1, %v1346_v58  ;;  %v1347_v60 = vsel %vm1317_vm3, %v1345_v59, %v1346_v58  ;;  %v1167_v61 = vpop.permute.xlu1 %1166  ;;  %v1165_v62 = vpop.permute.xlu0 %1164 }
  0xbb   : > { %1443 = vst.msk [vmem:[#allocation2 + $0xf0] sm:$0xf0] %vm657_vm0, %v1345_v59  ;;  %v1254_v63 = vsel %vm1188_vm2, %v8497_v56, %v1167_v61  ;;  %v1251_v0 = vsel %vm1188_vm2, %v8498_v57, %v1165_v62 }
  0xbc   : > { %1444 = vst.msk [vmem:[#allocation2 + $0xf8] sm:$0xff] %vm1416_vm4, %v1347_v60  ;;  %v1349_v3 = vrot.slane %v1254_v63, 4  ;;  %v1348_v4 = vrot.slane %v1251_v0, 4 }
  0xbe   : > { %1448 = vst.msk [vmem:[#allocation2 + $0x118] sm:$0xf] %vm638_vm1, %v1349_v3  ;;  %v1350_v5 = vsel %vm1317_vm3, %v1348_v4, %v1349_v3  ;;  %v1171_v6 = vpop.permute.xlu1 %1170  ;;  %v1169_v7 = vpop.permute.xlu0 %1168 }
  0xbf   : > { %1446 = vst.msk [vmem:[#allocation2 + $0x108] sm:$0xf0] %vm657_vm0, %v1348_v4  ;;  %v1260_v8 = vsel %vm1188_vm2, %v8499_v1, %v1171_v6  ;;  %v1257_v9 = vsel %vm1188_vm2, %v8500_v2, %v1169_v7 }
  0xc0   : > { %1447 = vst.msk [vmem:[#allocation2 + $0x110] sm:$0xff] %vm1416_vm4, %v1350_v5  ;;  %v1352_v12 = vrot.slane %v1260_v8, 4  ;;  %v1351_v13 = vrot.slane %v1257_v9, 4 }
  0xc2   : > { %1451 = vst.msk [vmem:[#allocation2 + $0x130] sm:$0xf] %vm638_vm1, %v1352_v12  ;;  %v1353_v14 = vsel %vm1317_vm3, %v1351_v13, %v1352_v12  ;;  %v1175_v15 = vpop.permute.xlu1 %1174  ;;  %v1173_v16 = vpop.permute.xlu0 %1172 }
  0xc3   : > { %1449 = vst.msk [vmem:[#allocation2 + $0x120] sm:$0xf0] %vm657_vm0, %v1351_v13  ;;  %v1266_v17 = vsel %vm1188_vm2, %v8501_v10, %v1175_v15  ;;  %v1263_v18 = vsel %vm1188_vm2, %v8502_v11, %v1173_v16 }
  0xc4   : > { %1450 = vst.msk [vmem:[#allocation2 + $0x128] sm:$0xff] %vm1416_vm4, %v1353_v14  ;;  %v1355_v21 = vrot.slane %v1266_v17, 4  ;;  %v1354_v22 = vrot.slane %v1263_v18, 4 }
  0xc6   : > { %1454 = vst.msk [vmem:[#allocation2 + $0x148] sm:$0xf] %vm638_vm1, %v1355_v21  ;;  %v1356_v23 = vsel %vm1317_vm3, %v1354_v22, %v1355_v21  ;;  %v1179_v24 = vpop.permute.xlu1 %1178  ;;  %v1177_v25 = vpop.permute.xlu0 %1176 }
  0xc7   : > { %1452 = vst.msk [vmem:[#allocation2 + $0x138] sm:$0xf0] %vm657_vm0, %v1354_v22  ;;  %v1272_v26 = vsel %vm1188_vm2, %v8503_v19, %v1179_v24  ;;  %v1269_v27 = vsel %vm1188_vm2, %v8504_v20, %v1177_v25 }
  0xc8   : > { %1453 = vst.msk [vmem:[#allocation2 + $0x140] sm:$0xff] %vm1416_vm4, %v1356_v23  ;;  %v1358_v30 = vrot.slane %v1272_v26, 4  ;;  %v1357_v31 = vrot.slane %v1269_v27, 4 }
  0xca   : > { %1457 = vst.msk [vmem:[#allocation2 + $0x160] sm:$0xf] %vm638_vm1, %v1358_v30  ;;  %v1359_v32 = vsel %vm1317_vm3, %v1357_v31, %v1358_v30  ;;  %v1183_v33 = vpop.permute.xlu1 %1182  ;;  %v1181_v34 = vpop.permute.xlu0 %1180 }
  0xcb   : > { %1455 = vst.msk [vmem:[#allocation2 + $0x150] sm:$0xf0] %vm657_vm0, %v1357_v31  ;;  %v1278_v35 = vsel %vm1188_vm2, %v8505_v28, %v1183_v33  ;;  %v1275_v36 = vsel %vm1188_vm2, %v8506_v29, %v1181_v34 }
  0xcc   : > { %1456 = vst.msk [vmem:[#allocation2 + $0x158] sm:$0xff] %vm1416_vm4, %v1359_v32  ;;  %v1361_v39 = vrot.slane %v1278_v35, 4  ;;  %v1360_v40 = vrot.slane %v1275_v36, 4 }
  0xce   : > { %1460 = vst.msk [vmem:[#allocation2 + $0x178] sm:$0xf] %vm638_vm1, %v1361_v39  ;;  %v1362_v41 = vsel %vm1317_vm3, %v1360_v40, %v1361_v39  ;;  %v1187_v42 = vpop.permute.xlu1 %1186  ;;  %v1185_v43 = vpop.permute.xlu0 %1184  ;;  %1467 = sbr.rel (%p6529_p10) target bundleno = 213 (0xd5), region = 56 }
  0xcf   : > { %1458 = vst.msk [vmem:[#allocation2 + $0x168] sm:$0xf0] %vm657_vm0, %v1360_v40  ;;  %v1284_v44 = vsel %vm1188_vm2, %v8507_v37, %v1187_v42  ;;  %v1281_v45 = vsel %vm1188_vm2, %v8508_v38, %v1185_v43 }
  0xd0   : > { %1459 = vst.msk [vmem:[#allocation2 + $0x170] sm:$0xff] %vm1416_vm4, %v1362_v41  ;;  %v1364_v46 = vrot.slane %v1284_v44, 4  ;;  %v1363_v47 = vrot.slane %v1281_v45, 4 }
  0xd2   : > { %1463 = vst.msk [vmem:[#allocation2 + $0x190] sm:$0xf] %vm638_vm1, %v1364_v46  ;;  %v1365_v48 = vsel %vm1317_vm3, %v1363_v47, %v1364_v46 }
  0xd3   : > { %1461 = vst.msk [vmem:[#allocation2 + $0x180] sm:$0xf0] %vm657_vm0, %v1363_v47 }
  0xd4   : > { %1462 = vst.msk [vmem:[#allocation2 + $0x188] sm:$0xff] %vm1416_vm4, %v1365_v48 }
  0xd5 PF: > { %p6530_p11 = scmp.le.s32.totalorder %s8540_s27, 0 }
  0xd6   : > { %v8509_v50 = vld [vmem:[%s8733_s15] sm:$0xff] (!%p6530_p11)   ;;  %s8561_s19 = smov (!%p6530_p11), 4   ;;  %v8510_v51 = vld [vmem:[%s8733_s15 + $0x8] sm:$0xff] (!%p6530_p11)  }
  0xd7   : > { %1474 = sbr.rel (%p6530_p11) target bundleno = 339 (0x153), region = 60  ;;  %1503 = vrot.lane.b32.xlu0 (!%p6530_p11), %v8509_v50, %s8561_s19  ;;  %v8511_v52 = vld [vmem:[%s8722_s13] sm:$0xff] (!%p6530_p11)   ;;  %v8512_v55 = vld [vmem:[%s8722_s13 + $0x8] sm:$0xff] (!%p6530_p11)  }
  0xdb   : > { %1505 = vrot.lane.b32.xlu0 (!%p6530_p11), %v8510_v51, %s8561_s19 }
 0x149   : > { %v1504_v53 = vpop.permute.xlu0 %1503 }
 0x14a   : > { %v1509_v54 = vsel %vm1188_vm2, %v8511_v52, %v1504_v53 }
 0x14b   : > { %v1515_v56 = vrot.slane %v1509_v54, 4 }
 0x14d   : > { %1521 = vst.msk [vmem:[#allocation2] sm:$0xf0] %vm657_vm0, %v1515_v56  ;;  %v1506_v57 = vpop.permute.xlu0 %1505 }
 0x14e   : > { %v1512_v58 = vsel %vm1188_vm2, %v8512_v55, %v1506_v57 }
 0x14f   : > { %v1516_v59 = vrot.slane %v1512_v58, 4 }
 0x151   : > { %v1517_v60 = vsel %vm1317_vm3, %v1515_v56, %v1516_v59  ;;  %1523 = vst.msk [vmem:[#allocation2 + $0x10] sm:$0xf] %vm638_vm1, %v1516_v59 }
 0x152   : > { %1522 = vst.msk [vmem:[#allocation2 + $0x8] sm:$0xff] %vm1416_vm4, %v1517_v60 }
 0x153 PF: > { %p6535_p12 = scmp.ne.s32.totalorder %s8540_s27, 1 }
 0x154   : > { %v8562_v61 = vmov (!%p6535_p12), 0  }
 0x155   : > { %1527 = sbr.rel (%p6535_p12) target bundleno = 348 (0x15c), region = 64  ;;  %1529 = vst.msk [vmem:[#allocation2 + $0x198] sm:$0xf0] (!%p6535_p12), %vm657_vm0, %v8562_v61 }
 0x156   : > { %1530 = vst.msk [vmem:[#allocation2 + $0x1a0] sm:$0xff] (!%p6535_p12), %vm1416_vm4, %v8562_v61 }
 0x157   : > { %1531 = vst.msk [vmem:[#allocation2 + $0x1a8] sm:$0xf] (!%p6535_p12), %vm638_vm1, %v8562_v61 }
 0x15c PF: > { %p6536_p13 = scmp.ge.s32.totalorder %s8540_s27, 1 }
 0x15d   : > { %v8513_v62 = vld [vmem:[%s8738_s14] sm:$0xff] (!%p6536_p13)   ;;  %s8563_s24 = smov (!%p6536_p13), 4   ;;  %v8514_v63 = vld [vmem:[%s8738_s14 + $0x8] sm:$0xff] (!%p6536_p13)  }
 0x15e   : > { %1535 = sbr.rel (%p6536_p13) target bundleno = 474 (0x1da), region = 68  ;;  %1564 = vrot.lane.b32.xlu0 (!%p6536_p13), %v8513_v62, %s8563_s24  ;;  %v8515_v0 = vld [vmem:[%s8728_s23] sm:$0xff] (!%p6536_p13)   ;;  %v8516_v3 = vld [vmem:[%s8728_s23 + $0x8] sm:$0xff] (!%p6536_p13)  }
 0x162   : > { %1566 = vrot.lane.b32.xlu0 (!%p6536_p13), %v8514_v63, %s8563_s24 }
 0x1d0   : > { %v1565_v1 = vpop.permute.xlu0 %1564 }
 0x1d1   : > { %v1570_v2 = vsel %vm1188_vm2, %v8515_v0, %v1565_v1 }
 0x1d2   : > { %v1576_v4 = vrot.slane %v1570_v2, 4 }
 0x1d4   : > { %1583 = vst.msk [vmem:[#allocation2 + $0x198] sm:$0xf0] %vm657_vm0, %v1576_v4  ;;  %v1567_v5 = vpop.permute.xlu0 %1566 }
 0x1d5   : > { %v1573_v6 = vsel %vm1188_vm2, %v8516_v3, %v1567_v5 }
 0x1d6   : > { %v1577_v7 = vrot.slane %v1573_v6, 4 }
 0x1d8   : > { %v1578_v8 = vsel %vm1317_vm3, %v1576_v4, %v1577_v7  ;;  %1585 = vst.msk [vmem:[#allocation2 + $0x1a8] sm:$0xf] %vm638_vm1, %v1577_v7 }
 0x1d9   : > { %1584 = vst.msk [vmem:[#allocation2 + $0x1a0] sm:$0xff] %vm1416_vm4, %v1578_v8 }
 0x1da PF: > { %v6639_v9 = vld [vmem:[%s10910_s6 + $0x4] sm:$0xf]  ;;  %v6541_v10 = vld [vmem:[%s10910_s6 + $0xc] sm:$0xf]  ;;  %v8988_v15 = vld [vmem:[#allocation2 + $0x10] sm:$0xff]  ;;  %vm6133_vm7 = vcmask 27648  }
 0x1db   : > { %v8978_v11 = vld [vmem:[#allocation2] sm:$0xff]  ;;  %8393 = vmatprep.subr.msk.bf16.mxu0 %vm1317_vm3, %v6639_v9  ;;  %v8982_v12 = vsel %vm1317_vm3, %v6639_v9, 0  ;;  %8389 = vmatprep.subr.msk.bf16.mxu1 %vm1317_vm3, %v6541_v10  ;;  %v8985_v13 = vld [vmem:[#allocation2 + $0x8] sm:$0xff]  ;;  %v2210_v17 = vsel %vm1317_vm3, %v6541_v10, 0  ;;  %v8993_v18 = vld [vmem:[#allocation2 + $0x18] sm:$0xff]  ;;  %v3220_v20 = vrot.slane %v8988_v15, 4 }
 0x1dc   : > { %11153 = vst [vmem:[#allocation3_spill] sm:$0xff] %v8982_v12  ;;  %11154 = vst [vmem:[#allocation4_spill] sm:$0xff] %v8985_v13  ;;  %v3217_v14 = vrot.slane %v8978_v11, 4  ;;  %7546 = vmatpush3.bf16.msra.mxu0 %v8982_v12  ;;  %v3218_v16 = vrot.slane %v8985_v13, 4  ;;  %v8995_v19 = vld [vmem:[#allocation2 + $0x20] sm:$0xff]  ;;  %7282 = vmatpush3.bf16.msra.mxu1 %v2210_v17  ;;  %v10946_v22 = vshrl.u32 %v8993_v18, 16 }
 0x1dd   : > { %v10945_v23 = vshll.u32 %v8993_v18, 16  ;;  %v10944_v24 = vshrl.u32 %v8995_v19, 16  ;;  %v2109_v25 = vld [vmem:[%s10910_s6] sm:$0xf]  ;;  %v9005_v26 = vld [vmem:[#allocation2 + $0x28] sm:$0xff]  ;;  %v9021_v32 = vld [vmem:[#allocation2 + $0x30] sm:$0xff] }
 0x1de   : > { %v3219_v21 = vsel %vm1317_vm3, %v3217_v14, %v3218_v16  ;;  %v3221_v27 = vsel %vm1317_vm3, %v3218_v16, %v3220_v20  ;;  %8390 = vmatprep.subr.msk.bf16.mxu1 %vm1317_vm3, %v2109_v25  ;;  %v6705_v28 = vld [vmem:[%s10910_s6 + $0x1c] sm:$0xf]  ;;  %vm1640_vm5 = vsmask.f32 4352  ;;  %v1670_v29 = vrot.slane %v10946_v22, 3  ;;  %v9038_v46 = vld [vmem:[#allocation2 + $0x40] sm:$0xff] }
 0x1df   : > { %7547 = vmatprep.mubr.msk.bf16.mxu0 %vm1416_vm4, %v3219_v21  ;;  %v1673_v30 = vrot.slane %v10945_v23, 4  ;;  %v1678_v31 = vrot.slane %v10944_v24, 3  ;;  %8395 = vmatprep.subr.msk.bf16.mxu0 %vm1317_vm3, %v6705_v28  ;;  %v10943_v33 = vshll.u32 %v8995_v19, 16  ;;  %v2508_v34 = vsel %vm1317_vm3, %v2109_v25, 0  ;;  %v9027_v37 = vld [vmem:[#allocation2 + $0x38] sm:$0xff]  ;;  %11155 = vst [vmem:[#allocation5_spill] sm:$0xff] %v9038_v46 }
 0x1e0   : > { %7548 = vmatmul.mubr.msk.bf16.vlgmr.msra.gmra.mrb[0].mxu0 %vm1416_vm4, %v3221_v27  ;;  %v4006_v35 = vsel %vm1317_vm3, %v6705_v28, 0  ;;  %v10942_v36 = vshrl.u32 %v9005_v26, 16  ;;  %v10941_v39 = vshll.u32 %v9005_v26, 16  ;;  %v3222_v40 = vrot.slane %v8993_v18, 4  ;;  %v9060_v59 = vld [vmem:[#allocation2 + $0x48] sm:$0xff]  ;;  %v9069_v0 = vld [vmem:[#allocation2 + $0x50] sm:$0xff] }
 0x1e1   : > { %v1674_v38 = vor.u32 %v1673_v30, %v1670_v29  ;;  %7612 = vmatpush3.bf16.msra.mxu0 %v4006_v35  ;;  %v3223_v41 = vrot.slane %v8995_v19, 4  ;;  %v1681_v42 = vrot.slane %v10943_v33, 4  ;;  %v3225_v44 = vrot.slane %v9005_v26, 4  ;;  %11158 = vst [vmem:[#allocation8_spill] sm:$0xff] %v9060_v59  ;;  %11159 = vst [vmem:[#allocation9_spill] sm:$0xff] %v9069_v0  ;;  %v9092_v10 = vld [vmem:[#allocation2 + $0x58] sm:$0xff] }
 0x1e2   : > { %v1687_v43 = vrot.slane %v10942_v36, 3  ;;  %v10934_v45 = vshrl.u32 %v9021_v32, 16  ;;  %v1690_v47 = vrot.slane %v10941_v39, 4  ;;  %v10933_v49 = vshll.u32 %v9021_v32, 16  ;;  %v9084_v5 = vld [vmem:[%s10910_s6 + $0x14] sm:$0xf] }
 0x1e3   : > { %v9043_v48 = vsel %vm1317_vm3, %v3222_v40, %v3223_v41  ;;  %v10932_v50 = vshrl.u32 %v9027_v37, 16  ;;  %v1682_v51 = vor.u32 %v1681_v42, %v1678_v31  ;;  %v9050_v52 = vsel %vm1317_vm3, %v3223_v41, %v3225_v44  ;;  %11160 = vst [vmem:[#allocation10_spill] sm:$0xff] %v9092_v10  ;;  %8396 = vmatprep.subr.msk.bf16.mxu0 %vm1317_vm3, %v9084_v5  ;;  %v9126_v42 = vld [vmem:[#allocation2 + $0x68] sm:$0xff] }
 0x1e4   : > { %11156 = vst [vmem:[#allocation6_spill] sm:$0xff] %v9043_v48  ;;  %7551 = vmatprep.mubr.msk.bf16.mxu0 %vm1416_vm4, %v9043_v48  ;;  %11157 = vst [vmem:[#allocation7_spill] sm:$0xff] %v9050_v52  ;;  %v1696_v53 = vrot.slane %v10934_v45, 3  ;;  %v10931_v54 = vshll.u32 %v9027_v37, 16  ;;  %v1691_v55 = vor.u32 %v1690_v47, %v1687_v43  ;;  %v1699_v56 = vrot.slane %v10933_v49, 4  ;;  %v9246_v45 = vld [vmem:[#allocation2 + $0xa0] sm:$0xff] }
 0x1e5   : > { %v1704_v57 = vrot.slane %v10932_v50, 3  ;;  %v10930_v58 = vshrl.u32 %v9038_v46, 16  ;;  %v9063_v60 = vsel %vm1640_vm5, %v1674_v38, %v1682_v51  ;;  %v10929_v62 = vshll.u32 %v9038_v46, 16  ;;  %11164 = vst [vmem:[#allocation14_spill] sm:$0xff] %v9126_v42  ;;  %11176 = vst [vmem:[#allocation26_spill] sm:$0xff] %v9246_v45 }
 0x1e6   : > { %v1707_v61 = vrot.slane %v10931_v54, 4  ;;  %v3227_v63 = vrot.slane %v9021_v32, 4  ;;  %7283 = vmatprep.mubr.msk.bf16.mxu1 %vm1416_vm4, %v9063_v60  ;;  %v9074_v1 = vsel %vm1640_vm5, %v1682_v51, %v1691_v55  ;;  %v1700_v2 = vor.u32 %v1699_v56, %v1696_v53  ;;  %v9133_v53 = vld [vmem:[#allocation2 + $0x70] sm:$0xff] }
 0x1e7   : > { %v1713_v3 = vrot.slane %v10930_v58, 3  ;;  %v3228_v4 = vrot.slane %v9027_v37, 4  ;;  %7284 = vmatmul.mubr.msk.bf16.vlgmr.msra.gmra.mrb[0].mxu1 %vm1416_vm4, %v9074_v1  ;;  %v1716_v7 = vrot.slane %v10929_v62, 4  ;;  %v3230_v8 = vrot.slane %v9038_v46, 4  ;;  %11165 = vst [vmem:[#allocation15_spill] sm:$0xff] %v9133_v53 }
 0x1e8   : > { %7552 = vmatmul.mubr.msk.bf16.gmra.mrb[4].mxu0 %vm1416_vm4, %v9050_v52  ;;  %v1708_v6 = vor.u32 %v1707_v61, %v1704_v57  ;;  %v10928_v9 = vshrl.u32 %v9060_v59, 16  ;;  %7348 = vmatpush3.bf16.msra.mxu1 %v2508_v34  ;;  %v10923_v16 = vshll.u32 %v9060_v59, 16  ;;  %v10920_v17 = vshrl.u32 %v9069_v0, 16  ;;  %v9118_v34 = vld [vmem:[#allocation2 + $0x60] sm:$0xff] }
 0x1e9   : > { %v9097_v14 = vsel %vm1317_vm3, %v3227_v63, %v3228_v4  ;;  %v10919_v20 = vshll.u32 %v9069_v0, 16  ;;  %v1717_v25 = vor.u32 %v1716_v7, %v1713_v3  ;;  %v10918_v31 = vshrl.u32 %v9092_v10, 16  ;;  %11162 = vst [vmem:[#allocation12_spill] sm:$0xff] %v9118_v34 }
 0x1ea   : > { %11161 = vst [vmem:[#allocation11_spill] sm:$0xff] %v9097_v14  ;;  %v9103_v21 = vsel %vm1640_vm5, %v1700_v2, %v1708_v6  ;;  %7555 = vmatprep.mubr.msk.bf16.mxu0 %vm1416_vm4, %v9097_v14  ;;  %v1722_v27 = vrot.slane %v10928_v9, 3  ;;  %v1725_v28 = vrot.slane %v10923_v16, 4  ;;  %v1730_v29 = vrot.slane %v10920_v17, 3 }
 0x1eb   : > { %7287 = vmatprep.mubr.msk.bf16.mxu1 %vm1416_vm4, %v9103_v21  ;;  %v1733_v30 = vrot.slane %v10919_v20, 4  ;;  %v9121_v35 = vsel %vm1317_vm3, %v3228_v4, %v3230_v8  ;;  %v10915_v38 = vshll.u32 %v9092_v10, 16  ;;  %v3232_v40 = vrot.slane %v9060_v59, 4 }
 0x1ec   : > { %11163 = vst [vmem:[#allocation13_spill] sm:$0xff] %v9121_v35  ;;  %v3233_v41 = vrot.slane %v9069_v0, 4  ;;  %v9129_v43 = vsel %vm1640_vm5, %v1708_v6, %v1717_v25  ;;  %v1726_v44 = vor.u32 %v1725_v28, %v1722_v27  ;;  %v1739_v51 = vrot.slane %v10918_v31, 3  ;;  %v9153_v6 = vld [vmem:[%s10910_s6 + $0x18] sm:$0xf] }
 0x1ed   : > { %v1734_v47 = vor.u32 %v1733_v30, %v1730_v29  ;;  %v1742_v55 = vrot.slane %v10915_v38, 4  ;;  %v10914_v57 = vshrl.u32 %v9118_v34, 16  ;;  %v10913_v61 = vshll.u32 %v9118_v34, 16  ;;  %v9164_v28 = vld [vmem:[#allocation2 + $0x78] sm:$0xff]  ;;  %8391 = vmatprep.subr.msk.bf16.mxu1 %vm1317_vm3, %v9153_v6 }
 0x1ee   : > { %v9138_v56 = vsel %vm1317_vm3, %v3232_v40, %v3233_v41  ;;  %v3235_v2 = vrot.slane %v9092_v10, 4  ;;  %v10916_v3 = vshrl.u32 %v9126_v42, 16  ;;  %v10917_v4 = vshll.u32 %v9126_v42, 16  ;;  %11167 = vst [vmem:[#allocation17_spill] sm:$0xff] %v9164_v28 }
 0x1ef   : > { %11166 = vst [vmem:[#allocation16_spill] sm:$0xff] %v9138_v56  ;;  %v9145_v63 = vsel %vm1640_vm5, %v1726_v44, %v1734_v47  ;;  %7288 = vmatmul.mubr.msk.bf16.gmra.mrb[4].mxu1 %vm1416_vm4, %v9129_v43  ;;  %v1743_v7 = vor.u32 %v1742_v55, %v1739_v51  ;;  %v1748_v8 = vrot.slane %v10914_v57, 3  ;;  %v1751_v25 = vrot.slane %v10913_v61, 4  ;;  %v9174_v51 = vld [vmem:[#allocation2 + $0x80] sm:$0xff] }
 0x1f0   : > { %7556 = vmatmul.mubr.msk.bf16.gmra.mrb[8].mxu0 %vm1416_vm4, %v9121_v35  ;;  %v10922_v27 = vshrl.u32 %v9133_v53, 16  ;;  %7291 = vmatprep.mubr.msk.bf16.mxu1 %vm1416_vm4, %v9145_v63  ;;  %v1756_v29 = vrot.slane %v10916_v3, 3  ;;  %v1759_v30 = vrot.slane %v10917_v4, 4  ;;  %v10921_v40 = vshll.u32 %v9133_v53, 16  ;;  %11168 = vst [vmem:[#allocation18_spill] sm:$0xff] %v9174_v51 }
 0x1f1   : > { %7559 = vmatprep.mubr.msk.bf16.mxu0 %vm1416_vm4, %v9138_v56  ;;  %v3237_v44 = vrot.slane %v9118_v34, 4  ;;  %v1752_v55 = vor.u32 %v1751_v25, %v1748_v8  ;;  %v3238_v61 = vrot.slane %v9126_v42, 4  ;;  %v9180_v57 = vsel %vm1317_vm3, %v3233_v41, %v3235_v2  ;;  %v9190_v25 = vld [vmem:[#allocation2 + $0x88] sm:$0xff] }
 0x1f2   : > { %11169 = vst [vmem:[#allocation19_spill] sm:$0xff] %v9180_v57  ;;  %v1760_v38 = vor.u32 %v1759_v30, %v1756_v29  ;;  %v1765_v3 = vrot.slane %v10922_v27, 3  ;;  %v10927_v4 = vshrl.u32 %v9164_v28, 16  ;;  %v1768_v31 = vrot.slane %v10921_v40, 4  ;;  %11170 = vst [vmem:[#allocation20_spill] sm:$0xff] %v9190_v25 }
 0x1f3   : > { %v10924_v20 = vshll.u32 %v9164_v28, 16  ;;  %v10926_v17 = vshrl.u32 %v9174_v51, 16  ;;  %v10925_v8 = vshll.u32 %v9174_v51, 16  ;;  %v9193_v41 = vsel %vm1640_vm5, %v1734_v47, %v1743_v7 }
 0x1f4   : > { %v9196_v2 = vsel %vm1317_vm3, %v3237_v44, %v3238_v61  ;;  %v1774_v29 = vrot.slane %v10927_v4, 3  ;;  %v9201_v30 = vsel %vm1640_vm5, %v1752_v55, %v1760_v38  ;;  %v10935_v47 = vshrl.u32 %v9190_v25, 16  ;;  %v9213_v44 = vld [vmem:[#allocation2 + $0x90] sm:$0xff]  ;;  %v9215_v55 = vld [vmem:[#allocation2 + $0x98] sm:$0xff] }
 0x1f5   : > { %11171 = vst [vmem:[#allocation21_spill] sm:$0xff] %v9196_v2  ;;  %v1777_v40 = vrot.slane %v10924_v20, 4  ;;  %v1782_v27 = vrot.slane %v10926_v17, 3  ;;  %v1785_v16 = vrot.slane %v10925_v8, 4  ;;  %v10936_v7 = vshll.u32 %v9190_v25, 16  ;;  %11172 = vst [vmem:[#allocation22_spill] sm:$0xff] %v9213_v44 }
 0x1f6   : > { %11173 = vst [vmem:[#allocation23_spill] sm:$0xff] %v9215_v55  ;;  %v1769_v20 = vor.u32 %v1768_v31, %v1765_v3  ;;  %v3240_v8 = vrot.slane %v9133_v53, 4  ;;  %v3242_v9 = vrot.slane %v9164_v28, 4  ;;  %v3243_v62 = vrot.slane %v9174_v51, 4 }
 0x1f7   : > { %7292 = vmatmul.mubr.msk.bf16.gmra.mrb[8].mxu1 %vm1416_vm4, %v9193_v41  ;;  %v1778_v17 = vor.u32 %v1777_v40, %v1774_v29  ;;  %v1786_v4 = vor.u32 %v1785_v16, %v1782_v27  ;;  %v10940_v58 = vshrl.u32 %v9213_v44, 16  ;;  %v10939_v54 = vshll.u32 %v9213_v44, 16 }
 0x1f8   : > { %7560 = vmatmul.mubr.msk.bf16.gmra.mrb[12].mxu0 %vm1416_vm4, %v9180_v57  ;;  %7295 = vmatprep.mubr.msk.bf16.mxu1 %vm1416_vm4, %v9201_v30  ;;  %v10937_v31 = vshrl.u32 %v9215_v55, 16  ;;  %v10938_v3 = vshll.u32 %v9215_v55, 16  ;;  %v1791_v50 = vrot.slane %v10935_v47, 3  ;;  %v1794_v49 = vrot.slane %v10936_v7, 4 }
 0x1f9   : > { %7563 = vmatprep.mubr.msk.bf16.mxu0 %vm1416_vm4, %v9196_v2  ;;  %v9235_v16 = vsel %vm1317_vm3, %v3238_v61, %v3240_v8  ;;  %v9238_v27 = vsel %vm1640_vm5, %v1760_v38, %v1769_v20  ;;  %v9241_v40 = vsel %vm1640_vm5, %v1778_v17, %v1786_v4  ;;  %v9244_v29 = vsel %vm1317_vm3, %v3242_v9, %v3243_v62  ;;  %v9256_v38 = vld [vmem:[#allocation2 + $0xa8] sm:$0xff]  ;;  %v9258_v17 = vld [vmem:[#allocation2 + $0xb0] sm:$0xff] }
 0x1fa   : > { %11174 = vst [vmem:[#allocation24_spill] sm:$0xff] %v9235_v16  ;;  %11175 = vst [vmem:[#allocation25_spill] sm:$0xff] %v9244_v29  ;;  %v1800_v47 = vrot.slane %v10940_v58, 3  ;;  %v1803_v7 = vrot.slane %v10939_v54, 4  ;;  %v1808_v61 = vrot.slane %v10937_v31, 3  ;;  %v1811_v20 = vrot.slane %v10938_v3, 4 }
 0x1fb   : > { %11177 = vst [vmem:[#allocation27_spill] sm:$0xff] %v9256_v38  ;;  %11178 = vst [vmem:[#allocation28_spill] sm:$0xff] %v9258_v17  ;;  %v1795_v9 = vor.u32 %v1794_v49, %v1791_v50  ;;  %v3245_v8 = vrot.slane %v9190_v25, 4  ;;  %v10948_v31 = vshrl.u32 %v9246_v45, 16  ;;  %v3247_v54 = vrot.slane %v9213_v44, 4 }
 0x1fc   : > { %v3248_v58 = vrot.slane %v9215_v55, 4  ;;  %v1804_v33 = vor.u32 %v1803_v7, %v1800_v47  ;;  %v1812_v24 = vor.u32 %v1811_v20, %v1808_v61  ;;  %v11180_v12 = vshll.u32 %v9246_v45, 16 }
 0x1fd   : > { %v9278_v23 = vsel %vm1317_vm3, %v3243_v62, %v3245_v8  ;;  %v9281_v22 = vsel %vm1640_vm5, %v1786_v4, %v1795_v9  ;;  %v1817_v3 = vrot.slane %v10948_v31, 3  ;;  %v11182_v39 = vshrl.u32 %v9256_v38, 16  ;;  %v9298_v9 = vld [vmem:[#allocation2 + $0xb8] sm:$0xff] }
 0x1fe   : > { %11179 = vst [vmem:[#allocation29_spill] sm:$0xff] %v9278_v23  ;;  %v1820_v49 = vrot.slane %v11180_v12, 4  ;;  %v9288_v50 = vsel %vm1317_vm3, %v3247_v54, %v3248_v58  ;;  %v11183_v47 = vshll.u32 %v9256_v38, 16  ;;  %v11184_v62 = vshrl.u32 %v9258_v17, 16  ;;  %11186 = vst [vmem:[#allocation31_spill] sm:$0xff] %v9298_v9  ;;  %v9305_v12 = vld [vmem:[#allocation2 + $0xc0] sm:$0xff] }
 0x1ff   : > { %7296 = vmatmul.mubr.msk.bf16.gmra.mrb[12].mxu1 %vm1416_vm4, %v9238_v27  ;;  %11181 = vst [vmem:[#allocation30_spill] sm:$0xff] %v9288_v50  ;;  %v1826_v36 = vrot.slane %v11182_v39, 3  ;;  %v11185_v4 = vshll.u32 %v9258_v17, 16  ;;  %v9301_v8 = vsel %vm1640_vm5, %v1804_v33, %v1812_v24  ;;  %11187 = vst [vmem:[#allocation32_spill] sm:$0xff] %v9305_v12  ;;  %v9307_v39 = vld [vmem:[#allocation2 + $0xc8] sm:$0xff]  ;;  %v3252_v52 = vrot.slane %v9256_v38, 4 }
 0x200   : > { %7564 = vmatmul.mubr.msk.bf16.gmra.mrb[16].mxu0 %vm1416_vm4, %v9235_v16  ;;  %7299 = vmatprep.mubr.msk.bf16.mxu1 %vm1416_vm4, %v9241_v40  ;;  %v1829_v7 = vrot.slane %v11183_v47, 4  ;;  %v1834_v61 = vrot.slane %v11184_v62, 3  ;;  %11188 = vst [vmem:[#allocation33_spill] sm:$0xff] %v9307_v39  ;;  %v1821_v54 = vor.u32 %v1820_v49, %v1817_v3  ;;  %v3250_v47 = vrot.slane %v9246_v45, 4 }
 0x201   : > { %7567 = vmatprep.mubr.msk.bf16.mxu0 %vm1416_vm4, %v9244_v29  ;;  %v1837_v20 = vrot.slane %v11185_v4, 4  ;;  %v3253_v48 = vrot.slane %v9258_v17, 4  ;;  %v10960_v3 = vshrl.u32 %v9305_v12, 16  ;;  %v10959_v55 = vshrl.u32 %v9307_v39, 16 }
 0x202   : > { %v1830_v4 = vor.u32 %v1829_v7, %v1826_v36  ;;  %v9325_v62 = vsel %vm1317_vm3, %v3248_v58, %v3250_v47  ;;  %v11190_v33 = vshrl.u32 %v9298_v9, 16  ;;  %v11191_v36 = vshll.u32 %v9298_v9, 16 }
 0x203   : > { %v1838_v31 = vor.u32 %v1837_v20, %v1834_v61  ;;  %11189 = vst [vmem:[#allocation34_spill] sm:$0xff] %v9325_v62  ;;  %v9332_v61 = vsel %vm1640_vm5, %v1812_v24, %v1821_v54  ;;  %v9338_v49 = vsel %vm1317_vm3, %v3252_v52, %v3253_v48  ;;  %v1852_v45 = vrot.slane %v10960_v3, 3  ;;  %v9348_v24 = vld [vmem:[#allocation2 + $0xd0] sm:$0xff]  ;;  %v9350_v54 = vld [vmem:[#allocation2 + $0xd8] sm:$0xff]  ;;  %v9354_v52 = vld [vmem:[#allocation2 + $0xe0] sm:$0xff] }
 0x204   : > { %v1843_v44 = vrot.slane %v11190_v33, 3  ;;  %v1846_v7 = vrot.slane %v11191_v36, 4  ;;  %11193 = vst [vmem:[#allocation36_spill] sm:$0xff] %v9338_v49  ;;  %v11194_v58 = vshll.u32 %v9305_v12, 16  ;;  %v1860_v33 = vrot.slane %v10959_v55, 3  ;;  %11196 = vst [vmem:[#allocation37_spill] sm:$0xff] %v9354_v52 }
 0x205   : > { %v9335_v20 = vsel %vm1640_vm5, %v1830_v4, %v1838_v31  ;;  %v11195_v36 = vshll.u32 %v9307_v39, 16  ;;  %v10975_v55 = vshll.u32 %v9348_v24, 16  ;;  %v11199_v38 = vshrl.u32 %v9350_v54, 16 }
 0x206   : > { %11192 = vst [vmem:[#allocation35_spill] sm:$0xff] %v9335_v20  ;;  %v1855_v47 = vrot.slane %v11194_v58, 4  ;;  %v1847_v4 = vor.u32 %v1846_v7, %v1843_v44  ;;  %v3255_v58 = vrot.slane %v9298_v9, 4  ;;  %v10974_v44 = vshrl.u32 %v9354_v52, 16 }
 0x207   : > { %7300 = vmatmul.mubr.msk.bf16.gmra.mrb[16].mxu1 %vm1416_vm4, %v9281_v22  ;;  %v1863_v17 = vrot.slane %v11195_v36, 4  ;;  %v10976_v36 = vshrl.u32 %v9348_v24, 16  ;;  %v10973_v7 = vshll.u32 %v9354_v52, 16  ;;  %v1872_v3 = vrot.slane %v10975_v55, 4 }
 0x208   : > { %7568 = vmatmul.mubr.msk.bf16.gmra.mrb[20].mxu0 %vm1416_vm4, %v9278_v23  ;;  %7303 = vmatprep.mubr.msk.bf16.mxu1 %vm1416_vm4, %v9301_v8  ;;  %v1856_v25 = vor.u32 %v1855_v47, %v1852_v45  ;;  %v9370_v28 = vsel %vm1640_vm5, %v1838_v31, %v1847_v4  ;;  %v9373_v9 = vsel %vm1317_vm3, %v3253_v48, %v3255_v58  ;;  %v1878_v45 = vrot.slane %v11199_v38, 3  ;;  %v9392_v58 = vld [vmem:[#allocation2 + $0xf0] sm:$0xff]  ;;  %v9396_v38 = vld [vmem:[#allocation2 + $0xf8] sm:$0xff] }
 0x209   : > { %7571 = vmatprep.mubr.msk.bf16.mxu0 %vm1416_vm4, %v9288_v50  ;;  %v1864_v51 = vor.u32 %v1863_v17, %v1860_v33  ;;  %11197 = vst [vmem:[#allocation38_spill] sm:$0xff] %v9370_v28  ;;  %11198 = vst [vmem:[#allocation39_spill] sm:$0xff] %v9373_v9  ;;  %v1869_v53 = vrot.slane %v10976_v36, 3  ;;  %v11200_v17 = vshll.u32 %v9350_v54, 16  ;;  %v9383_v33 = vld [vmem:[#allocation2 + $0xe8] sm:$0xff]  ;;  %v1886_v48 = vrot.slane %v10974_v44, 3 }
 0x20a   : > { %v1889_v4 = vrot.slane %v10973_v7, 4  ;;  %11202 = vst [vmem:[#allocation41_spill] sm:$0xff] %v9392_v58  ;;  %11203 = vst [vmem:[#allocation42_spill] sm:$0xff] %v9396_v38  ;;  %v10988_v44 = vshll.u32 %v9383_v33, 16  ;;  %v10984_v55 = vshrl.u32 %v9392_v58, 16  ;;  %v10987_v42 = vshll.u32 %v9392_v58, 16 }
 0x20b   : > { %v1881_v47 = vrot.slane %v11200_v17, 4  ;;  %v9386_v31 = vsel %vm1640_vm5, %v1856_v25, %v1864_v51  ;;  %v1873_v17 = vor.u32 %v1872_v3, %v1869_v53  ;;  %v10985_v34 = vshrl.u32 %v9396_v38, 16 }
 0x20c   : > { %11201 = vst [vmem:[#allocation40_spill] sm:$0xff] %v9386_v31  ;;  %v1890_v36 = vor.u32 %v1889_v4, %v1886_v48  ;;  %v10986_v10 = vshll.u32 %v9396_v38, 16  ;;  %v11205_v53 = vshrl.u32 %v9383_v33, 16  ;;  %v9421_v48 = vld [vmem:[#allocation2 + $0x100] sm:$0xff]  ;;  %vm4425_vm6 = vsmask.f32 3328 }
 0x20d   : > { %v1882_v7 = vor.u32 %v1881_v47, %v1878_v45  ;;  %v9413_v25 = vsel %vm1640_vm5, %v1864_v51, %v1873_v17  ;;  %v1898_v45 = vrot.slane %v10988_v44, 4  ;;  %v1904_v47 = vrot.slane %v10984_v55, 3  ;;  %v9436_v55 = vld [vmem:[#allocation2 + $0x110] sm:$0xff] }
 0x20e   : > { %11204 = vst [vmem:[#allocation43_spill] sm:$0xff] %v9413_v25  ;;  %v1895_v3 = vrot.slane %v11205_v53, 3  ;;  %v1912_v51 = vrot.slane %v10985_v34, 3  ;;  %v1915_v17 = vrot.slane %v10986_v10, 4  ;;  %v9432_v53 = vld [vmem:[#allocation2 + $0x108] sm:$0xff]  ;;  %v11210_v44 = vshll.u32 %v9421_v48, 16 }
 0x20f   : > { %7304 = vmatmul.mubr.msk.bf16.gmra.mrb[20].mxu1 %vm1416_vm4, %v9332_v61  ;;  %v9424_v4 = vsel %vm1640_vm5, %v1882_v7, %v1890_v36 }
 0x210   : > { %7572 = vmatmul.mubr.msk.bf16.gmra.mrb[24].mxu0 %vm1416_vm4, %v9325_v62  ;;  %7307 = vmatprep.mubr.msk.bf16.mxu1 %vm1416_vm4, %v9335_v20  ;;  %11206 = vst [vmem:[#allocation44_spill] sm:$0xff] %v9424_v4  ;;  %v1899_v34 = vor.u32 %v1898_v45, %v1895_v3  ;;  %v1916_v7 = vor.u32 %v1915_v17, %v1912_v51  ;;  %v11208_v45 = vshrl.u32 %v9421_v48, 16  ;;  %v9468_v17 = vld [vmem:[#allocation2 + $0x118] sm:$0xff]  ;;  %v9575_v20 = vld [vmem:[#allocation2 + $0x160] sm:$0xff] }
 0x211   : > { %7575 = vmatprep.mubr.msk.bf16.mxu0 %vm1416_vm4, %v9338_v49 }
 0x212   : > { %v1921_v10 = vrot.slane %v11208_v45, 3 }
 0x217   : > { %7308 = vmatmul.mubr.msk.bf16.gmra.mrb[24].mxu1 %vm1416_vm4, %v9370_v28 }
 0x218   : > { %7576 = vmatmul.mubr.msk.bf16.gmra.mrb[28].mxu0 %vm1416_vm4, %v9373_v9  ;;  %7311 = vmatprep.mubr.msk.bf16.mxu1 %vm1416_vm4, %v9386_v31  ;;  %v9477_v31 = vld [vmem:[#allocation2 + $0x120] sm:$0xff] }
 0x219   : > { %7613 = vmatprep.mubr.msk.bf16.mxu0 %vm1416_vm4, %v9097_v14  ;;  %v4725_v14 = vsel %vm1317_vm3, %v9084_v5, 0  ;;  %v1907_v5 = vrot.slane %v10987_v42, 4  ;;  %v9460_v42 = vsel %vm1640_vm5, %v1890_v36, %v1899_v34  ;;  %v11214_v34 = vshll.u32 %v9436_v55, 16 }
 0x21a   : > { %11209 = vst [vmem:[#allocation46_spill] sm:$0xff] %v9460_v42  ;;  %v11013_v28 = vshll.u32 %v9477_v31, 16 }
 0x21b   : > { %v1941_v36 = vrot.slane %v11214_v34, 4 }
 0x21f   : > { %7312 = vmatmul.mubr.msk.bf16.gmra.mrb[28].mxu1 %vm1416_vm4, %v9413_v25  ;;  %v10997_v25 = vshrl.u32 %v9436_v55, 16 }
 0x220   : > { %7614 = vmatmul.mubr.msk.bf16.vlgmr.msra.gmra.mrb[0].mxu0 %vm1416_vm4, %v9121_v35  ;;  %7315 = vmatprep.mubr.msk.bf16.mxu1 %vm1416_vm4, %v9424_v4  ;;  %v9451_v35 = vld [vmem:[%s10910_s6 + $0x8] sm:$0xf]  ;;  %v11211_v4 = vshrl.u32 %v9432_v53, 16 }
 0x221   : > { %7678 = vmatpush3.bf16.msra.mxu0 %v4725_v14  ;;  %7617 = vmatprep.mubr.msk.bf16.mxu0 %vm1416_vm4, %v9138_v56  ;;  %11207 = vst [vmem:[#allocation45_spill] sm:$0xff] %v9451_v35  ;;  %v1908_v14 = vor.u32 %v1907_v5, %v1904_v47  ;;  %v1924_v56 = vrot.slane %v11210_v44, 4  ;;  %v11212_v5 = vshll.u32 %v9432_v53, 16  ;;  %v1938_v45 = vrot.slane %v10997_v25, 3  ;;  %v9481_v44 = vld [vmem:[#allocation2 + $0x128] sm:$0xff] }
 0x222   : > { %8397 = vmatprep.subr.msk.bf16.mxu0 %vm1317_vm3, %v9451_v35  ;;  %v1930_v47 = vrot.slane %v11211_v4, 3  ;;  %v11015_v4 = vshrl.u32 %v9468_v17, 16  ;;  %v11014_v25 = vshrl.u32 %v9477_v31, 16  ;;  %v11012_v0 = vshrl.u32 %v9481_v44, 16 }
 0x223   : > { %v1933_v51 = vrot.slane %v11212_v5, 4  ;;  %v9471_v3 = vsel %vm1640_vm5, %v1908_v14, %v1916_v7  ;;  %v11010_v14 = vshll.u32 %v9468_v17, 16  ;;  %v1925_v5 = vor.u32 %v1924_v56, %v1921_v10 }
 0x224   : > { %11213 = vst [vmem:[#allocation47_spill] sm:$0xff] %v9471_v3  ;;  %v1956_v10 = vrot.slane %v11014_v25, 3 }
 0x225   : > { %v1934_v34 = vor.u32 %v1933_v51, %v1930_v47  ;;  %v1950_v59 = vrot.slane %v11010_v14, 4  ;;  %v9500_v46 = vsel %vm1640_vm5, %v1916_v7, %v1925_v5  ;;  %v1959_v47 = vrot.slane %v11013_v28, 4  ;;  %v9515_v14 = vld [vmem:[#allocation2 + $0x138] sm:$0xff]  ;;  %v9519_v7 = vld [vmem:[#allocation2 + $0x140] sm:$0xff] }
 0x226   : > { %11215 = vst [vmem:[#allocation48_spill] sm:$0xff] %v9500_v46  ;;  %v1964_v51 = vrot.slane %v11012_v0, 3  ;;  %v11022_v0 = vshrl.u32 %v9515_v14, 16  ;;  %v11025_v28 = vshll.u32 %v9515_v14, 16 }
 0x227   : > { %7316 = vmatmul.mubr.msk.bf16.gmra.mrb[32].mxu1 %vm1416_vm4, %v9460_v42  ;;  %v11011_v42 = vshll.u32 %v9481_v44, 16  ;;  %v1960_v25 = vor.u32 %v1959_v47, %v1956_v10  ;;  %v9544_v47 = vld [vmem:[#allocation2 + $0x148] sm:$0xff] }
 0x228   : > { %7618 = vmatmul.mubr.msk.bf16.gmra.mrb[4].mxu0 %vm1416_vm4, %v9180_v57  ;;  %7319 = vmatprep.mubr.msk.bf16.mxu1 %vm1416_vm4, %v9471_v3  ;;  %v1942_v57 = vor.u32 %v1941_v36, %v1938_v45  ;;  %v9513_v36 = vld [vmem:[#allocation2 + $0x130] sm:$0xff]  ;;  %v1985_v10 = vrot.slane %v11025_v28, 4 }
 0x229   : > { %7621 = vmatprep.mubr.msk.bf16.mxu0 %vm1416_vm4, %v9196_v2  ;;  %v1947_v2 = vrot.slane %v11015_v4, 3  ;;  %v1967_v45 = vrot.slane %v11011_v42, 4  ;;  %v11026_v42 = vshll.u32 %v9513_v36, 16 }
 0x22a   : > { %v9505_v56 = vsel %vm1640_vm5, %v1934_v34, %v1942_v57  ;;  %v11027_v34 = vshrl.u32 %v9513_v36, 16 }
 0x22b   : > { %11216 = vst [vmem:[#allocation49_spill] sm:$0xff] %v9505_v56  ;;  %v1951_v5 = vor.u32 %v1950_v59, %v1947_v2  ;;  %v1968_v4 = vor.u32 %v1967_v45, %v1964_v51  ;;  %v11024_v59 = vshll.u32 %v9519_v7, 16 }
 0x22d   : > { %v9534_v2 = vsel %vm1640_vm5, %v1942_v57, %v1951_v5  ;;  %v9547_v51 = vsel %vm1640_vm5, %v1960_v25, %v1968_v4  ;;  %v1993_v45 = vrot.slane %v11024_v59, 4  ;;  %v9553_v5 = vld [vmem:[#allocation2 + $0x150] sm:$0xff]  ;;  %v11038_v25 = vshrl.u32 %v9544_v47, 16 }
 0x22e   : > { %11217 = vst [vmem:[#allocation50_spill] sm:$0xff] %v9534_v2  ;;  %11218 = vst [vmem:[#allocation51_spill] sm:$0xff] %v9547_v51 }
 0x22f   : > { %7320 = vmatmul.mubr.msk.bf16.gmra.mrb[36].mxu1 %vm1416_vm4, %v9500_v46  ;;  %v1982_v46 = vrot.slane %v11022_v0, 3  ;;  %v9557_v0 = vld [vmem:[#allocation2 + $0x158] sm:$0xff] }
 0x230   : > { %7622 = vmatmul.mubr.msk.bf16.gmra.mrb[8].mxu0 %vm1416_vm4, %v9235_v16  ;;  %7323 = vmatprep.mubr.msk.bf16.mxu1 %vm1416_vm4, %v9505_v56  ;;  %v11023_v16 = vshrl.u32 %v9519_v7, 16  ;;  %v1976_v56 = vrot.slane %v11026_v42, 4  ;;  %v11042_v42 = vshrl.u32 %v9553_v5, 16  ;;  %v11040_v3 = vshrl.u32 %v9557_v0, 16 }
 0x231   : > { %7625 = vmatprep.mubr.msk.bf16.mxu0 %vm1416_vm4, %v9244_v29  ;;  %v1973_v29 = vrot.slane %v11027_v34, 3  ;;  %v1986_v28 = vor.u32 %v1985_v10, %v1982_v46 }
 0x232   : > { %v1990_v57 = vrot.slane %v11023_v16, 3  ;;  %v11037_v16 = vshll.u32 %v9544_v47, 16  ;;  %v2008_v46 = vrot.slane %v11042_v42, 3 }
 0x233   : > { %v1977_v59 = vor.u32 %v1976_v56, %v1973_v29 }
 0x234   : > { %v1994_v34 = vor.u32 %v1993_v45, %v1990_v57  ;;  %v2002_v35 = vrot.slane %v11037_v16, 4  ;;  %v2016_v57 = vrot.slane %v11040_v3, 3  ;;  %v9591_v16 = vld [vmem:[#allocation2 + $0x168] sm:$0xff]  ;;  %v3258_v3 = vrot.slane %v9307_v39, 4 }
 0x235   : > { %v9578_v29 = vsel %vm1640_vm5, %v1968_v4, %v1977_v59  ;;  %v11222_v59 = vshrl.u32 %v9575_v20, 16  ;;  %v11223_v39 = vshll.u32 %v9575_v20, 16  ;;  %v11225_v4 = vshll.u32 %v9591_v16, 16 }
 0x236   : > { %11219 = vst [vmem:[#allocation52_spill] sm:$0xff] %v9578_v29  ;;  %v9583_v56 = vsel %vm1640_vm5, %v1986_v28, %v1994_v34 }
 0x237   : > { %7324 = vmatmul.mubr.msk.bf16.gmra.mrb[40].mxu1 %vm1416_vm4, %v9534_v2  ;;  %v11039_v2 = vshll.u32 %v9557_v0, 16  ;;  %11220 = vst [vmem:[#allocation53_spill] sm:$0xff] %v9583_v56 }
 0x238   : > { %7626 = vmatmul.mubr.msk.bf16.gmra.mrb[12].mxu0 %vm1416_vm4, %v9278_v23  ;;  %7327 = vmatprep.mubr.msk.bf16.mxu1 %vm1416_vm4, %v9547_v51  ;;  %v11041_v23 = vshll.u32 %v9553_v5, 16  ;;  %v3263_v51 = vrot.slane %v9354_v52, 4 }
 0x239   : > { %7629 = vmatprep.mubr.msk.bf16.mxu0 %vm1416_vm4, %v9288_v50  ;;  %v1999_v50 = vrot.slane %v11038_v25, 3  ;;  %v2019_v45 = vrot.slane %v11039_v2, 4  ;;  %v9593_v25 = vld [vmem:[#allocation2 + $0x170] sm:$0xff]  ;;  %v3257_v2 = vrot.slane %v9305_v12, 4  ;;  %v2028_v12 = vrot.slane %v11223_v39, 4  ;;  %v9636_v39 = vld [vmem:[#allocation2 + $0x180] sm:$0xff] }
 0x23a   : > { %v2011_v10 = vrot.slane %v11041_v23, 4  ;;  %v11053_v23 = vshrl.u32 %v9591_v16, 16 }
 0x23b   : > { %v2003_v28 = vor.u32 %v2002_v35, %v1999_v50  ;;  %v2037_v35 = vrot.slane %v11225_v4, 4 }
 0x23c   : > { %v2012_v50 = vor.u32 %v2011_v10, %v2008_v46  ;;  %v2034_v42 = vrot.slane %v11053_v23, 3  ;;  %v11226_v46 = vshrl.u32 %v9593_v25, 16 }
 0x23e   : > { %v2042_v10 = vrot.slane %v11226_v46, 3 }
 0x23f   : > { %7328 = vmatmul.mubr.msk.bf16.gmra.mrb[44].mxu1 %vm1416_vm4, %v9578_v29  ;;  %v2025_v29 = vrot.slane %v11222_v59, 3  ;;  %v3260_v59 = vrot.slane %v9348_v24, 4 }
 0x240   : > { %7630 = vmatmul.mubr.msk.bf16.gmra.mrb[16].mxu0 %vm1416_vm4, %v9325_v62  ;;  %7331 = vmatprep.mubr.msk.bf16.mxu1 %vm1416_vm4, %v9583_v56  ;;  %v2020_v62 = vor.u32 %v2019_v45, %v2016_v57  ;;  %v9619_v56 = vsel %vm1317_vm3, %v3257_v2, %v3258_v3  ;;  %v9629_v45 = vld [vmem:[#allocation2 + $0x178] sm:$0xff]  ;;  %v9638_v2 = vld [vmem:[#allocation2 + $0x188] sm:$0xff] }
 0x241   : > { %7633 = vmatprep.mubr.msk.bf16.mxu0 %vm1416_vm4, %v9338_v49  ;;  %v9612_v49 = vsel %vm1640_vm5, %v1994_v34, %v2003_v28  ;;  %11224 = vst [vmem:[#allocation55_spill] sm:$0xff] %v9619_v56  ;;  %v11227_v34 = vshll.u32 %v9593_v25, 16  ;;  %v2029_v4 = vor.u32 %v2028_v12, %v2025_v29  ;;  %v11066_v12 = vshrl.u32 %v9636_v39, 16 }
 0x242   : > { %11221 = vst [vmem:[#allocation54_spill] sm:$0xff] %v9612_v49  ;;  %v9632_v28 = vsel %vm1640_vm5, %v2012_v50, %v2020_v62  ;;  %v9656_v46 = vsel %vm1317_vm3, %v3258_v3, %v3260_v59  ;;  %v11230_v50 = vshrl.u32 %v9629_v45, 16  ;;  %v11235_v3 = vshll.u32 %v9636_v39, 16 }
 0x243   : > { %v2045_v57 = vrot.slane %v11227_v34, 4  ;;  %11228 = vst [vmem:[#allocation56_spill] sm:$0xff] %v9632_v28  ;;  %v2038_v34 = vor.u32 %v2037_v35, %v2034_v42  ;;  %11229 = vst [vmem:[#allocation57_spill] sm:$0xff] %v9656_v46  ;;  %v11231_v42 = vshll.u32 %v9629_v45, 16 }
 0x244   : > { %v2063_v59 = vrot.slane %v11235_v3, 4  ;;  %v3265_v3 = vrot.slane %v9383_v33, 4 }
 0x245   : > { %v2046_v23 = vor.u32 %v2045_v57, %v2042_v10  ;;  %v2054_v35 = vrot.slane %v11231_v42, 4  ;;  %v9663_v10 = vsel %vm1640_vm5, %v2020_v62, %v2029_v4  ;;  %v11236_v42 = vshll.u32 %v9638_v2, 16  ;;  %v9679_v62 = vld [vmem:[#allocation2 + $0x190] sm:$0xff] }
 0x246   : > { %11232 = vst [vmem:[#allocation58_spill] sm:$0xff] %v9663_v10  ;;  %v3268_v4 = vrot.slane %v9396_v38, 4 }
 0x247   : > { %7332 = vmatmul.mubr.msk.bf16.gmra.mrb[48].mxu1 %vm1416_vm4, %v9612_v49  ;;  %v9666_v57 = vsel %vm1640_vm5, %v2038_v34, %v2046_v23  ;;  %v2060_v49 = vrot.slane %v11066_v12, 3  ;;  %v2071_v52 = vrot.slane %v11236_v42, 4  ;;  %v11080_v42 = vshrl.u32 %v9679_v62, 16 }
 0x248   : > { %7634 = vmatmul.mubr.msk.bf16.gmra.mrb[20].mxu0 %vm1416_vm4, %v9373_v9  ;;  %7335 = vmatprep.mubr.msk.bf16.mxu1 %vm1416_vm4, %v9632_v28  ;;  %v3262_v9 = vrot.slane %v9350_v54, 4  ;;  %v2051_v28 = vrot.slane %v11230_v50, 3  ;;  %11233 = vst [vmem:[#allocation59_spill] sm:$0xff] %v9666_v57  ;;  %v3267_v12 = vrot.slane %v9392_v58, 4 }
 0x249   : > { %7637 = vmatprep.mubr.msk.bf16.mxu0 %vm1416_vm4, %v9619_v56  ;;  %v11065_v56 = vshrl.u32 %v9638_v2, 16 }
 0x24a   : > { %v9669_v29 = vsel %vm1317_vm3, %v3262_v9, %v3263_v51  ;;  %v2055_v34 = vor.u32 %v2054_v35, %v2051_v28  ;;  %v2064_v35 = vor.u32 %v2063_v59, %v2060_v49  ;;  %v9709_v38 = vsel %vm1317_vm3, %v3267_v12, %v3268_v4 }
 0x24b   : > { %11234 = vst [vmem:[#allocation60_spill] sm:$0xff] %v9669_v29  ;;  %v2068_v50 = vrot.slane %v11065_v56, 3  ;;  %v11079_v56 = vshll.u32 %v9679_v62, 16  ;;  %11238 = vst [vmem:[#allocation62_spill] sm:$0xff] %v9709_v38  ;;  %v11239_v9 = vshrl.u32 %v8978_v11, 16  ;;  %v11088_v12 = vshrl.u32 %v8988_v15, 16 }
 0x24d   : > { %v2080_v58 = vrot.slane %v11079_v56, 4  ;;  %v1644_v28 = vrot.slane %v11239_v9, 3  ;;  %v3270_v9 = vrot.slane %v9421_v48, 4 }
 0x24f   : > { %7336 = vmatmul.mubr.msk.bf16.gmra.mrb[52].mxu1 %vm1416_vm4, %v9663_v10  ;;  %v9702_v10 = vsel %vm1317_vm3, %v3263_v51, %v3265_v3  ;;  %v11242_v51 = vshrl.u32 %v8985_v13, 16  ;;  %v11087_v3 = vshll.u32 %v8988_v15, 16 }
 0x250   : > { %7638 = vmatmul.mubr.msk.bf16.gmra.mrb[24].mxu0 %vm1416_vm4, %v9656_v46  ;;  %7339 = vmatprep.mubr.msk.bf16.mxu1 %vm1416_vm4, %v9666_v57  ;;  %v2072_v46 = vor.u32 %v2071_v52, %v2068_v50  ;;  %11237 = vst [vmem:[#allocation61_spill] sm:$0xff] %v9702_v10  ;;  %v2077_v57 = vrot.slane %v11080_v42, 3  ;;  %v11243_v50 = vshll.u32 %v8985_v13, 16  ;;  %v9736_v42 = vsel %vm1317_vm3, %v3268_v4, %v3270_v9 }
 0x251   : > { %7641 = vmatprep.mubr.msk.bf16.mxu0 %vm1416_vm4, %v9669_v29  ;;  %v9699_v29 = vsel %vm1640_vm5, %v2046_v23, %v2055_v34  ;;  %v11241_v23 = vshll.u32 %v8978_v11, 16  ;;  %v1652_v59 = vrot.slane %v11242_v51, 3  ;;  %v3273_v51 = vrot.slane %v9436_v55, 4  ;;  %11244 = vst [vmem:[#allocation64_spill] sm:$0xff] %v9736_v42 }
 0x252   : > { %v9714_v49 = vsel %vm1640_vm5, %v2064_v35, %v2072_v46  ;;  %v1655_v34 = vrot.slane %v11243_v50, 4  ;;  %v2081_v35 = vor.u32 %v2080_v58, %v2077_v57  ;;  %v3275_v4 = vrot.slane %v9468_v17, 4 }
 0x253   : > { %11240 = vst [vmem:[#allocation63_spill] sm:$0xff] %v9714_v49  ;;  %v1647_v52 = vrot.slane %v11241_v23, 4  ;;  %v3272_v23 = vrot.slane %v9432_v53, 4 }
 0x254   : > { %v1656_v56 = vor.u32 %v1655_v34, %v1652_v59  ;;  %v9743_v13 = vsel %vm1640_vm5, %v2072_v46, %v2081_v35  ;;  %v9760_v59 = vsel %vm1317_vm3, %v3273_v51, %v3275_v4  ;;  %v2808_v35 = vsel %vm1317_vm3, %v9153_v6, 0 }
 0x255   : > { %v1648_v50 = vor.u32 %v1647_v52, %v1644_v28  ;;  %11245 = vst [vmem:[#allocation65_spill] sm:$0xff] %v9743_v13  ;;  %v9746_v58 = vsel %vm1317_vm3, %v3272_v23, %v3273_v51  ;;  %v3277_v28 = vrot.slane %v9477_v31, 4  ;;  %v3278_v52 = vrot.slane %v9481_v44, 4  ;;  %11247 = vst [vmem:[#allocation67_spill] sm:$0xff] %v9760_v59 }
 0x256   : > { %11246 = vst [vmem:[#allocation66_spill] sm:$0xff] %v9746_v58  ;;  %v3282_v6 = vrot.slane %v9515_v14, 4 }
 0x257   : > { %7340 = vmatmul.mubr.msk.bf16.gmra.mrb[56].mxu1 %vm1416_vm4, %v9699_v29  ;;  %v1657_v57 = vsel %vm1640_vm5, %v1648_v50, %v1656_v56  ;;  %v9764_v9 = vsel %vm1317_vm3, %v3277_v28, %v3278_v52  ;;  %v3287_v50 = vrot.slane %v9553_v5, 4  ;;  %v3292_v28 = vrot.slane %v9591_v16, 4 }
 0x258   : > { %7642 = vmatmul.mubr.msk.bf16.gmra.mrb[28].mxu0 %vm1416_vm4, %v9702_v10  ;;  %7343 = vmatprep.mubr.msk.bf16.mxu1 %vm1416_vm4, %v9714_v49  ;;  %v1664_v10 = vrot.slane %v11087_v3, 4  ;;  %11248 = vst [vmem:[#allocation68_spill] sm:$0xff] %v9764_v9  ;;  %v11260_v3 = vshrl.u32 %v8993_v18, 16  ;;  %v11298_v49 = vld [vmem:[#allocation14_spill] sm:$0xff] }
 0x259   : > { %7645 = vmatprep.mubr.msk.bf16.mxu0 %vm1416_vm4, %v9709_v38  ;;  %v1661_v38 = vrot.slane %v11088_v12, 3 }
 0x25a   : > { %v4437_v12 = vrot.slane %v11260_v3, 4 }
 0x25b   : > { %v1665_v46 = vor.u32 %v1664_v10, %v1661_v38  ;;  %v9773_v38 = vld [vmem:[%s10910_s6 + $0x10] sm:$0xf]  ;;  %v3283_v10 = vrot.slane %v9519_v7, 4 }
 0x25d   : > { %v1666_v34 = vsel %vm1640_vm5, %v1656_v56, %v1665_v46  ;;  %v3280_v56 = vrot.slane %v9513_v36, 4  ;;  %v9789_v51 = vsel %vm1317_vm3, %v3282_v6, %v3283_v10  ;;  %v3297_v6 = vrot.slane %v9636_v39, 4 }
 0x25e   : > { %11250 = vst [vmem:[#allocation70_spill] sm:$0xff] %v9789_v51 }
 0x25f   : > { %7344 = vmatmul.mubr.msk.bf16.gmra.mrb[60].mxu1 %vm1416_vm4, %v9743_v13  ;;  %v9786_v23 = vsel %vm1317_vm3, %v3278_v52, %v3280_v56  ;;  %v3293_v52 = vrot.slane %v9593_v25, 4  ;;  %v3295_v56 = vrot.slane %v9629_v45, 4 }
 0x260   : > { %7646 = vmatmul.mubr.msk.bf16.gmra.mrb[32].mxu0 %vm1416_vm4, %v9736_v42  ;;  %7349 = vmatprep.mubr.msk.bf16.mxu1 %vm1416_vm4, %v1657_v57  ;;  %11249 = vst [vmem:[#allocation69_spill] sm:$0xff] %v9786_v23  ;;  %v3288_v57 = vrot.slane %v9557_v0, 4 }
 0x261   : > { %7649 = vmatprep.mubr.msk.bf16.mxu0 %vm1416_vm4, %v9746_v58 }
 0x262   : > { %v9806_v46 = vsel %vm1317_vm3, %v3287_v50, %v3288_v57 }
 0x263   : > { %11252 = vst [vmem:[#allocation72_spill] sm:$0xff] %v9806_v46 }
 0x267   : > { %7350 = vmatmul.mubr.msk.bf16.vlgmr.msra.gmra.mrb[0].mxu1 %vm1416_vm4, %v1666_v34 }
 0x268   : > { %7650 = vmatmul.mubr.msk.bf16.gmra.mrb[36].mxu0 %vm1416_vm4, %v9760_v59  ;;  %7414 = vmatpush3.bf16.msra.mxu1 %v2808_v35  ;;  %v9823_v35 = vsel %vm1317_vm3, %v3292_v28, %v3293_v52  ;;  %v3300_v28 = vrot.slane %v9679_v62, 4 }
 0x269   : > { %7653 = vmatprep.mubr.msk.bf16.mxu0 %vm1416_vm4, %v9764_v9  ;;  %7353 = vmatprep.mubr.msk.bf16.mxu1 %vm1416_vm4, %v9063_v60  ;;  %v3285_v60 = vrot.slane %v9544_v47, 4  ;;  %11254 = vst [vmem:[#allocation74_spill] sm:$0xff] %v9823_v35  ;;  %v11269_v9 = vshll.u32 %v9021_v32, 16 }
 0x26a   : > { %8392 = vmatprep.subr.msk.bf16.mxu1 %vm1317_vm3, %v9773_v38 }
 0x26b   : > { %v9803_v4 = vsel %vm1317_vm3, %v3283_v10, %v3285_v60  ;;  %v3298_v10 = vrot.slane %v9638_v2, 4  ;;  %v9837_v60 = vsel %vm1317_vm3, %v3293_v52, %v3295_v56  ;;  %v4449_v59 = vrot.slane %v11269_v9, 5 }
 0x26c   : > { %11251 = vst [vmem:[#allocation71_spill] sm:$0xff] %v9803_v4  ;;  %11255 = vst [vmem:[#allocation75_spill] sm:$0xff] %v9837_v60 }
 0x26d   : > { %v9840_v50 = vsel %vm1317_vm3, %v3297_v6, %v3298_v10  ;;  %v9858_v6 = vsel %vm1317_vm3, %v3298_v10, %v3300_v28 }
 0x26e   : > { %11256 = vst [vmem:[#allocation76_spill] sm:$0xff] %v9840_v50  ;;  %11259 = vst [vmem:[#allocation79_spill] sm:$0xff] %v9858_v6 }
 0x26f   : > { %7354 = vmatmul.mubr.msk.bf16.gmra.mrb[4].mxu1 %vm1416_vm4, %v9074_v1  ;;  %v3290_v1 = vrot.slane %v9575_v20, 4 }
 0x270   : > { %7654 = vmatmul.mubr.msk.bf16.gmra.mrb[40].mxu0 %vm1416_vm4, %v9786_v23  ;;  %7357 = vmatprep.mubr.msk.bf16.mxu1 %vm1416_vm4, %v9103_v21 }
 0x271   : > { %7657 = vmatprep.mubr.msk.bf16.mxu0 %vm1416_vm4, %v9789_v51  ;;  %v9820_v34 = vsel %vm1317_vm3, %v3288_v57, %v3290_v1  ;;  %v9842_v57 = vld [vmem:[#allocation2 + $0x198] sm:$0xff]  ;;  %v9844_v1 = vld [vmem:[#allocation2 + $0x1a0] sm:$0xff]  ;;  %v11264_v51 = vshll.u32 %v8995_v19, 16 }
 0x272   : > { %11253 = vst [vmem:[#allocation73_spill] sm:$0xff] %v9820_v34  ;;  %11257 = vst [vmem:[#allocation77_spill] sm:$0xff] %v9842_v57  ;;  %v3302_v52 = vrot.slane %v9842_v57, 4  ;;  %v3303_v56 = vrot.slane %v9844_v1, 4 }
 0x273   : > { %11258 = vst [vmem:[#allocation78_spill] sm:$0xff] %v9844_v1  ;;  %v4441_v23 = vrot.slane %v11264_v51, 5 }
 0x277   : > { %7358 = vmatmul.mubr.msk.bf16.gmra.mrb[8].mxu1 %vm1416_vm4, %v9129_v43 }
 0x278   : > { %7658 = vmatmul.mubr.msk.bf16.gmra.mrb[44].mxu0 %vm1416_vm4, %v9803_v4  ;;  %7361 = vmatprep.mubr.msk.bf16.mxu1 %vm1416_vm4, %v9145_v63 }
 0x279   : > { %7661 = vmatprep.mubr.msk.bf16.mxu0 %vm1416_vm4, %v9806_v46  ;;  %v11263_v46 = vshrl.u32 %v8995_v19, 16  ;;  %v11265_v19 = vshrl.u32 %v9005_v26, 16 }
 0x27b   : > { %v4440_v4 = vrot.slane %v11263_v46, 4  ;;  %v4444_v51 = vrot.slane %v11265_v19, 4 }
 0x27d   : > { %v4442_v10 = vor.u32 %v4441_v23, %v4440_v4  ;;  %v11271_v4 = vshll.u32 %v9027_v37, 16 }
 0x27f   : > { %7362 = vmatmul.mubr.msk.bf16.gmra.mrb[12].mxu1 %vm1416_vm4, %v9193_v41 }
 0x280   : > { %7662 = vmatmul.mubr.msk.bf16.gmra.mrb[48].mxu0 %vm1416_vm4, %v9820_v34  ;;  %7365 = vmatprep.mubr.msk.bf16.mxu1 %vm1416_vm4, %v9201_v30 }
 0x281   : > { %7665 = vmatprep.mubr.msk.bf16.mxu0 %vm1416_vm4, %v9823_v35  ;;  %v9863_v35 = vld [vmem:[#allocation2 + $0x1a8] sm:$0xff] }
 0x282   : > { %11261 = vst [vmem:[#allocation80_spill] sm:$0xff] %v9863_v35  ;;  %v3305_v3 = vrot.slane %v9863_v35, 4  ;;  %v11299_v35 = vshrl.u32 %v11298_v49, 16 }
 0x284   : > { %v3306_v46 = vsel %vm1317_vm3, %v3303_v56, %v3305_v3  ;;  %v11273_v3 = vshrl.u32 %v8988_v15, 16  ;;  %v4473_v1 = vrot.slane %v11299_v35, 4 }
 0x287   : > { %7366 = vmatmul.mubr.msk.bf16.gmra.mrb[16].mxu1 %vm1416_vm4, %v9238_v27 }
 0x288   : > { %7666 = vmatmul.mubr.msk.bf16.gmra.mrb[52].mxu0 %vm1416_vm4, %v9837_v60  ;;  %7369 = vmatprep.mubr.msk.bf16.mxu1 %vm1416_vm4, %v9241_v40  ;;  %v3304_v60 = vsel %vm1317_vm3, %v3302_v52, %v3303_v56  ;;  %v11272_v56 = vld [vmem:[#allocation35_spill] sm:$0xff] }
 0x289   : > { %7669 = vmatprep.mubr.msk.bf16.mxu0 %vm1416_vm4, %v9840_v50  ;;  %v11262_v50 = vshll.u32 %v8993_v18, 16 }
 0x28b   : > { %v4438_v34 = vrot.slane %v11262_v50, 5  ;;  %v11266_v50 = vshll.u32 %v9005_v26, 16 }
 0x28d   : > { %v4439_v18 = vor.u32 %v4438_v34, %v4437_v12  ;;  %v4445_v28 = vrot.slane %v11266_v50, 5  ;;  %v11270_v12 = vshrl.u32 %v9027_v37, 16  ;;  %v4452_v34 = vrot.slane %v11271_v4, 5  ;;  %v11276_v50 = vld [vmem:[#allocation45_spill] sm:$0xff] }
 0x28e   : > { %v11274_v37 = vshll.u32 %v8988_v15, 16 }
 0x28f   : > { %7370 = vmatmul.mubr.msk.bf16.gmra.mrb[20].mxu1 %vm1416_vm4, %v9281_v22  ;;  %v9885_v52 = vsel %vm4425_vm6, %v4439_v18, %v4442_v10  ;;  %v4451_v23 = vrot.slane %v11270_v12, 4  ;;  %v4446_v26 = vor.u32 %v4445_v28, %v4444_v51  ;;  %v9904_v18 = vrot.slane %v11273_v3, 4  ;;  %v11277_v51 = vld [vmem:[#allocation5_spill] sm:$0xff] }
 0x290   : > { %7670 = vmatmul.mubr.msk.bf16.gmra.mrb[56].mxu0 %vm1416_vm4, %v9858_v6  ;;  %7373 = vmatprep.mubr.msk.bf16.mxu1 %vm1416_vm4, %v9301_v8  ;;  %11267 = vst [vmem:[#allocation81_spill] sm:$0xff] %v9885_v52  ;;  %v9908_v19 = vrot.slane %v11274_v37, 5  ;;  %v11278_v28 = vshrl.u32 %v11277_v51, 16  ;;  %v11283_v37 = vld [vmem:[#allocation9_spill] sm:$0xff] }
 0x291   : > { %7673 = vmatprep.mubr.msk.bf16.mxu0 %vm1416_vm4, %v3304_v60  ;;  %v11268_v60 = vshrl.u32 %v9021_v32, 16  ;;  %v4453_v9 = vor.u32 %v4452_v34, %v4451_v23  ;;  %v11280_v23 = vld [vmem:[#allocation8_spill] sm:$0xff]  ;;  %v11284_v58 = vshrl.u32 %v11283_v37, 16 }
 0x292   : > { %v4455_v12 = vrot.slane %v11278_v28, 4  ;;  %v11281_v4 = vshrl.u32 %v11280_v23, 16  ;;  %v11282_v3 = vshll.u32 %v11280_v23, 16  ;;  %v11288_v23 = vld [vmem:[#allocation40_spill] sm:$0xff] }
 0x293   : > { %v4448_v6 = vrot.slane %v11268_v60, 4  ;;  %v5023_v60 = vsel %vm1317_vm3, %v11276_v50, 0  ;;  %v4462_v42 = vrot.slane %v11284_v58, 4 }
 0x294   : > { %v4459_v34 = vrot.slane %v11281_v4, 4  ;;  %v4460_v15 = vrot.slane %v11282_v3, 5  ;;  %v9943_v4 = vld [vmem:[%s10910_s6 + $0x20] sm:$0xf] }
 0x295   : > { %v4450_v32 = vor.u32 %v4449_v59, %v4448_v6  ;;  %v11279_v59 = vshll.u32 %v11277_v51, 16  ;;  %v11287_v51 = vld [vmem:[#allocation38_spill] sm:$0xff]  ;;  %11289 = vst [vmem:[#allocation5_spill] sm:$0xff] %v9943_v4 }
 0x296   : > { %v4461_v58 = vor.u32 %v4460_v15, %v4459_v34 }
 0x297   : > { %7374 = vmatmul.mubr.msk.bf16.gmra.mrb[24].mxu1 %vm1416_vm4, %v9332_v61  ;;  %v4456_v6 = vrot.slane %v11279_v59, 5  ;;  %v9928_v50 = vsel %vm4425_vm6, %v4450_v32, %v4453_v9  ;;  %v11294_v59 = vld [vmem:[#allocation12_spill] sm:$0xff] }
 0x298   : > { %7674 = vmatmul.mubr.msk.bf16.gmra.mrb[60].mxu0 %vm1416_vm4, %v3306_v46  ;;  %7377 = vmatprep.mubr.msk.bf16.mxu1 %vm1416_vm4, %v11272_v56  ;;  %v9911_v46 = vsel %vm4425_vm6, %v4442_v10, %v4446_v26  ;;  %v11285_v10 = vshll.u32 %v11283_v37, 16  ;;  %11286 = vst [vmem:[#allocation45_spill] sm:$0xff] %v9928_v50  ;;  %v11295_v34 = vshrl.u32 %v11294_v59, 16 }
 0x299   : > { %7679 = vmatprep.mubr.msk.bf16.mxu0 %vm1416_vm4, %v9885_v52  ;;  %11275 = vst [vmem:[#allocation35_spill] sm:$0xff] %v9911_v46  ;;  %v4457_v28 = vor.u32 %v4456_v6, %v4455_v12  ;;  %v11291_v12 = vld [vmem:[#allocation10_spill] sm:$0xff] }
 0x29a   : > { %v4463_v26 = vrot.slane %v11285_v10, 5  ;;  %v11292_v6 = vshrl.u32 %v11291_v12, 16  ;;  %v11293_v37 = vshll.u32 %v11291_v12, 16  ;;  %v11301_v12 = vld [vmem:[#allocation43_spill] sm:$0xff] }
 0x29c   : > { %v4464_v32 = vor.u32 %v4463_v26, %v4462_v42  ;;  %v4466_v3 = vrot.slane %v11292_v6, 4  ;;  %v4467_v10 = vrot.slane %v11293_v37, 5  ;;  %v4470_v42 = vrot.slane %v11295_v34, 4  ;;  %v11302_v6 = vld [vmem:[#allocation44_spill] sm:$0xff] }
 0x29d   : > { %v11297_v26 = vshll.u32 %v11294_v59, 16 }
 0x29e   : > { %v9957_v15 = vsel %vm4425_vm6, %v4461_v58, %v4464_v32  ;;  %v4468_v58 = vor.u32 %v4467_v10, %v4466_v3 }
 0x29f   : > { %7378 = vmatmul.mubr.msk.bf16.gmra.mrb[28].mxu1 %vm1416_vm4, %v11287_v51  ;;  %11296 = vst [vmem:[#allocation9_spill] sm:$0xff] %v9957_v15  ;;  %v4471_v13 = vrot.slane %v11297_v26, 5 }
 0x2a0   : > { %7680 = vmatmul.mubr.msk.bf16.vlgmr.msra.gmra.mrb[0].mxu0 %vm1416_vm4, %v9911_v46  ;;  %7381 = vmatprep.mubr.msk.bf16.mxu1 %vm1416_vm4, %v11288_v23  ;;  %v9974_v35 = vsel %vm4425_vm6, %v4464_v32, %v4468_v58  ;;  %v11314_v58 = vld [vmem:[#allocation46_spill] sm:$0xff] }
 0x2a1   : > { %7744 = vmatpush3.bf16.msra.mxu0 %v5023_v60  ;;  %7683 = vmatprep.mubr.msk.bf16.mxu0 %vm1416_vm4, %v9928_v50  ;;  %v9948_v60 = vsel %vm4425_vm6, %v4453_v9, %v4457_v28  ;;  %v11300_v9 = vshll.u32 %v11298_v49, 16  ;;  %v4472_v59 = vor.u32 %v4471_v13, %v4470_v42  ;;  %11303 = vst [vmem:[#allocation38_spill] sm:$0xff] %v9974_v35  ;;  %v11304_v49 = vld [vmem:[#allocation15_spill] sm:$0xff]  ;;  %v11311_v13 = vld [vmem:[#allocation18_spill] sm:$0xff] }
 0x2a2   : > { %8398 = vmatprep.subr.msk.bf16.mxu0 %vm1317_vm3, %v9943_v4  ;;  %11290 = vst [vmem:[#allocation8_spill] sm:$0xff] %v9948_v60  ;;  %v11305_v34 = vshrl.u32 %v11304_v49, 16  ;;  %v11313_v32 = vshll.u32 %v11311_v13, 16 }
 0x2a3   : > { %v4474_v28 = vrot.slane %v11300_v9, 5  ;;  %v11306_v9 = vshll.u32 %v11304_v49, 16 }
 0x2a4   : > { %v4477_v26 = vrot.slane %v11305_v34, 4 }
 0x2a5   : > { %v4475_v37 = vor.u32 %v4474_v28, %v4473_v1  ;;  %v4478_v57 = vrot.slane %v11306_v9, 5  ;;  %v11312_v1 = vshrl.u32 %v11311_v13, 16  ;;  %v4485_v28 = vrot.slane %v11313_v32, 5  ;;  %v11317_v9 = vld [vmem:[#allocation20_spill] sm:$0xff] }
 0x2a7   : > { %7382 = vmatmul.mubr.msk.bf16.gmra.mrb[32].mxu1 %vm1416_vm4, %v11301_v12  ;;  %v4484_v42 = vrot.slane %v11312_v1, 4  ;;  %v11319_v1 = vshll.u32 %v11317_v9, 16 }
 0x2a8   : > { %7684 = vmatmul.mubr.msk.bf16.gmra.mrb[4].mxu0 %vm1416_vm4, %v9948_v60  ;;  %7385 = vmatprep.mubr.msk.bf16.mxu1 %vm1416_vm4, %v11302_v6  ;;  %v11307_v60 = vld [vmem:[#allocation17_spill] sm:$0xff] }
 0x2a9   : > { %7687 = vmatprep.mubr.msk.bf16.mxu0 %vm1416_vm4, %v9957_v15  ;;  %v11308_v50 = vshrl.u32 %v11307_v60, 16  ;;  %v9983_v15 = vsel %vm4425_vm6, %v4472_v59, %v4475_v37  ;;  %v11310_v3 = vshll.u32 %v11307_v60, 16  ;;  %v11315_v59 = vld [vmem:[#allocation47_spill] sm:$0xff]  ;;  %v4486_v49 = vor.u32 %v4485_v28, %v4484_v42 }
 0x2aa   : > { %11309 = vst [vmem:[#allocation40_spill] sm:$0xff] %v9983_v15  ;;  %v4489_v32 = vrot.slane %v11319_v1, 5 }
 0x2ab   : > { %v4481_v46 = vrot.slane %v11308_v50, 4  ;;  %v4482_v10 = vrot.slane %v11310_v3, 5  ;;  %v4479_v50 = vor.u32 %v4478_v57, %v4477_v26  ;;  %v11318_v3 = vshrl.u32 %v11317_v9, 16 }
 0x2ad   : > { %v4483_v60 = vor.u32 %v4482_v10, %v4481_v46  ;;  %v10000_v34 = vsel %vm4425_vm6, %v4475_v37, %v4479_v50  ;;  %v4488_v13 = vrot.slane %v11318_v3, 4  ;;  %v11324_v46 = vld [vmem:[#allocation23_spill] sm:$0xff]  ;;  %v11327_v50 = vld [vmem:[#allocation48_spill] sm:$0xff]  ;;  %v11329_v3 = vld [vmem:[#allocation26_spill] sm:$0xff] }
 0x2ae   : > { %11316 = vst [vmem:[#allocation10_spill] sm:$0xff] %v10000_v34  ;;  %v11325_v10 = vshrl.u32 %v11324_v46, 16  ;;  %v11326_v37 = vshll.u32 %v11324_v46, 16  ;;  %v11330_v1 = vshrl.u32 %v11329_v3, 16  ;;  %v11331_v46 = vshll.u32 %v11329_v3, 16 }
 0x2af   : > { %7386 = vmatmul.mubr.msk.bf16.gmra.mrb[36].mxu1 %vm1416_vm4, %v11314_v58 }
 0x2b0   : > { %7688 = vmatmul.mubr.msk.bf16.gmra.mrb[8].mxu0 %vm1416_vm4, %v9974_v35  ;;  %7389 = vmatprep.mubr.msk.bf16.mxu1 %vm1416_vm4, %v11315_v59  ;;  %v11320_v35 = vld [vmem:[#allocation22_spill] sm:$0xff]  ;;  %v4495_v42 = vrot.slane %v11325_v10, 4  ;;  %v4496_v28 = vrot.slane %v11326_v37, 5  ;;  %v4500_v10 = vrot.slane %v11331_v46, 5  ;;  %v11343_v46 = vld [vmem:[#allocation31_spill] sm:$0xff] }
 0x2b1   : > { %7691 = vmatprep.mubr.msk.bf16.mxu0 %vm1416_vm4, %v9983_v15  ;;  %v11321_v52 = vshrl.u32 %v11320_v35, 16  ;;  %v10009_v15 = vsel %vm4425_vm6, %v4483_v60, %v4486_v49  ;;  %v11323_v57 = vshll.u32 %v11320_v35, 16  ;;  %v11328_v60 = vld [vmem:[#allocation49_spill] sm:$0xff] }
 0x2b2   : > { %11322 = vst [vmem:[#allocation12_spill] sm:$0xff] %v10009_v15  ;;  %v4497_v9 = vor.u32 %v4496_v28, %v4495_v42 }
 0x2b3   : > { %v4492_v58 = vrot.slane %v11321_v52, 4  ;;  %v4493_v26 = vrot.slane %v11323_v57, 5  ;;  %v4490_v52 = vor.u32 %v4489_v32, %v4488_v13  ;;  %v4499_v57 = vrot.slane %v11330_v1, 4 }
 0x2b5   : > { %v4494_v35 = vor.u32 %v4493_v26, %v4492_v58  ;;  %v10030_v37 = vsel %vm4425_vm6, %v4486_v49, %v4490_v52  ;;  %v11337_v58 = vld [vmem:[#allocation28_spill] sm:$0xff]  ;;  %v4501_v49 = vor.u32 %v4500_v10, %v4499_v57  ;;  %v11340_v52 = vld [vmem:[#allocation50_spill] sm:$0xff] }
 0x2b6   : > { %11332 = vst [vmem:[#allocation14_spill] sm:$0xff] %v10030_v37  ;;  %v11338_v26 = vshrl.u32 %v11337_v58, 16  ;;  %v11339_v28 = vshll.u32 %v11337_v58, 16  ;;  %v11346_v10 = vld [vmem:[#allocation32_spill] sm:$0xff] }
 0x2b7   : > { %7390 = vmatmul.mubr.msk.bf16.gmra.mrb[40].mxu1 %vm1416_vm4, %v11327_v50  ;;  %v10052_v3 = vsel %vm4425_vm6, %v4497_v9, %v4501_v49 }
 0x2b8   : > { %7692 = vmatmul.mubr.msk.bf16.gmra.mrb[12].mxu0 %vm1416_vm4, %v10000_v34  ;;  %7393 = vmatprep.mubr.msk.bf16.mxu1 %vm1416_vm4, %v11328_v60  ;;  %v11333_v34 = vld [vmem:[#allocation27_spill] sm:$0xff]  ;;  %v4506_v42 = vrot.slane %v11338_v26, 4  ;;  %v4507_v1 = vrot.slane %v11339_v28, 5  ;;  %11342 = vst [vmem:[#allocation44_spill] sm:$0xff] %v10052_v3  ;;  %v11345_v26 = vshll.u32 %v11343_v46, 16  ;;  %v11347_v28 = vshrl.u32 %v11346_v10, 16 }
 0x2b9   : > { %7695 = vmatprep.mubr.msk.bf16.mxu0 %vm1416_vm4, %v10009_v15  ;;  %v11334_v50 = vshrl.u32 %v11333_v34, 16  ;;  %v10035_v15 = vsel %vm4425_vm6, %v4494_v35, %v4497_v9  ;;  %v11336_v13 = vshll.u32 %v11333_v34, 16  ;;  %v11349_v60 = vld [vmem:[#allocation33_spill] sm:$0xff] }
 0x2ba   : > { %11335 = vst [vmem:[#allocation43_spill] sm:$0xff] %v10035_v15  ;;  %v4508_v35 = vor.u32 %v4507_v1, %v4506_v42  ;;  %v4511_v57 = vrot.slane %v11345_v26, 5  ;;  %v11350_v4 = vshrl.u32 %v11349_v60, 16  ;;  %v11353_v42 = vld [vmem:[#allocation52_spill] sm:$0xff] }
 0x2bb   : > { %v4503_v59 = vrot.slane %v11334_v50, 4  ;;  %v4504_v32 = vrot.slane %v11336_v13, 5  ;;  %v11341_v50 = vld [vmem:[#allocation51_spill] sm:$0xff]  ;;  %v11344_v13 = vshrl.u32 %v11343_v46, 16  ;;  %v11354_v46 = vld [vmem:[#allocation53_spill] sm:$0xff] }
 0x2bd   : > { %v4505_v34 = vor.u32 %v4504_v32, %v4503_v59  ;;  %v4510_v58 = vrot.slane %v11344_v13, 4  ;;  %v11351_v59 = vshll.u32 %v11349_v60, 16 }
 0x2bf   : > { %7394 = vmatmul.mubr.msk.bf16.gmra.mrb[44].mxu1 %vm1416_vm4, %v11340_v52  ;;  %v11348_v52 = vshll.u32 %v11346_v10, 16  ;;  %v4518_v32 = vrot.slane %v11351_v59, 5  ;;  %v10067_v9 = vsel %vm4425_vm6, %v4505_v34, %v4508_v35  ;;  %v4512_v1 = vor.u32 %v4511_v57, %v4510_v58 }
 0x2c0   : > { %7696 = vmatmul.mubr.msk.bf16.gmra.mrb[16].mxu0 %vm1416_vm4, %v10030_v37  ;;  %7397 = vmatprep.mubr.msk.bf16.mxu1 %vm1416_vm4, %v11341_v50  ;;  %v4514_v37 = vrot.slane %v11347_v28, 4  ;;  %v4517_v50 = vrot.slane %v11350_v4, 4  ;;  %11352 = vst [vmem:[#allocation15_spill] sm:$0xff] %v10067_v9  ;;  %v11355_v4 = vshrl.u32 %v9348_v24, 16  ;;  %v11356_v34 = vshll.u32 %v9348_v24, 16 }
 0x2c1   : > { %7699 = vmatprep.mubr.msk.bf16.mxu0 %vm1416_vm4, %v10035_v15  ;;  %v4515_v15 = vrot.slane %v11348_v52, 5  ;;  %v10082_v26 = vsel %vm4425_vm6, %v4508_v35, %v4512_v1  ;;  %v11359_v28 = vshrl.u32 %v9350_v54, 16  ;;  %v11364_v35 = vld [vmem:[#allocation54_spill] sm:$0xff]  ;;  %v11365_v1 = vld [vmem:[#allocation56_spill] sm:$0xff] }
 0x2c2   : > { %v4519_v52 = vor.u32 %v4518_v32, %v4517_v50  ;;  %v4521_v60 = vrot.slane %v11355_v4, 4  ;;  %v4522_v13 = vrot.slane %v11356_v34, 5  ;;  %11357 = vst [vmem:[#allocation17_spill] sm:$0xff] %v10082_v26  ;;  %v11361_v50 = vld [vmem:[#allocation37_spill] sm:$0xff] }
 0x2c3   : > { %v4516_v49 = vor.u32 %v4515_v15, %v4514_v37  ;;  %v4525_v58 = vrot.slane %v11359_v28, 4  ;;  %v11360_v15 = vshll.u32 %v9350_v54, 16  ;;  %v11362_v57 = vshrl.u32 %v11361_v50, 16 }
 0x2c4   : > { %v11363_v32 = vshll.u32 %v11361_v50, 16  ;;  %v4523_v24 = vor.u32 %v4522_v13, %v4521_v60  ;;  %v11366_v28 = vshrl.u32 %v9383_v33, 16  ;;  %v11367_v50 = vshll.u32 %v9383_v33, 16  ;;  %v11368_v13 = vld [vmem:[#allocation41_spill] sm:$0xff]  ;;  %v11374_v33 = vld [vmem:[#allocation58_spill] sm:$0xff] }
 0x2c5   : > { %v10085_v10 = vsel %vm4425_vm6, %v4516_v49, %v4519_v52  ;;  %v4526_v37 = vrot.slane %v11360_v15, 5  ;;  %v4528_v59 = vrot.slane %v11362_v57, 4  ;;  %v11369_v57 = vshrl.u32 %v11368_v13, 16 }
 0x2c6   : > { %11358 = vst [vmem:[#allocation18_spill] sm:$0xff] %v10085_v10  ;;  %v4529_v4 = vrot.slane %v11363_v32, 5  ;;  %v10104_v34 = vsel %vm4425_vm6, %v4519_v52, %v4523_v24  ;;  %v4532_v15 = vrot.slane %v11366_v28, 4  ;;  %v4533_v60 = vrot.slane %v11367_v50, 5  ;;  %v11375_v24 = vld [vmem:[#allocation59_spill] sm:$0xff] }
 0x2c7   : > { %7398 = vmatmul.mubr.msk.bf16.gmra.mrb[48].mxu1 %vm1416_vm4, %v11353_v42  ;;  %v4527_v54 = vor.u32 %v4526_v37, %v4525_v58  ;;  %v4536_v32 = vrot.slane %v11369_v57, 4  ;;  %v11378_v57 = vshrl.u32 %v9432_v53, 16 }
 0x2c8   : > { %7700 = vmatmul.mubr.msk.bf16.gmra.mrb[20].mxu0 %vm1416_vm4, %v10052_v3  ;;  %7401 = vmatprep.mubr.msk.bf16.mxu1 %vm1416_vm4, %v11354_v46  ;;  %v4530_v49 = vor.u32 %v4529_v4, %v4528_v59  ;;  %v4534_v59 = vor.u32 %v4533_v60, %v4532_v15  ;;  %v11380_v60 = vshrl.u32 %v9436_v55, 16 }
 0x2c9   : > { %7703 = vmatprep.mubr.msk.bf16.mxu0 %vm1416_vm4, %v10067_v9  ;;  %v11371_v9 = vld [vmem:[#allocation42_spill] sm:$0xff]  ;;  %v4547_v15 = vrot.slane %v11378_v57, 4  ;;  %v11385_v57 = vshll.u32 %v9477_v31, 16 }
 0x2ca   : > { %v11372_v3 = vshrl.u32 %v11371_v9, 16  ;;  %v11373_v58 = vshll.u32 %v11371_v9, 16  ;;  %v10119_v52 = vsel %vm4425_vm6, %v4527_v54, %v4530_v49  ;;  %v11377_v54 = vshll.u32 %v9421_v48, 16 }
 0x2cb   : > { %v10134_v50 = vsel %vm4425_vm6, %v4530_v49, %v4534_v59 }
 0x2cc   : > { %v4540_v37 = vrot.slane %v11373_v58, 5  ;;  %v4544_v28 = vrot.slane %v11377_v54, 5  ;;  %v11381_v58 = vshll.u32 %v9436_v55, 16  ;;  %v11382_v55 = vshrl.u32 %v9468_v17, 16 }
 0x2cd   : > { %v11384_v54 = vshrl.u32 %v9477_v31, 16 }
 0x2cf   : > { %7402 = vmatmul.mubr.msk.bf16.gmra.mrb[52].mxu1 %vm1416_vm4, %v11364_v35 }
 0x2d0   : > { %7704 = vmatmul.mubr.msk.bf16.gmra.mrb[24].mxu0 %vm1416_vm4, %v10082_v26  ;;  %7405 = vmatprep.mubr.msk.bf16.mxu1 %vm1416_vm4, %v11365_v1  ;;  %v11370_v26 = vshll.u32 %v11368_v13, 16  ;;  %v4539_v1 = vrot.slane %v11372_v3, 4  ;;  %v11376_v3 = vshrl.u32 %v9421_v48, 16 }
 0x2d1   : > { %7707 = vmatprep.mubr.msk.bf16.mxu0 %vm1416_vm4, %v10085_v10 }
 0x2d2   : > { %v4537_v10 = vrot.slane %v11370_v26, 5  ;;  %v4541_v4 = vor.u32 %v4540_v37, %v4539_v1  ;;  %v4543_v9 = vrot.slane %v11376_v3, 4  ;;  %v4551_v37 = vrot.slane %v11381_v58, 5 }
 0x2d3   : > { %v11383_v3 = vshll.u32 %v9468_v17, 16 }
 0x2d4   : > { %v4538_v26 = vor.u32 %v4537_v10, %v4536_v32  ;;  %v11379_v10 = vshll.u32 %v9432_v53, 16  ;;  %v4550_v32 = vrot.slane %v11380_v60, 4  ;;  %v4545_v48 = vor.u32 %v4544_v28, %v4543_v9 }
 0x2d5   : > { %v4555_v9 = vrot.slane %v11383_v3, 5  ;;  %v4558_v28 = vrot.slane %v11384_v54, 4  ;;  %v11386_v60 = vshrl.u32 %v9481_v44, 16  ;;  %v11391_v3 = vshll.u32 %v9515_v14, 16 }
 0x2d6   : > { %v10137_v13 = vsel %vm4425_vm6, %v4538_v26, %v4541_v4  ;;  %v4548_v1 = vrot.slane %v11379_v10, 5  ;;  %v4552_v49 = vor.u32 %v4551_v37, %v4550_v32  ;;  %v10156_v59 = vsel %vm4425_vm6, %v4541_v4, %v4545_v48 }
 0x2d7   : > { %7406 = vmatmul.mubr.msk.bf16.gmra.mrb[56].mxu1 %vm1416_vm4, %v11374_v33  ;;  %v4554_v26 = vrot.slane %v11382_v55, 4  ;;  %v4559_v10 = vrot.slane %v11385_v57, 5  ;;  %v3408_v32 = vsel %vm1317_vm3, %v9773_v38, 0  ;;  %v11388_v38 = vshrl.u32 %v9513_v36, 16 }
 0x2d8   : > { %7708 = vmatmul.mubr.msk.bf16.gmra.mrb[28].mxu0 %vm1416_vm4, %v10104_v34  ;;  %7409 = vmatprep.mubr.msk.bf16.mxu1 %vm1416_vm4, %v11375_v24  ;;  %v4549_v53 = vor.u32 %v4548_v1, %v4547_v15  ;;  %v11387_v15 = vshll.u32 %v9481_v44, 16  ;;  %v8517_v44 = vld [vmem:[%s10910_s6 + $0x4] sm:$0xf]  ;;  %v11392_v54 = vshrl.u32 %v9519_v7, 16  ;;  %v11393_v57 = vshll.u32 %v9519_v7, 16 }
 0x2d9   : > { %7711 = vmatprep.mubr.msk.bf16.mxu0 %vm1416_vm4, %v10119_v52  ;;  %v4556_v31 = vor.u32 %v4555_v9, %v4554_v26  ;;  %v4560_v17 = vor.u32 %v4559_v10, %v4558_v28  ;;  %v4565_v37 = vrot.slane %v11388_v38, 4  ;;  %v4570_v9 = vrot.slane %v11391_v3, 5 }
 0x2da   : > { %v4562_v1 = vrot.slane %v11387_v15, 5  ;;  %v10171_v4 = vsel %vm4425_vm6, %v4549_v53, %v4552_v49  ;;  %v4572_v28 = vrot.slane %v11392_v54, 4  ;;  %v4573_v10 = vrot.slane %v11393_v57, 5 }
 0x2db   : > { %v10192_v53 = vsel %vm4425_vm6, %v4552_v49, %v4556_v31  ;;  %v11394_v7 = vshrl.u32 %v9544_v47, 16  ;;  %v11395_v15 = vshll.u32 %v9544_v47, 16  ;;  %v11397_v31 = vshll.u32 %v9553_v5, 16 }
 0x2dc   : > { %v4574_v49 = vor.u32 %v4573_v10, %v4572_v28  ;;  %v11399_v38 = vshll.u32 %v9557_v0, 16  ;;  %v11403_v28 = vshll.u32 %v9591_v16, 16 }
 0x2de   : > { %v4592_v57 = vrot.slane %v11403_v28, 5 }
 0x2df   : > { %7410 = vmatmul.mubr.msk.bf16.gmra.mrb[60].mxu1 %vm1416_vm4, %v9699_v29 }
 0x2e0   : > { %7712 = vmatmul.mubr.msk.bf16.gmra.mrb[32].mxu0 %vm1416_vm4, %v10134_v50  ;;  %7415 = vmatprep.mubr.msk.bf16.mxu1 %vm1416_vm4, %v9103_v21  ;;  %v4561_v21 = vrot.slane %v11386_v60, 4 }
 0x2e1   : > { %7715 = vmatprep.mubr.msk.bf16.mxu0 %vm1416_vm4, %v10137_v13 }
 0x2e2   : > { %v4563_v58 = vor.u32 %v4562_v1, %v4561_v21  ;;  %v4576_v21 = vrot.slane %v11394_v7, 4  ;;  %v4577_v1 = vrot.slane %v11395_v15, 5  ;;  %v11407_v15 = vshll.u32 %v9629_v45, 16 }
 0x2e4   : > { %v10195_v55 = vsel %vm4425_vm6, %v4560_v17, %v4563_v58  ;;  %v4581_v17 = vrot.slane %v11397_v31, 5  ;;  %v4578_v47 = vor.u32 %v4577_v1, %v4576_v21  ;;  %v4599_v1 = vrot.slane %v11407_v15, 5  ;;  %v11428_v15 = vld [vmem:[#allocation8_spill] sm:$0xff] }
 0x2e6   : > { %v10244_v3 = vsel %vm4425_vm6, %v4574_v49, %v4578_v47 }
 0x2e7   : > { %7416 = vmatmul.mubr.msk.bf16.vlgmr.msra.gmra.mrb[0].mxu1 %vm1416_vm4, %v9129_v43  ;;  %v11389_v43 = vshll.u32 %v9513_v36, 16 }
 0x2e8   : > { %7716 = vmatmul.mubr.msk.bf16.gmra.mrb[36].mxu0 %vm1416_vm4, %v10156_v59  ;;  %7480 = vmatpush3.bf16.msra.mxu1 %v3408_v32  ;;  %v11396_v32 = vshrl.u32 %v9553_v5, 16 }
 0x2e9   : > { %7719 = vmatprep.mubr.msk.bf16.mxu0 %vm1416_vm4, %v10171_v4  ;;  %7419 = vmatprep.mubr.msk.bf16.mxu1 %vm1416_vm4, %v9145_v63  ;;  %v4566_v48 = vrot.slane %v11389_v43, 5  ;;  %v11390_v63 = vshrl.u32 %v9515_v14, 16 }
 0x2ea   : > { %8394 = vmatprep.subr.msk.bf16.mxu1 %vm1317_vm3, %v8517_v44  ;;  %v11398_v44 = vshrl.u32 %v9557_v0, 16  ;;  %v11400_v0 = vshrl.u32 %v9575_v20, 16 }
 0x2eb   : > { %v4569_v26 = vrot.slane %v11390_v63, 4  ;;  %v4567_v36 = vor.u32 %v4566_v48, %v4565_v37  ;;  %v4584_v37 = vrot.slane %v11399_v38, 5  ;;  %v11401_v63 = vshll.u32 %v9575_v20, 16 }
 0x2ec   : > { %v4587_v48 = vrot.slane %v11400_v0, 4 }
 0x2ed   : > { %v4571_v14 = vor.u32 %v4570_v9, %v4569_v26  ;;  %v10214_v60 = vsel %vm4425_vm6, %v4563_v58, %v4567_v36  ;;  %v4588_v26 = vrot.slane %v11401_v63, 5  ;;  %v11402_v9 = vshrl.u32 %v9591_v16, 16 }
 0x2ee   : > { %v11405_v36 = vshll.u32 %v9593_v25, 16 }
 0x2ef   : > { %7420 = vmatmul.mubr.msk.bf16.gmra.mrb[4].mxu1 %vm1416_vm4, %v9193_v41  ;;  %v4580_v41 = vrot.slane %v11396_v32, 4  ;;  %v10229_v58 = vsel %vm4425_vm6, %v4571_v14, %v4574_v49  ;;  %v4591_v54 = vrot.slane %v11402_v9, 4  ;;  %v4589_v20 = vor.u32 %v4588_v26, %v4587_v48 }
 0x2f0   : > { %7720 = vmatmul.mubr.msk.bf16.gmra.mrb[40].mxu0 %vm1416_vm4, %v10192_v53  ;;  %7423 = vmatprep.mubr.msk.bf16.mxu1 %vm1416_vm4, %v9201_v30  ;;  %v4583_v30 = vrot.slane %v11398_v44, 4  ;;  %v4595_v14 = vrot.slane %v11405_v36, 5  ;;  %v11408_v32 = vshrl.u32 %v9636_v39, 16  ;;  %v11411_v44 = vshll.u32 %v9638_v2, 16 }
 0x2f1   : > { %7723 = vmatprep.mubr.msk.bf16.mxu0 %vm1416_vm4, %v10195_v55  ;;  %v4582_v5 = vor.u32 %v4581_v17, %v4580_v41  ;;  %v4593_v16 = vor.u32 %v4592_v57, %v4591_v54  ;;  %v11409_v41 = vshll.u32 %v9636_v39, 16  ;;  %v11410_v17 = vshrl.u32 %v9638_v2, 16  ;;  %v11416_v54 = vld [vmem:[#allocation4_spill] sm:$0xff] }
 0x2f2   : > { %v4585_v43 = vor.u32 %v4584_v37, %v4583_v30  ;;  %v4606_v30 = vrot.slane %v11411_v44, 5  ;;  %v11414_v48 = vshrl.u32 %v8978_v11, 16  ;;  %v11415_v26 = vshll.u32 %v8978_v11, 16  ;;  %v11436_v44 = vld [vmem:[#allocation56_spill] sm:$0xff] }
 0x2f3   : > { %v4603_v31 = vrot.slane %v11409_v41, 5  ;;  %v11418_v57 = vshll.u32 %v11416_v54, 16  ;;  %v11432_v41 = vld [vmem:[#allocation38_spill] sm:$0xff] }
 0x2f4   : > { %v10266_v7 = vsel %vm4425_vm6, %v4585_v43, %v4589_v20  ;;  %v4426_v63 = vrot.slane %v11414_v48, 4  ;;  %v4427_v9 = vrot.slane %v11415_v26, 5  ;;  %v11420_v20 = vld [vmem:[#allocation5_spill] sm:$0xff]  ;;  %v11442_v48 = vld [vmem:[#allocation15_spill] sm:$0xff] }
 0x2f6   : > { %v4428_v11 = vor.u32 %v4427_v9, %v4426_v63  ;;  %v11443_v63 = vld [vmem:[#allocation80_spill] sm:$0xff] }
 0x2f7   : > { %7424 = vmatmul.mubr.msk.bf16.gmra.mrb[8].mxu1 %vm1416_vm4, %v9238_v27  ;;  %v10247_v27 = vsel %vm4425_vm6, %v4582_v5, %v4585_v43  ;;  %v11412_v5 = vshrl.u32 %v9679_v62, 16  ;;  %v2101_v26 = vshrl.u32 %v11443_v63, 16  ;;  %v2104_v9 = vshll.u32 %v11443_v63, 16 }
 0x2f8   : > { %7724 = vmatmul.mubr.msk.bf16.gmra.mrb[44].mxu0 %vm1416_vm4, %v10214_v60  ;;  %7427 = vmatprep.mubr.msk.bf16.mxu1 %vm1416_vm4, %v9241_v40  ;;  %v11404_v40 = vshrl.u32 %v9593_v25, 16  ;;  %v11406_v25 = vshrl.u32 %v9629_v45, 16 }
 0x2f9   : > { %7727 = vmatprep.mubr.msk.bf16.mxu0 %vm1416_vm4, %v10229_v58  ;;  %v4609_v43 = vrot.slane %v11412_v5, 4 }
 0x2fa   : > { %v4594_v10 = vrot.slane %v11404_v40, 4  ;;  %v4598_v21 = vrot.slane %v11406_v25, 4  ;;  %v4430_v40 = vrot.slane %v11418_v57, 5  ;;  %v11423_v25 = vld [vmem:[#allocation81_spill] sm:$0xff]  ;;  %v2103_v57 = vrot.slane %v2101_v26, 3 }
 0x2fc   : > { %v4596_v49 = vor.u32 %v4595_v14, %v4594_v10  ;;  %v4600_v45 = vor.u32 %v4599_v1, %v4598_v21  ;;  %v11427_v21 = vld [vmem:[#allocation49_spill] sm:$0xff]  ;;  %v11429_v1 = vld [vmem:[#allocation50_spill] sm:$0xff] }
 0x2fe   : > { %v10281_v38 = vsel %vm4425_vm6, %v4593_v16, %v4596_v49  ;;  %v10292_v2 = vsel %vm4425_vm6, %v4596_v49, %v4600_v45  ;;  %v5323_v16 = vsel %vm1317_vm3, %v11420_v20, 0  ;;  %v11421_v49 = vld [vmem:[#allocation46_spill] sm:$0xff]  ;;  %v11449_v20 = vld [vmem:[#allocation7_spill] sm:$0xff] }
 0x2ff   : > { %7428 = vmatmul.mubr.msk.bf16.gmra.mrb[12].mxu1 %vm1416_vm4, %v9281_v22  ;;  %v4602_v22 = vrot.slane %v11408_v32, 4  ;;  %v11430_v32 = vld [vmem:[#allocation9_spill] sm:$0xff] }
 0x300   : > { %7728 = vmatmul.mubr.msk.bf16.gmra.mrb[48].mxu0 %vm1416_vm4, %v10244_v3  ;;  %7431 = vmatprep.mubr.msk.bf16.mxu1 %vm1416_vm4, %v9301_v8  ;;  %v4605_v8 = vrot.slane %v11410_v17, 4  ;;  %v11434_v17 = vld [vmem:[#allocation10_spill] sm:$0xff] }
 0x301   : > { %7731 = vmatprep.mubr.msk.bf16.mxu0 %vm1416_vm4, %v10247_v27  ;;  %v4604_v39 = vor.u32 %v4603_v31, %v4602_v22  ;;  %v11431_v22 = vld [vmem:[#allocation51_spill] sm:$0xff]  ;;  %v11433_v31 = vld [vmem:[#allocation40_spill] sm:$0xff] }
 0x302   : > { %v4607_v37 = vor.u32 %v4606_v30, %v4605_v8  ;;  %v11435_v8 = vld [vmem:[#allocation12_spill] sm:$0xff]  ;;  %v11437_v30 = vld [vmem:[#allocation14_spill] sm:$0xff] }
 0x304   : > { %v10295_v47 = vsel %vm4425_vm6, %v4604_v39, %v4607_v37  ;;  %v11440_v39 = vld [vmem:[#allocation78_spill] sm:$0xff] }
 0x305   : > { %v2095_v5 = vshll.u32 %v11440_v39, 16 }
 0x307   : > { %7432 = vmatmul.mubr.msk.bf16.gmra.mrb[16].mxu1 %vm1416_vm4, %v9332_v61  ;;  %v11413_v61 = vshll.u32 %v9679_v62, 16 }
 0x308   : > { %7732 = vmatmul.mubr.msk.bf16.gmra.mrb[52].mxu0 %vm1416_vm4, %v10266_v7  ;;  %7435 = vmatprep.mubr.msk.bf16.mxu1 %vm1416_vm4, %v11272_v56  ;;  %v11417_v56 = vshrl.u32 %v11416_v54, 16  ;;  %v11444_v54 = vld [vmem:[#allocation63_spill] sm:$0xff] }
 0x309   : > { %7735 = vmatprep.mubr.msk.bf16.mxu0 %vm1416_vm4, %v10281_v38  ;;  %v4610_v0 = vrot.slane %v11413_v61, 5 }
 0x30a   : > { %v4429_v28 = vrot.slane %v11417_v56, 4 }
 0x30b   : > { %v4611_v62 = vor.u32 %v4610_v0, %v4609_v43  ;;  %v11441_v0 = vld [vmem:[#allocation44_spill] sm:$0xff] }
 0x30c   : > { %v4431_v10 = vor.u32 %v4430_v40, %v4429_v28  ;;  %v2106_v40 = vrot.slane %v2104_v9, 4 }
 0x30d   : > { %v10318_v36 = vsel %vm4425_vm6, %v4607_v37, %v4611_v62  ;;  %v2092_v37 = vshrl.u32 %v11440_v39, 16  ;;  %v11445_v62 = vld [vmem:[#allocation17_spill] sm:$0xff] }
 0x30e   : > { %v4432_v14 = vsel %vm4425_vm6, %v4428_v11, %v4431_v10  ;;  %v11446_v11 = vld [vmem:[#allocation65_spill] sm:$0xff] }
 0x30f   : > { %7436 = vmatmul.mubr.msk.bf16.gmra.mrb[20].mxu1 %vm1416_vm4, %v11287_v51  ;;  %v11419_v51 = vor.u32 %v9908_v19, %v9904_v18  ;;  %v11425_v18 = vld [vmem:[#allocation48_spill] sm:$0xff]  ;;  %v11426_v19 = vld [vmem:[#allocation45_spill] sm:$0xff]  ;;  %v2094_v61 = vrot.slane %v2092_v37, 3 }
 0x310   : > { %7736 = vmatmul.mubr.msk.bf16.gmra.mrb[56].mxu0 %vm1416_vm4, %v10292_v2  ;;  %7439 = vmatprep.mubr.msk.bf16.mxu1 %vm1416_vm4, %v11288_v23 }
 0x311   : > { %7739 = vmatprep.mubr.msk.bf16.mxu0 %vm1416_vm4, %v10295_v47  ;;  %v4436_v23 = vsel %vm4425_vm6, %v4431_v10, %v11419_v51  ;;  %v11447_v10 = vld [vmem:[#allocation18_spill] sm:$0xff] }
 0x317   : > { %7440 = vmatmul.mubr.msk.bf16.gmra.mrb[24].mxu1 %vm1416_vm4, %v11301_v12  ;;  %v11422_v12 = vld [vmem:[#allocation47_spill] sm:$0xff] }
 0x318   : > { %7740 = vmatmul.mubr.msk.bf16.gmra.mrb[60].mxu0 %vm1416_vm4, %v10318_v36  ;;  %7443 = vmatprep.mubr.msk.bf16.mxu1 %vm1416_vm4, %v11302_v6  ;;  %v11424_v6 = vld [vmem:[#allocation35_spill] sm:$0xff] }
 0x319   : > { %7745 = vmatprep.mubr.msk.bf16.mxu0 %vm1416_vm4, %v4432_v14  ;;  %v2107_v14 = vor.u32 %v2106_v40, %v2103_v57  ;;  %v11478_v57 = vld [vmem:[#allocation75_spill] sm:$0xff]  ;;  %v11479_v40 = vld [vmem:[#allocation76_spill] sm:$0xff] }
 0x31f   : > { %7444 = vmatmul.mubr.msk.bf16.gmra.mrb[28].mxu1 %vm1416_vm4, %v11421_v49  ;;  %v11451_v49 = vld [vmem:[#allocation11_spill] sm:$0xff] }
 0x320   : > { %7746 = vmatmul.mubr.msk.bf16.vlgmr.msra.gmra.mrb[0].mxu0 %vm1416_vm4, %v4436_v23  ;;  %7447 = vmatprep.mubr.msk.bf16.mxu1 %vm1416_vm4, %v11422_v12  ;;  %v11448_v23 = vld [vmem:[#allocation6_spill] sm:$0xff]  ;;  %v11452_v12 = vld [vmem:[#allocation13_spill] sm:$0xff] }
 0x321   : > { %7810 = vmatpush3.bf16.msra.mxu0 %v5323_v16  ;;  %7749 = vmatprep.mubr.msk.bf16.mxu0 %vm1416_vm4, %v11423_v25  ;;  %v11450_v16 = vld [vmem:[#allocation3_spill] sm:$0xff]  ;;  %v11453_v25 = vld [vmem:[#allocation16_spill] sm:$0xff] }
 0x327   : > { %7448 = vmatmul.mubr.msk.bf16.gmra.mrb[32].mxu1 %vm1416_vm4, %v11425_v18  ;;  %v11455_v18 = vld [vmem:[#allocation21_spill] sm:$0xff] }
 0x328   : > { %7750 = vmatmul.mubr.msk.bf16.gmra.mrb[4].mxu0 %vm1416_vm4, %v11424_v6  ;;  %7451 = vmatprep.mubr.msk.bf16.mxu1 %vm1416_vm4, %v11427_v21  ;;  %v11454_v6 = vld [vmem:[#allocation19_spill] sm:$0xff]  ;;  %v11456_v21 = vld [vmem:[#allocation24_spill] sm:$0xff] }
 0x329   : > { %7753 = vmatprep.mubr.msk.bf16.mxu0 %vm1416_vm4, %v11426_v19 }
 0x32f   : > { %7452 = vmatmul.mubr.msk.bf16.gmra.mrb[36].mxu1 %vm1416_vm4, %v11429_v1  ;;  %v11457_v1 = vld [vmem:[#allocation25_spill] sm:$0xff] }
 0x330   : > { %7754 = vmatmul.mubr.msk.bf16.gmra.mrb[8].mxu0 %vm1416_vm4, %v11428_v15  ;;  %7455 = vmatprep.mubr.msk.bf16.mxu1 %vm1416_vm4, %v11431_v22  ;;  %v11458_v22 = vld [vmem:[#allocation29_spill] sm:$0xff] }
 0x331   : > { %7757 = vmatprep.mubr.msk.bf16.mxu0 %vm1416_vm4, %v11430_v32 }
 0x337   : > { %7456 = vmatmul.mubr.msk.bf16.gmra.mrb[40].mxu1 %vm1416_vm4, %v11353_v42  ;;  %v11438_v42 = vld [vmem:[#allocation43_spill] sm:$0xff] }
 0x338   : > { %7758 = vmatmul.mubr.msk.bf16.gmra.mrb[12].mxu0 %vm1416_vm4, %v11432_v41  ;;  %7459 = vmatprep.mubr.msk.bf16.mxu1 %vm1416_vm4, %v11354_v46  ;;  %v11439_v46 = vld [vmem:[#allocation77_spill] sm:$0xff] }
 0x339   : > { %7761 = vmatprep.mubr.msk.bf16.mxu0 %vm1416_vm4, %v11433_v31  ;;  %v2087_v45 = vshll.u32 %v11439_v46, 16 }
 0x33f   : > { %7460 = vmatmul.mubr.msk.bf16.gmra.mrb[44].mxu1 %vm1416_vm4, %v11364_v35  ;;  %v2084_v35 = vshrl.u32 %v11439_v46, 16 }
 0x340   : > { %7762 = vmatmul.mubr.msk.bf16.gmra.mrb[16].mxu0 %vm1416_vm4, %v11434_v17  ;;  %7463 = vmatprep.mubr.msk.bf16.mxu1 %vm1416_vm4, %v11436_v44  ;;  %v11459_v44 = vld [vmem:[#allocation30_spill] sm:$0xff] }
 0x341   : > { %7765 = vmatprep.mubr.msk.bf16.mxu0 %vm1416_vm4, %v11435_v8  ;;  %v2086_v43 = vrot.slane %v2084_v35, 3 }
 0x347   : > { %7464 = vmatmul.mubr.msk.bf16.gmra.mrb[48].mxu1 %vm1416_vm4, %v11374_v33  ;;  %v2089_v33 = vrot.slane %v2087_v45, 4 }
 0x348   : > { %7766 = vmatmul.mubr.msk.bf16.gmra.mrb[20].mxu0 %vm1416_vm4, %v11437_v30  ;;  %7467 = vmatprep.mubr.msk.bf16.mxu1 %vm1416_vm4, %v11375_v24  ;;  %v2097_v24 = vrot.slane %v2095_v5, 4 }
 0x349   : > { %7769 = vmatprep.mubr.msk.bf16.mxu0 %vm1416_vm4, %v11438_v42  ;;  %v2090_v56 = vor.u32 %v2089_v33, %v2086_v43  ;;  %v11460_v43 = vld [vmem:[#allocation34_spill] sm:$0xff]  ;;  %v11461_v33 = vld [vmem:[#allocation36_spill] sm:$0xff] }
 0x34a   : > { %v2098_v28 = vor.u32 %v2097_v24, %v2094_v61  ;;  %v11462_v61 = vld [vmem:[#allocation39_spill] sm:$0xff] }
 0x34b   : > { %v11463_v24 = vld [vmem:[#allocation55_spill] sm:$0xff] }
 0x34c   : > { %v2108_v51 = vsel %vm1640_vm5, %v2098_v28, %v2107_v14 }
 0x34f   : > { %7468 = vmatmul.mubr.msk.bf16.gmra.mrb[52].mxu1 %vm1416_vm4, %v9699_v29  ;;  %v2099_v29 = vsel %vm1640_vm5, %v2090_v56, %v2098_v28  ;;  %v11465_v56 = vld [vmem:[#allocation60_spill] sm:$0xff]  ;;  %v11466_v28 = vld [vmem:[#allocation61_spill] sm:$0xff] }
 0x350   : > { %7770 = vmatmul.mubr.msk.bf16.gmra.mrb[24].mxu0 %vm1416_vm4, %v11441_v0  ;;  %7471 = vmatprep.mubr.msk.bf16.mxu1 %vm1416_vm4, %v11444_v54  ;;  %v11464_v54 = vld [vmem:[#allocation57_spill] sm:$0xff] }
 0x351   : > { %7773 = vmatprep.mubr.msk.bf16.mxu0 %vm1416_vm4, %v11442_v48 }
 0x357   : > { %7472 = vmatmul.mubr.msk.bf16.gmra.mrb[56].mxu1 %vm1416_vm4, %v11446_v11 }
 0x358   : > { %7774 = vmatmul.mubr.msk.bf16.gmra.mrb[28].mxu0 %vm1416_vm4, %v11445_v62  ;;  %7475 = vmatprep.mubr.msk.bf16.mxu1 %vm1416_vm4, %v2099_v29 }
 0x359   : > { %7777 = vmatprep.mubr.msk.bf16.mxu0 %vm1416_vm4, %v11447_v10 }
 0x35f   : > { %7476 = vmatmul.mubr.msk.bf16.gmra.mrb[60].mxu1 %vm1416_vm4, %v2108_v51 }
 0x360   : > { %7778 = vmatmul.mubr.msk.bf16.gmra.mrb[32].mxu0 %vm1416_vm4, %v10104_v34  ;;  %7481 = vmatprep.mubr.msk.bf16.mxu1 %vm1416_vm4, %v11448_v23 }
 0x361   : > { %7781 = vmatprep.mubr.msk.bf16.mxu0 %vm1416_vm4, %v10119_v52 }
 0x367   : > { %7482 = vmatmul.mubr.msk.bf16.vlgmr.msra.gmra.mrb[0].mxu1 %vm1416_vm4, %v11449_v20 }
 0x368   : > { %7782 = vmatmul.mubr.msk.bf16.gmra.mrb[36].mxu0 %vm1416_vm4, %v10134_v50  ;;  %7876 = vmatpush3.bf16.msra.mxu1 %v11450_v16 }
 0x369   : > { %7785 = vmatprep.mubr.msk.bf16.mxu0 %vm1416_vm4, %v10137_v13  ;;  %7485 = vmatprep.mubr.msk.bf16.mxu1 %vm1416_vm4, %v11451_v49 }
 0x36f   : > { %7486 = vmatmul.mubr.msk.bf16.gmra.mrb[4].mxu1 %vm1416_vm4, %v11452_v12 }
 0x370   : > { %7786 = vmatmul.mubr.msk.bf16.gmra.mrb[40].mxu0 %vm1416_vm4, %v10156_v59  ;;  %7489 = vmatprep.mubr.msk.bf16.mxu1 %vm1416_vm4, %v11453_v25 }
 0x371   : > { %7789 = vmatprep.mubr.msk.bf16.mxu0 %vm1416_vm4, %v10171_v4 }
 0x377   : > { %7490 = vmatmul.mubr.msk.bf16.gmra.mrb[8].mxu1 %vm1416_vm4, %v11454_v6 }
 0x378   : > { %7790 = vmatmul.mubr.msk.bf16.gmra.mrb[44].mxu0 %vm1416_vm4, %v10192_v53  ;;  %7493 = vmatprep.mubr.msk.bf16.mxu1 %vm1416_vm4, %v11455_v18 }
 0x379   : > { %7793 = vmatprep.mubr.msk.bf16.mxu0 %vm1416_vm4, %v10195_v55 }
 0x37f   : > { %7494 = vmatmul.mubr.msk.bf16.gmra.mrb[12].mxu1 %vm1416_vm4, %v11456_v21 }
 0x380   : > { %7794 = vmatmul.mubr.msk.bf16.gmra.mrb[48].mxu0 %vm1416_vm4, %v10214_v60  ;;  %7497 = vmatprep.mubr.msk.bf16.mxu1 %vm1416_vm4, %v11457_v1  ;;  %v10663_v1 = vld [vmem:[%s10911_s7] ss:$0 sm:$0xff] }
 0x381   : > { %7797 = vmatprep.mubr.msk.bf16.mxu0 %vm1416_vm4, %v10229_v58 }
 0x387   : > { %7498 = vmatmul.mubr.msk.bf16.gmra.mrb[16].mxu1 %vm1416_vm4, %v11458_v22 }
 0x388   : > { %7798 = vmatmul.mubr.msk.bf16.gmra.mrb[52].mxu0 %vm1416_vm4, %v10244_v3  ;;  %7501 = vmatprep.mubr.msk.bf16.mxu1 %vm1416_vm4, %v11459_v44 }
 0x389   : > { %7801 = vmatprep.mubr.msk.bf16.mxu0 %vm1416_vm4, %v10247_v27 }
 0x38f   : > { %7502 = vmatmul.mubr.msk.bf16.gmra.mrb[20].mxu1 %vm1416_vm4, %v11460_v43 }
 0x390   : > { %7802 = vmatmul.mubr.msk.bf16.gmra.mrb[56].mxu0 %vm1416_vm4, %v10266_v7  ;;  %7505 = vmatprep.mubr.msk.bf16.mxu1 %vm1416_vm4, %v11461_v33 }
 0x391   : > { %7805 = vmatprep.mubr.msk.bf16.mxu0 %vm1416_vm4, %v10281_v38 }
 0x397   : > { %7506 = vmatmul.mubr.msk.bf16.gmra.mrb[24].mxu1 %vm1416_vm4, %v11462_v61 }
 0x398   : > { %7806 = vmatmul.mubr.msk.bf16.gmra.mrb[60].mxu0 %vm1416_vm4, %v10292_v2  ;;  %7509 = vmatprep.mubr.msk.bf16.mxu1 %vm1416_vm4, %v11463_v24 }
 0x399   : > { %7811 = vmatprep.mubr.msk.bf16.mxu0 %vm1416_vm4, %v11426_v19  ;;  %v11467_v19 = vld [vmem:[#allocation62_spill] sm:$0xff] }
 0x39f   : > { %7510 = vmatmul.mubr.msk.bf16.gmra.mrb[28].mxu1 %vm1416_vm4, %v11464_v54 }
 0x3a0   : > { %7812 = vmatmul.mubr.msk.bf16.vlgmr.msra.gmra.mrb[0].mxu0 %vm1416_vm4, %v11428_v15  ;;  %7513 = vmatprep.mubr.msk.bf16.mxu1 %vm1416_vm4, %v11465_v56  ;;  %v11468_v15 = vld [vmem:[#allocation64_spill] sm:$0xff] }
 0x3a1   : > { %7815 = vmatprep.mubr.msk.bf16.mxu0 %vm1416_vm4, %v11430_v32  ;;  %v11469_v32 = vld [vmem:[#allocation66_spill] sm:$0xff] }
 0x3a7   : > { %7514 = vmatmul.mubr.msk.bf16.gmra.mrb[32].mxu1 %vm1416_vm4, %v11466_v28 }
 0x3a8   : > { %7816 = vmatmul.mubr.msk.bf16.gmra.mrb[4].mxu0 %vm1416_vm4, %v11432_v41  ;;  %7517 = vmatprep.mubr.msk.bf16.mxu1 %vm1416_vm4, %v11467_v19  ;;  %v11470_v41 = vld [vmem:[#allocation67_spill] sm:$0xff] }
 0x3a9   : > { %7819 = vmatprep.mubr.msk.bf16.mxu0 %vm1416_vm4, %v11433_v31  ;;  %v11471_v31 = vld [vmem:[#allocation68_spill] sm:$0xff] }
 0x3af   : > { %7518 = vmatmul.mubr.msk.bf16.gmra.mrb[36].mxu1 %vm1416_vm4, %v11468_v15 }
 0x3b0   : > { %7820 = vmatmul.mubr.msk.bf16.gmra.mrb[8].mxu0 %vm1416_vm4, %v11434_v17  ;;  %7521 = vmatprep.mubr.msk.bf16.mxu1 %vm1416_vm4, %v11469_v32  ;;  %v11472_v17 = vld [vmem:[#allocation69_spill] sm:$0xff] }
 0x3b1   : > { %7823 = vmatprep.mubr.msk.bf16.mxu0 %vm1416_vm4, %v11435_v8  ;;  %v11473_v8 = vld [vmem:[#allocation70_spill] sm:$0xff] }
 0x3b7   : > { %7522 = vmatmul.mubr.msk.bf16.gmra.mrb[40].mxu1 %vm1416_vm4, %v11470_v41 }
 0x3b8   : > { %7824 = vmatmul.mubr.msk.bf16.gmra.mrb[12].mxu0 %vm1416_vm4, %v11437_v30  ;;  %7525 = vmatprep.mubr.msk.bf16.mxu1 %vm1416_vm4, %v11471_v31  ;;  %v11474_v30 = vld [vmem:[#allocation71_spill] sm:$0xff] }
 0x3b9   : > { %7827 = vmatprep.mubr.msk.bf16.mxu0 %vm1416_vm4, %v11438_v42  ;;  %v11475_v42 = vld [vmem:[#allocation72_spill] sm:$0xff] }
 0x3bf   : > { %7526 = vmatmul.mubr.msk.bf16.gmra.mrb[44].mxu1 %vm1416_vm4, %v11472_v17 }
 0x3c0   : > { %7828 = vmatmul.mubr.msk.bf16.gmra.mrb[16].mxu0 %vm1416_vm4, %v11441_v0  ;;  %7529 = vmatprep.mubr.msk.bf16.mxu1 %vm1416_vm4, %v11473_v8  ;;  %v11476_v0 = vld [vmem:[#allocation73_spill] sm:$0xff] }
 0x3c1   : > { %7831 = vmatprep.mubr.msk.bf16.mxu0 %vm1416_vm4, %v11442_v48  ;;  %v11477_v48 = vld [vmem:[#allocation74_spill] sm:$0xff] }
 0x3c7   : > { %7530 = vmatmul.mubr.msk.bf16.gmra.mrb[48].mxu1 %vm1416_vm4, %v11474_v30 }
 0x3c8   : > { %7832 = vmatmul.mubr.msk.bf16.gmra.mrb[20].mxu0 %vm1416_vm4, %v11445_v62  ;;  %7533 = vmatprep.mubr.msk.bf16.mxu1 %vm1416_vm4, %v11475_v42 }
 0x3c9   : > { %7835 = vmatprep.mubr.msk.bf16.mxu0 %vm1416_vm4, %v11447_v10 }
 0x3cf   : > { %7534 = vmatmul.mubr.msk.bf16.gmra.mrb[52].mxu1 %vm1416_vm4, %v11476_v0 }
 0x3d0   : > { %7836 = vmatmul.mubr.msk.bf16.gmra.mrb[24].mxu0 %vm1416_vm4, %v10104_v34  ;;  %7537 = vmatprep.mubr.msk.bf16.mxu1 %vm1416_vm4, %v11477_v48  ;;  %v11480_v34 = vld [vmem:[#allocation79_spill] sm:$0xff] }
 0x3d1   : > { %7839 = vmatprep.mubr.msk.bf16.mxu0 %vm1416_vm4, %v10119_v52  ;;  %v4613_v52 = vrot.slane %v2084_v35, 4 }
 0x3d7   : > { %7538 = vmatmul.mubr.msk.bf16.gmra.mrb[56].mxu1 %vm1416_vm4, %v11478_v57 }
 0x3d8   : > { %7840 = vmatmul.mubr.msk.bf16.gmra.mrb[28].mxu0 %vm1416_vm4, %v10134_v50  ;;  %7541 = vmatprep.mubr.msk.bf16.mxu1 %vm1416_vm4, %v11479_v40  ;;  %v4614_v50 = vrot.slane %v2087_v45, 5 }
 0x3d9   : > { %7843 = vmatprep.mubr.msk.bf16.mxu0 %vm1416_vm4, %v10137_v13  ;;  %v4616_v13 = vrot.slane %v2092_v37, 4 }
 0x3df   : > { %7542 = vmatmul.mubr.msk.bf16.gmra.mrb[60].mxu1 %vm1416_vm4, %v11480_v34 }
 0x3e0   : > { %7844 = vmatmul.mubr.msk.bf16.gmra.mrb[32].mxu0 %vm1416_vm4, %v10156_v59  ;;  %7579 = vmatprep.mubr.msk.bf16.mxu1 %vm1416_vm4, %v11463_v24  ;;  %v4617_v59 = vrot.slane %v2095_v5, 5 }
 0x3e1   : > { %7847 = vmatprep.mubr.msk.bf16.mxu0 %vm1416_vm4, %v10171_v4  ;;  %v4615_v4 = vor.u32 %v4614_v50, %v4613_v52 }
 0x3e7   : > { %7580 = vmatmul.mubr.msk.bf16.vlgmr.msra.gmra.mrb[32].mxu1 %vm1416_vm4, %v11464_v54 }
 0x3e8   : > { %7848 = vmatmul.mubr.msk.bf16.gmra.mrb[36].mxu0 %vm1416_vm4, %v10192_v53  ;;  %7583 = vmatprep.mubr.msk.bf16.mxu1 %vm1416_vm4, %v11465_v56  ;;  %v4618_v53 = vor.u32 %v4617_v59, %v4616_v13 }
 0x3e9   : > { %7851 = vmatprep.mubr.msk.bf16.mxu0 %vm1416_vm4, %v10195_v55  ;;  %v4620_v55 = vrot.slane %v2101_v26, 4 }
 0x3ef   : > { %7584 = vmatmul.mubr.msk.bf16.gmra.mrb[36].mxu1 %vm1416_vm4, %v11466_v28 }
 0x3f0   : > { %7852 = vmatmul.mubr.msk.bf16.gmra.mrb[40].mxu0 %vm1416_vm4, %v10214_v60  ;;  %7587 = vmatprep.mubr.msk.bf16.mxu1 %vm1416_vm4, %v11467_v19  ;;  %v4621_v60 = vrot.slane %v2104_v9, 5 }
 0x3f1   : > { %7855 = vmatprep.mubr.msk.bf16.mxu0 %vm1416_vm4, %v10229_v58  ;;  %v4619_v58 = vsel %vm4425_vm6, %v4615_v4, %v4618_v53 }
 0x3f7   : > { %7588 = vmatmul.mubr.msk.bf16.gmra.mrb[40].mxu1 %vm1416_vm4, %v11468_v15 }
 0x3f8   : > { %7856 = vmatmul.mubr.msk.bf16.gmra.mrb[44].mxu0 %vm1416_vm4, %v10244_v3  ;;  %7591 = vmatprep.mubr.msk.bf16.mxu1 %vm1416_vm4, %v11469_v32  ;;  %v4622_v3 = vor.u32 %v4621_v60, %v4620_v55 }
 0x3f9   : > { %7859 = vmatprep.mubr.msk.bf16.mxu0 %vm1416_vm4, %v10247_v27 }
 0x3fa   : > { %v4623_v27 = vsel %vm4425_vm6, %v4618_v53, %v4622_v3 }
 0x3ff   : > { %7592 = vmatmul.mubr.msk.bf16.gmra.mrb[44].mxu1 %vm1416_vm4, %v11470_v41 }
 0x400   : > { %7860 = vmatmul.mubr.msk.bf16.gmra.mrb[48].mxu0 %vm1416_vm4, %v10266_v7  ;;  %7595 = vmatprep.mubr.msk.bf16.mxu1 %vm1416_vm4, %v11471_v31 }
 0x401   : > { %7863 = vmatprep.mubr.msk.bf16.mxu0 %vm1416_vm4, %v10281_v38 }
 0x407   : > { %7596 = vmatmul.mubr.msk.bf16.gmra.mrb[48].mxu1 %vm1416_vm4, %v11472_v17 }
 0x408   : > { %7864 = vmatmul.mubr.msk.bf16.gmra.mrb[52].mxu0 %vm1416_vm4, %v10292_v2  ;;  %7599 = vmatprep.mubr.msk.bf16.mxu1 %vm1416_vm4, %v11473_v8 }
 0x409   : > { %7867 = vmatprep.mubr.msk.bf16.mxu0 %vm1416_vm4, %v10295_v47 }
 0x40f   : > { %7600 = vmatmul.mubr.msk.bf16.gmra.mrb[52].mxu1 %vm1416_vm4, %v11474_v30 }
 0x410   : > { %7868 = vmatmul.mubr.msk.bf16.gmra.mrb[56].mxu0 %vm1416_vm4, %v10318_v36  ;;  %7603 = vmatprep.mubr.msk.bf16.mxu1 %vm1416_vm4, %v11475_v42 }
 0x411   : > { %7871 = vmatprep.mubr.msk.bf16.mxu0 %vm1416_vm4, %v4619_v58 }
 0x417   : > { %7604 = vmatmul.mubr.msk.bf16.gmra.mrb[56].mxu1 %vm1416_vm4, %v11476_v0 }
 0x418   : > { %7872 = vmatmul.mubr.msk.bf16.gmra.mrb[60].mxu0 %vm1416_vm4, %v4623_v27  ;;  %7607 = vmatprep.mubr.msk.bf16.mxu1 %vm1416_vm4, %v11477_v48 }
 0x41f   : > { %7608 = vmatmul.mubr.msk.bf16.gmra.mrb[60].mxu1 %vm1416_vm4, %v11478_v57 }
 0x43a   : > { %v7483_v7 = vpop.f32.mrb[0].mxu1 }
 0x43b   : > { %v3444_v38 = vpop.f32.mrb[1].mxu1 }
 0x43c   : > { %v7484_v2 = vpop.f32.mrb[2].mxu1 }
 0x43d   : > { %v3447_v47 = vpop.f32.mrb[3].mxu1 }
 0x442   : > { %v7487_v36 = vpop.f32.mrb[4].mxu1 }
 0x443   : > { %v3460_v46 = vpop.f32.mrb[5].mxu1 }
 0x444   : > { %v7488_v35 = vpop.f32.mrb[6].mxu1 }
 0x445   : > { %v3463_v45 = vpop.f32.mrb[7].mxu1 }
 0x44a   : > { %v10620_v39 = vpop.f32.mrb[8].mxu1 }
 0x44b   : > { %v10622_v37 = vpop.f32.mrb[9].mxu1 }
 0x44c   : > { %v10624_v5 = vpop.f32.mrb[10].mxu1 }
 0x44d   : > { %v10626_v63 = vpop.f32.mrb[11].mxu1 }
 0x452   : > { %v10628_v26 = vpop.f32.mrb[12].mxu1 }
 0x453   : > { %v10630_v9 = vpop.f32.mrb[13].mxu1 }
 0x454   : > { %v10632_v29 = vpop.f32.mrb[14].mxu1 }
 0x455   : > { %v10634_v62 = vpop.f32.mrb[15].mxu1 }
 0x45a   : > { %v10636_v11 = vpop.f32.mrb[16].mxu1 }
 0x45b   : > { %v10638_v10 = vpop.f32.mrb[17].mxu1 }
 0x45c   : > { %v10640_v14 = vpop.f32.mrb[18].mxu1 }
 0x45d   : > { %v10642_v51 = vpop.f32.mrb[19].mxu1 }
 0x462   : > { %v10644_v23 = vpop.f32.mrb[20].mxu1 }
 0x463   : > { %v10646_v20 = vpop.f32.mrb[21].mxu1 }
 0x464   : > { %v10648_v16 = vpop.f32.mrb[22].mxu1 }
 0x465   : > { %v10650_v49 = vpop.f32.mrb[23].mxu1 }
 0x46a   : > { %v10652_v12 = vpop.f32.mrb[24].mxu1 }
 0x46b   : > { %v10654_v25 = vpop.f32.mrb[25].mxu1 }
 0x46c   : > { %v10656_v6 = vpop.f32.mrb[26].mxu1 }
 0x46d   : > { %v10658_v18 = vpop.f32.mrb[27].mxu1 }
 0x472   : > { %v10665_v22 = vpop.f32.mrb[28].mxu1 }
 0x473   : > { %v7813_v21 = vpop.f32.mrb[0].mxu0  ;;  %v10667_v33 = vpop.f32.mrb[29].mxu1 }
 0x474   : > { %v7877_v44 = vadd.f32 %v7813_v21, %v7483_v7  ;;  %v5359_v43 = vpop.f32.mrb[1].mxu0  ;;  %v10669_v54 = vpop.f32.mrb[30].mxu1 }
 0x475   : > { %v7878_v61 = vadd.f32 %v5359_v43, %v3444_v38  ;;  %v7814_v24 = vpop.f32.mrb[2].mxu0  ;;  %v10672_v15 = vpop.f32.mrb[31].mxu1 }
 0x476   : > { %v5751_v56 = vadd.f32 %v7877_v44, %v10663_v1  ;;  %v7879_v28 = vadd.f32 %v7814_v24, %v7484_v2  ;;  %v5362_v19 = vpop.f32.mrb[3].mxu0 }
 0x477   : > { %v5749_v32 = vadd.f32 %v7878_v61, %v10663_v1  ;;  %v7880_v41 = vadd.f32 %v5362_v19, %v3447_v47 }
 0x478   : > { %v5815_v31 = vmax.f32 %v5751_v56, 0.0  ;;  %v5752_v17 = vadd.f32 %v7879_v28, %v10663_v1 }
 0x479   : > { %v5813_v8 = vmax.f32 %v5749_v32, 0.0  ;;  %v5750_v30 = vadd.f32 %v7880_v41, %v10663_v1 }
 0x47a   : > { %v6922_v42 = vpack.c.bf16 %v5815_v31, %v5815_v31  ;;  %v5816_v0 = vmax.f32 %v5752_v17, 0.0 }
 0x47b   : > { %v6920_v48 = vpack.c.bf16 %v5813_v8, %v5813_v8  ;;  %v5814_v57 = vmax.f32 %v5750_v30, 0.0  ;;  %v7817_v40 = vpop.f32.mrb[4].mxu0 }
 0x47c   : > { %6136 = vst.msk [vmem:[%s8744_s1 + $0x8] sm:$0xf] %vm6133_vm7, %v6922_v42  ;;  %v6923_v34 = vpack.c.bf16 %v5816_v0, %v5816_v0  ;;  %v7881_v52 = vadd.f32 %v7817_v40, %v7487_v36  ;;  %v5375_v50 = vpop.f32.mrb[5].mxu0 }
 0x47d   : > { %6134 = vst.msk [vmem:[%s8744_s1] sm:$0xf] %vm6133_vm7, %v6920_v48  ;;  %v6921_v13 = vpack.c.bf16 %v5814_v57, %v5814_v57  ;;  %v7882_v59 = vadd.f32 %v5375_v50, %v3460_v46  ;;  %v7818_v4 = vpop.f32.mrb[6].mxu0 }
 0x47e   : > { %6137 = vst.msk [vmem:[%s8744_s1 + $0xc] sm:$0xf] %vm6133_vm7, %v6923_v34  ;;  %v5755_v53 = vadd.f32 %v7881_v52, %v10663_v1  ;;  %v7883_v55 = vadd.f32 %v7818_v4, %v7488_v35  ;;  %v5378_v60 = vpop.f32.mrb[7].mxu0 }
 0x47f   : > { %6135 = vst.msk [vmem:[%s8744_s1 + $0x4] sm:$0xf] %vm6133_vm7, %v6921_v13  ;;  %v5753_v58 = vadd.f32 %v7882_v59, %v10663_v1  ;;  %v7884_v3 = vadd.f32 %v5378_v60, %v3463_v45 }
 0x480   : > { %v5819_v27 = vmax.f32 %v5755_v53, 0.0  ;;  %v5756_v7 = vadd.f32 %v7883_v55, %v10663_v1 }
 0x481   : > { %v5817_v38 = vmax.f32 %v5753_v58, 0.0  ;;  %v5754_v2 = vadd.f32 %v7884_v3, %v10663_v1 }
 0x482   : > { %v6926_v47 = vpack.c.bf16 %v5819_v27, %v5819_v27  ;;  %v5820_v36 = vmax.f32 %v5756_v7, 0.0 }
 0x483   : > { %v6924_v46 = vpack.c.bf16 %v5817_v38, %v5817_v38  ;;  %v5818_v21 = vmax.f32 %v5754_v2, 0.0  ;;  %v7821_v35 = vpop.f32.mrb[8].mxu0 }
 0x484   : > { %6140 = vst.msk [vmem:[%s8744_s1 + $0x18] sm:$0xf] %vm6133_vm7, %v6926_v47  ;;  %v6927_v44 = vpack.c.bf16 %v5820_v36, %v5820_v36  ;;  %v7885_v43 = vadd.f32 %v7821_v35, %v10620_v39  ;;  %v5391_v61 = vpop.f32.mrb[9].mxu0 }
 0x485   : > { %6138 = vst.msk [vmem:[%s8744_s1 + $0x10] sm:$0xf] %vm6133_vm7, %v6924_v46  ;;  %v6925_v45 = vpack.c.bf16 %v5818_v21, %v5818_v21  ;;  %v7886_v24 = vadd.f32 %v5391_v61, %v10622_v37  ;;  %v7822_v56 = vpop.f32.mrb[10].mxu0 }
 0x486   : > { %6141 = vst.msk [vmem:[%s8744_s1 + $0x1c] sm:$0xf] %vm6133_vm7, %v6927_v44  ;;  %v5759_v28 = vadd.f32 %v7885_v43, %v10663_v1  ;;  %v7887_v19 = vadd.f32 %v7822_v56, %v10624_v5  ;;  %v5394_v32 = vpop.f32.mrb[11].mxu0 }
 0x487   : > { %6139 = vst.msk [vmem:[%s8744_s1 + $0x14] sm:$0xf] %vm6133_vm7, %v6925_v45  ;;  %v5757_v39 = vadd.f32 %v7886_v24, %v10663_v1  ;;  %v7888_v41 = vadd.f32 %v5394_v32, %v10626_v63 }
 0x488   : > { %v5823_v31 = vmax.f32 %v5759_v28, 0.0  ;;  %v5760_v17 = vadd.f32 %v7887_v19, %v10663_v1 }
 0x489   : > { %v5821_v37 = vmax.f32 %v5757_v39, 0.0  ;;  %v5758_v8 = vadd.f32 %v7888_v41, %v10663_v1 }
 0x48a   : > { %v6930_v30 = vpack.c.bf16 %v5823_v31, %v5823_v31  ;;  %v5824_v42 = vmax.f32 %v5760_v17, 0.0 }
 0x48b   : > { %v6928_v0 = vpack.c.bf16 %v5821_v37, %v5821_v37  ;;  %v5822_v5 = vmax.f32 %v5758_v8, 0.0  ;;  %v7825_v48 = vpop.f32.mrb[12].mxu0 }
 0x48c   : > { %6144 = vst.msk [vmem:[%s8744_s1 + $0x28] sm:$0xf] %vm6133_vm7, %v6930_v30  ;;  %v6931_v57 = vpack.c.bf16 %v5824_v42, %v5824_v42  ;;  %v7889_v40 = vadd.f32 %v7825_v48, %v10628_v26  ;;  %v5407_v34 = vpop.f32.mrb[13].mxu0 }
 0x48d   : > { %6142 = vst.msk [vmem:[%s8744_s1 + $0x20] sm:$0xf] %vm6133_vm7, %v6928_v0  ;;  %v6929_v63 = vpack.c.bf16 %v5822_v5, %v5822_v5  ;;  %v7890_v52 = vadd.f32 %v5407_v34, %v10630_v9  ;;  %v7826_v50 = vpop.f32.mrb[14].mxu0 }
 0x48e   : > { %6145 = vst.msk [vmem:[%s8744_s1 + $0x2c] sm:$0xf] %vm6133_vm7, %v6931_v57  ;;  %v5763_v13 = vadd.f32 %v7889_v40, %v10663_v1  ;;  %v7891_v59 = vadd.f32 %v7826_v50, %v10632_v29  ;;  %v5410_v4 = vpop.f32.mrb[15].mxu0 }
 0x48f   : > { %6143 = vst.msk [vmem:[%s8744_s1 + $0x24] sm:$0xf] %vm6133_vm7, %v6929_v63  ;;  %v5761_v26 = vadd.f32 %v7890_v52, %v10663_v1  ;;  %v7892_v53 = vadd.f32 %v5410_v4, %v10634_v62 }
 0x490   : > { %v5827_v55 = vmax.f32 %v5763_v13, 0.0  ;;  %v5764_v60 = vadd.f32 %v7891_v59, %v10663_v1 }
 0x491   : > { %v5825_v9 = vmax.f32 %v5761_v26, 0.0  ;;  %v5762_v58 = vadd.f32 %v7892_v53, %v10663_v1 }
 0x492   : > { %v6934_v3 = vpack.c.bf16 %v5827_v55, %v5827_v55  ;;  %v5828_v27 = vmax.f32 %v5764_v60, 0.0 }
 0x493   : > { %v6932_v7 = vpack.c.bf16 %v5825_v9, %v5825_v9  ;;  %v5826_v29 = vmax.f32 %v5762_v58, 0.0  ;;  %v7829_v38 = vpop.f32.mrb[16].mxu0 }
 0x494   : > { %6148 = vst.msk [vmem:[%s8744_s1 + $0x38] sm:$0xf] %vm6133_vm7, %v6934_v3  ;;  %v6935_v2 = vpack.c.bf16 %v5828_v27, %v5828_v27  ;;  %v7893_v47 = vadd.f32 %v7829_v38, %v10636_v11  ;;  %v5423_v36 = vpop.f32.mrb[17].mxu0 }
 0x495   : > { %6146 = vst.msk [vmem:[%s8744_s1 + $0x30] sm:$0xf] %vm6133_vm7, %v6932_v7  ;;  %v6933_v62 = vpack.c.bf16 %v5826_v29, %v5826_v29  ;;  %v7894_v46 = vadd.f32 %v5423_v36, %v10638_v10  ;;  %v7830_v21 = vpop.f32.mrb[18].mxu0 }
 0x496   : > { %6149 = vst.msk [vmem:[%s8744_s1 + $0x3c] sm:$0xf] %vm6133_vm7, %v6935_v2  ;;  %v5767_v35 = vadd.f32 %v7893_v47, %v10663_v1  ;;  %v7895_v44 = vadd.f32 %v7830_v21, %v10640_v14  ;;  %v5426_v43 = vpop.f32.mrb[19].mxu0 }
 0x497   : > { %6147 = vst.msk [vmem:[%s8744_s1 + $0x34] sm:$0xf] %vm6133_vm7, %v6933_v62  ;;  %v5765_v11 = vadd.f32 %v7894_v46, %v10663_v1  ;;  %v7896_v61 = vadd.f32 %v5426_v43, %v10642_v51 }
 0x498   : > { %v5831_v45 = vmax.f32 %v5767_v35, 0.0  ;;  %v5768_v24 = vadd.f32 %v7895_v44, %v10663_v1 }
 0x499   : > { %v5829_v10 = vmax.f32 %v5765_v11, 0.0  ;;  %v5766_v56 = vadd.f32 %v7896_v61, %v10663_v1 }
 0x49a   : > { %v6938_v28 = vpack.c.bf16 %v5831_v45, %v5831_v45  ;;  %v5832_v19 = vmax.f32 %v5768_v24, 0.0 }
 0x49b   : > { %v6936_v32 = vpack.c.bf16 %v5829_v10, %v5829_v10  ;;  %v5830_v14 = vmax.f32 %v5766_v56, 0.0  ;;  %v7833_v39 = vpop.f32.mrb[20].mxu0 }
 0x49c   : > { %6152 = vst.msk [vmem:[%s8744_s1 + $0x48] sm:$0xf] %vm6133_vm7, %v6938_v28  ;;  %v6939_v41 = vpack.c.bf16 %v5832_v19, %v5832_v19  ;;  %v7897_v31 = vadd.f32 %v7833_v39, %v10644_v23  ;;  %v5439_v17 = vpop.f32.mrb[21].mxu0 }
 0x49d   : > { %6150 = vst.msk [vmem:[%s8744_s1 + $0x40] sm:$0xf] %vm6133_vm7, %v6936_v32  ;;  %v6937_v51 = vpack.c.bf16 %v5830_v14, %v5830_v14  ;;  %v7898_v37 = vadd.f32 %v5439_v17, %v10646_v20  ;;  %v7834_v8 = vpop.f32.mrb[22].mxu0 }
 0x49e   : > { %6153 = vst.msk [vmem:[%s8744_s1 + $0x4c] sm:$0xf] %vm6133_vm7, %v6939_v41  ;;  %v5771_v30 = vadd.f32 %v7897_v31, %v10663_v1  ;;  %v7899_v42 = vadd.f32 %v7834_v8, %v10648_v16  ;;  %v5442_v0 = vpop.f32.mrb[23].mxu0 }
 0x49f   : > { %6151 = vst.msk [vmem:[%s8744_s1 + $0x44] sm:$0xf] %vm6133_vm7, %v6937_v51  ;;  %v5769_v23 = vadd.f32 %v7898_v37, %v10663_v1  ;;  %v7900_v5 = vadd.f32 %v5442_v0, %v10650_v49 }
 0x4a0   : > { %v5835_v48 = vmax.f32 %v5771_v30, 0.0  ;;  %v5772_v57 = vadd.f32 %v7899_v42, %v10663_v1 }
 0x4a1   : > { %v5833_v20 = vmax.f32 %v5769_v23, 0.0  ;;  %v5770_v40 = vadd.f32 %v7900_v5, %v10663_v1 }
 0x4a2   : > { %v6942_v34 = vpack.c.bf16 %v5835_v48, %v5835_v48  ;;  %v5836_v63 = vmax.f32 %v5772_v57, 0.0 }
 0x4a3   : > { %v6940_v52 = vpack.c.bf16 %v5833_v20, %v5833_v20  ;;  %v5834_v16 = vmax.f32 %v5770_v40, 0.0  ;;  %v7837_v50 = vpop.f32.mrb[24].mxu0 }
 0x4a4   : > { %6156 = vst.msk [vmem:[%s8744_s1 + $0x58] sm:$0xf] %vm6133_vm7, %v6942_v34  ;;  %v6943_v13 = vpack.c.bf16 %v5836_v63, %v5836_v63  ;;  %v7901_v59 = vadd.f32 %v7837_v50, %v10652_v12  ;;  %v5455_v4 = vpop.f32.mrb[25].mxu0 }
 0x4a5   : > { %6154 = vst.msk [vmem:[%s8744_s1 + $0x50] sm:$0xf] %vm6133_vm7, %v6940_v52  ;;  %v6941_v49 = vpack.c.bf16 %v5834_v16, %v5834_v16  ;;  %v7902_v26 = vadd.f32 %v5455_v4, %v10654_v25  ;;  %v7838_v53 = vpop.f32.mrb[26].mxu0 }
 0x4a6   : > { %6157 = vst.msk [vmem:[%s8744_s1 + $0x5c] sm:$0xf] %vm6133_vm7, %v6943_v13  ;;  %v5775_v55 = vadd.f32 %v7901_v59, %v10663_v1  ;;  %v7903_v60 = vadd.f32 %v7838_v53, %v10656_v6  ;;  %v5458_v9 = vpop.f32.mrb[27].mxu0 }
 0x4a7   : > { %6155 = vst.msk [vmem:[%s8744_s1 + $0x54] sm:$0xf] %vm6133_vm7, %v6941_v49  ;;  %v5773_v12 = vadd.f32 %v7902_v26, %v10663_v1  ;;  %v7904_v58 = vadd.f32 %v5458_v9, %v10658_v18 }
 0x4a8   : > { %v5839_v3 = vmax.f32 %v5775_v55, 0.0  ;;  %v5776_v27 = vadd.f32 %v7903_v60, %v10663_v1 }
 0x4a9   : > { %v5837_v25 = vmax.f32 %v5773_v12, 0.0  ;;  %v5774_v7 = vadd.f32 %v7904_v58, %v10663_v1 }
 0x4aa   : > { %v6946_v29 = vpack.c.bf16 %v5839_v3, %v5839_v3  ;;  %v5840_v38 = vmax.f32 %v5776_v27, 0.0 }
 0x4ab   : > { %v6944_v2 = vpack.c.bf16 %v5837_v25, %v5837_v25  ;;  %v5838_v6 = vmax.f32 %v5774_v7, 0.0  ;;  %v7841_v47 = vpop.f32.mrb[28].mxu0 }
 0x4ac   : > { %6160 = vst.msk [vmem:[%s8744_s1 + $0x68] sm:$0xf] %vm6133_vm7, %v6946_v29  ;;  %v6947_v36 = vpack.c.bf16 %v5840_v38, %v5840_v38  ;;  %v7905_v62 = vadd.f32 %v7841_v47, %v10665_v22  ;;  %v5471_v46 = vpop.f32.mrb[29].mxu0 }
 0x4ad   : > { %6158 = vst.msk [vmem:[%s8744_s1 + $0x60] sm:$0xf] %vm6133_vm7, %v6944_v2  ;;  %v6945_v18 = vpack.c.bf16 %v5838_v6, %v5838_v6  ;;  %v7906_v21 = vadd.f32 %v5471_v46, %v10667_v33  ;;  %v7842_v35 = vpop.f32.mrb[30].mxu0 }
 0x4ae   : > { %6161 = vst.msk [vmem:[%s8744_s1 + $0x6c] sm:$0xf] %vm6133_vm7, %v6947_v36  ;;  %v5779_v44 = vadd.f32 %v7905_v62, %v10663_v1  ;;  %v7907_v43 = vadd.f32 %v7842_v35, %v10669_v54  ;;  %v5474_v11 = vpop.f32.mrb[31].mxu0 }
 0x4af   : > { %6159 = vst.msk [vmem:[%s8744_s1 + $0x64] sm:$0xf] %vm6133_vm7, %v6945_v18  ;;  %v5777_v22 = vadd.f32 %v7906_v21, %v10663_v1  ;;  %v7908_v61 = vadd.f32 %v5474_v11, %v10672_v15 }
 0x4b0   : > { %v5843_v45 = vmax.f32 %v5779_v44, 0.0  ;;  %v5780_v33 = vadd.f32 %v7907_v43, %v10663_v1 }
 0x4b1   : > { %v5841_v24 = vmax.f32 %v5777_v22, 0.0  ;;  %v5778_v10 = vadd.f32 %v7908_v61, %v10663_v1 }
 0x4b2   : > { %v6950_v56 = vpack.c.bf16 %v5843_v45, %v5843_v45  ;;  %v5844_v28 = vmax.f32 %v5780_v33, 0.0 }
 0x4b3   : > { %v6948_v19 = vpack.c.bf16 %v5841_v24, %v5841_v24  ;;  %v5842_v54 = vmax.f32 %v5778_v10, 0.0  ;;  %v7845_v32 = vpop.f32.mrb[32].mxu0 }
 0x4b4   : > { %6164 = vst.msk [vmem:[%s8744_s1 + $0x78] sm:$0xf] %vm6133_vm7, %v6950_v56  ;;  %v6951_v14 = vpack.c.bf16 %v5844_v28, %v5844_v28  ;;  %v5487_v39 = vpop.f32.mrb[33].mxu0 }
 0x4b5   : > { %6162 = vst.msk [vmem:[%s8744_s1 + $0x70] sm:$0xf] %vm6133_vm7, %v6948_v19  ;;  %v6949_v15 = vpack.c.bf16 %v5842_v54, %v5842_v54  ;;  %v7846_v41 = vpop.f32.mrb[34].mxu0 }
 0x4b6   : > { %6165 = vst.msk [vmem:[%s8744_s1 + $0x7c] sm:$0xf] %vm6133_vm7, %v6951_v14  ;;  %v5490_v31 = vpop.f32.mrb[35].mxu0 }
 0x4b7   : > { %6163 = vst.msk [vmem:[%s8744_s1 + $0x74] sm:$0xf] %vm6133_vm7, %v6949_v15 }
 0x4ba   : > { %v7581_v51 = vpop.f32.mrb[32].mxu1 }
 0x4bb   : > { %v7849_v17 = vpop.f32.mrb[36].mxu0  ;;  %v7909_v8 = vadd.f32 %v7845_v32, %v7581_v51  ;;  %v3870_v30 = vpop.f32.mrb[33].mxu1 }
 0x4bc   : > { %v5503_v37 = vpop.f32.mrb[37].mxu0  ;;  %v7910_v0 = vadd.f32 %v5487_v39, %v3870_v30  ;;  %v7582_v23 = vpop.f32.mrb[34].mxu1 }
 0x4bd   : > { %v7850_v42 = vpop.f32.mrb[38].mxu0  ;;  %v5783_v48 = vadd.f32 %v7909_v8, %v10663_v1  ;;  %v7911_v57 = vadd.f32 %v7846_v41, %v7582_v23  ;;  %v3873_v20 = vpop.f32.mrb[35].mxu1 }
 0x4be   : > { %v5506_v5 = vpop.f32.mrb[39].mxu0  ;;  %v5781_v40 = vadd.f32 %v7910_v0, %v10663_v1  ;;  %v7912_v34 = vadd.f32 %v5490_v31, %v3873_v20 }
 0x4bf   : > { %v5847_v63 = vmax.f32 %v5783_v48, 0.0  ;;  %v5784_v52 = vadd.f32 %v7911_v57, %v10663_v1 }
 0x4c0   : > { %v5845_v16 = vmax.f32 %v5781_v40, 0.0  ;;  %v5782_v50 = vadd.f32 %v7912_v34, %v10663_v1 }
 0x4c1   : > { %v6954_v13 = vpack.c.bf16 %v5847_v63, %v5847_v63  ;;  %v5848_v59 = vmax.f32 %v5784_v52, 0.0 }
 0x4c2   : > { %v6952_v49 = vpack.c.bf16 %v5845_v16, %v5845_v16  ;;  %v5846_v26 = vmax.f32 %v5782_v50, 0.0  ;;  %v7585_v53 = vpop.f32.mrb[36].mxu1 }
 0x4c3   : > { %v7853_v4 = vpop.f32.mrb[40].mxu0  ;;  %6168 = vst.msk [vmem:[%s8744_s1 + $0x88] sm:$0xf] %vm6133_vm7, %v6954_v13  ;;  %v6955_v60 = vpack.c.bf16 %v5848_v59, %v5848_v59  ;;  %v7913_v9 = vadd.f32 %v7849_v17, %v7585_v53  ;;  %v3886_v12 = vpop.f32.mrb[37].mxu1 }
 0x4c4   : > { %v5519_v55 = vpop.f32.mrb[41].mxu0  ;;  %6166 = vst.msk [vmem:[%s8744_s1 + $0x80] sm:$0xf] %vm6133_vm7, %v6952_v49  ;;  %v6953_v3 = vpack.c.bf16 %v5846_v26, %v5846_v26  ;;  %v7914_v27 = vadd.f32 %v5503_v37, %v3886_v12  ;;  %v7586_v25 = vpop.f32.mrb[38].mxu1 }
 0x4c5   : > { %v7854_v58 = vpop.f32.mrb[42].mxu0  ;;  %6169 = vst.msk [vmem:[%s8744_s1 + $0x8c] sm:$0xf] %vm6133_vm7, %v6955_v60  ;;  %v5787_v29 = vadd.f32 %v7913_v9, %v10663_v1  ;;  %v7915_v38 = vadd.f32 %v7850_v42, %v7586_v25  ;;  %v3889_v2 = vpop.f32.mrb[39].mxu1 }
 0x4c6   : > { %v5522_v7 = vpop.f32.mrb[43].mxu0  ;;  %6167 = vst.msk [vmem:[%s8744_s1 + $0x84] sm:$0xf] %vm6133_vm7, %v6953_v3  ;;  %v5785_v6 = vadd.f32 %v7914_v27, %v10663_v1  ;;  %v7916_v47 = vadd.f32 %v5506_v5, %v3889_v2 }
 0x4c7   : > { %v5851_v36 = vmax.f32 %v5787_v29, 0.0  ;;  %v5788_v62 = vadd.f32 %v7915_v38, %v10663_v1 }
 0x4c8   : > { %v5849_v46 = vmax.f32 %v5785_v6, 0.0  ;;  %v5786_v18 = vadd.f32 %v7916_v47, %v10663_v1 }
 0x4c9   : > { %v6958_v21 = vpack.c.bf16 %v5851_v36, %v5851_v36  ;;  %v5852_v35 = vmax.f32 %v5788_v62, 0.0 }
 0x4ca   : > { %v6956_v43 = vpack.c.bf16 %v5849_v46, %v5849_v46  ;;  %v5850_v11 = vmax.f32 %v5786_v18, 0.0  ;;  %v7589_v22 = vpop.f32.mrb[40].mxu1 }
 0x4cb   : > { %v7857_v44 = vpop.f32.mrb[44].mxu0  ;;  %6172 = vst.msk [vmem:[%s8744_s1 + $0x98] sm:$0xf] %vm6133_vm7, %v6958_v21  ;;  %v6959_v45 = vpack.c.bf16 %v5852_v35, %v5852_v35  ;;  %v7917_v33 = vadd.f32 %v7853_v4, %v7589_v22  ;;  %v3902_v24 = vpop.f32.mrb[41].mxu1 }
 0x4cc   : > { %v5535_v61 = vpop.f32.mrb[45].mxu0  ;;  %6170 = vst.msk [vmem:[%s8744_s1 + $0x90] sm:$0xf] %vm6133_vm7, %v6956_v43  ;;  %v6957_v56 = vpack.c.bf16 %v5850_v11, %v5850_v11  ;;  %v7918_v28 = vadd.f32 %v5519_v55, %v3902_v24  ;;  %v7590_v19 = vpop.f32.mrb[42].mxu1 }
 0x4cd   : > { %v7858_v10 = vpop.f32.mrb[46].mxu0  ;;  %6173 = vst.msk [vmem:[%s8744_s1 + $0x9c] sm:$0xf] %vm6133_vm7, %v6959_v45  ;;  %v5791_v32 = vadd.f32 %v7917_v33, %v10663_v1  ;;  %v7919_v14 = vadd.f32 %v7854_v58, %v7590_v19  ;;  %v3905_v39 = vpop.f32.mrb[43].mxu1 }
 0x4ce   : > { %v5538_v54 = vpop.f32.mrb[47].mxu0  ;;  %6171 = vst.msk [vmem:[%s8744_s1 + $0x94] sm:$0xf] %vm6133_vm7, %v6957_v56  ;;  %v5789_v15 = vadd.f32 %v7918_v28, %v10663_v1  ;;  %v7920_v41 = vadd.f32 %v5522_v7, %v3905_v39 }
 0x4cf   : > { %v5855_v31 = vmax.f32 %v5791_v32, 0.0  ;;  %v5792_v17 = vadd.f32 %v7919_v14, %v10663_v1 }
 0x4d0   : > { %v5853_v51 = vmax.f32 %v5789_v15, 0.0  ;;  %v5790_v37 = vadd.f32 %v7920_v41, %v10663_v1 }
 0x4d1   : > { %v6962_v8 = vpack.c.bf16 %v5855_v31, %v5855_v31  ;;  %v5856_v30 = vmax.f32 %v5792_v17, 0.0 }
 0x4d2   : > { %v6960_v0 = vpack.c.bf16 %v5853_v51, %v5853_v51  ;;  %v5854_v23 = vmax.f32 %v5790_v37, 0.0  ;;  %v7593_v5 = vpop.f32.mrb[44].mxu1 }
 0x4d3   : > { %v7861_v42 = vpop.f32.mrb[48].mxu0  ;;  %6176 = vst.msk [vmem:[%s8744_s1 + $0xa8] sm:$0xf] %vm6133_vm7, %v6962_v8  ;;  %v6963_v57 = vpack.c.bf16 %v5856_v30, %v5856_v30  ;;  %v7921_v20 = vadd.f32 %v7857_v44, %v7593_v5  ;;  %v3918_v40 = vpop.f32.mrb[45].mxu1 }
 0x4d4   : > { %v5551_v48 = vpop.f32.mrb[49].mxu0  ;;  %6174 = vst.msk [vmem:[%s8744_s1 + $0xa0] sm:$0xf] %vm6133_vm7, %v6960_v0  ;;  %v6961_v63 = vpack.c.bf16 %v5854_v23, %v5854_v23  ;;  %v7922_v52 = vadd.f32 %v5535_v61, %v3918_v40  ;;  %v7594_v16 = vpop.f32.mrb[46].mxu1 }
 0x4d5   : > { %v7862_v34 = vpop.f32.mrb[50].mxu0  ;;  %6177 = vst.msk [vmem:[%s8744_s1 + $0xac] sm:$0xf] %vm6133_vm7, %v6963_v57  ;;  %v5795_v13 = vadd.f32 %v7921_v20, %v10663_v1  ;;  %v7923_v59 = vadd.f32 %v7858_v10, %v7594_v16  ;;  %v3921_v4 = vpop.f32.mrb[47].mxu1 }
 0x4d6   : > { %v5554_v50 = vpop.f32.mrb[51].mxu0  ;;  %6175 = vst.msk [vmem:[%s8744_s1 + $0xa4] sm:$0xf] %vm6133_vm7, %v6961_v63  ;;  %v5793_v49 = vadd.f32 %v7922_v52, %v10663_v1  ;;  %v7924_v26 = vadd.f32 %v5538_v54, %v3921_v4 }
 0x4d7   : > { %v5859_v53 = vmax.f32 %v5795_v13, 0.0  ;;  %v5796_v55 = vadd.f32 %v7923_v59, %v10663_v1 }
 0x4d8   : > { %v5857_v60 = vmax.f32 %v5793_v49, 0.0  ;;  %v5794_v9 = vadd.f32 %v7924_v26, %v10663_v1 }
 0x4d9   : > { %v6966_v12 = vpack.c.bf16 %v5859_v53, %v5859_v53  ;;  %v5860_v58 = vmax.f32 %v5796_v55, 0.0 }
 0x4da   : > { %v6964_v27 = vpack.c.bf16 %v5857_v60, %v5857_v60  ;;  %v5858_v25 = vmax.f32 %v5794_v9, 0.0  ;;  %v7597_v7 = vpop.f32.mrb[48].mxu1 }
 0x4db   : > { %v7865_v3 = vpop.f32.mrb[52].mxu0  ;;  %6180 = vst.msk [vmem:[%s8744_s1 + $0xb8] sm:$0xf] %vm6133_vm7, %v6966_v12  ;;  %v6967_v38 = vpack.c.bf16 %v5860_v58, %v5860_v58  ;;  %v7925_v2 = vadd.f32 %v7861_v42, %v7597_v7  ;;  %v3934_v6 = vpop.f32.mrb[49].mxu1 }
 0x4dc   : > { %v5567_v29 = vpop.f32.mrb[53].mxu0  ;;  %6178 = vst.msk [vmem:[%s8744_s1 + $0xb0] sm:$0xf] %vm6133_vm7, %v6964_v27  ;;  %v6965_v36 = vpack.c.bf16 %v5858_v25, %v5858_v25  ;;  %v7926_v62 = vadd.f32 %v5551_v48, %v3934_v6  ;;  %v7598_v46 = vpop.f32.mrb[50].mxu1 }
 0x4dd   : > { %v7866_v47 = vpop.f32.mrb[54].mxu0  ;;  %6181 = vst.msk [vmem:[%s8744_s1 + $0xbc] sm:$0xf] %vm6133_vm7, %v6967_v38  ;;  %v5799_v21 = vadd.f32 %v7925_v2, %v10663_v1  ;;  %v7927_v35 = vadd.f32 %v7862_v34, %v7598_v46  ;;  %v3937_v44 = vpop.f32.mrb[51].mxu1 }
 0x4de   : > { %v5570_v18 = vpop.f32.mrb[55].mxu0  ;;  %6179 = vst.msk [vmem:[%s8744_s1 + $0xb4] sm:$0xf] %vm6133_vm7, %v6965_v36  ;;  %v5797_v43 = vadd.f32 %v7926_v62, %v10663_v1  ;;  %v7928_v11 = vadd.f32 %v5554_v50, %v3937_v44 }
 0x4df   : > { %v5863_v22 = vmax.f32 %v5799_v21, 0.0  ;;  %v5800_v61 = vadd.f32 %v7927_v35, %v10663_v1 }
 0x4e0   : > { %v5861_v45 = vmax.f32 %v5797_v43, 0.0  ;;  %v5798_v33 = vadd.f32 %v7928_v11, %v10663_v1 }
 0x4e1   : > { %v6970_v24 = vpack.c.bf16 %v5863_v22, %v5863_v22  ;;  %v5864_v10 = vmax.f32 %v5800_v61, 0.0 }
 0x4e2   : > { %v6968_v28 = vpack.c.bf16 %v5861_v45, %v5861_v45  ;;  %v5862_v19 = vmax.f32 %v5798_v33, 0.0  ;;  %v7601_v54 = vpop.f32.mrb[52].mxu1 }
 0x4e3   : > { %v7869_v56 = vpop.f32.mrb[56].mxu0  ;;  %6184 = vst.msk [vmem:[%s8744_s1 + $0xc8] sm:$0xf] %vm6133_vm7, %v6970_v24  ;;  %v6971_v14 = vpack.c.bf16 %v5864_v10, %v5864_v10  ;;  %v7929_v39 = vadd.f32 %v7865_v3, %v7601_v54  ;;  %v3950_v15 = vpop.f32.mrb[53].mxu1 }
 0x4e4   : > { %v5583_v32 = vpop.f32.mrb[57].mxu0  ;;  %6182 = vst.msk [vmem:[%s8744_s1 + $0xc0] sm:$0xf] %vm6133_vm7, %v6968_v28  ;;  %v6969_v31 = vpack.c.bf16 %v5862_v19, %v5862_v19  ;;  %v7930_v17 = vadd.f32 %v5567_v29, %v3950_v15  ;;  %v7602_v51 = vpop.f32.mrb[54].mxu1 }
 0x4e5   : > { %v7870_v41 = vpop.f32.mrb[58].mxu0  ;;  %6185 = vst.msk [vmem:[%s8744_s1 + $0xcc] sm:$0xf] %vm6133_vm7, %v6971_v14  ;;  %v5803_v8 = vadd.f32 %v7929_v39, %v10663_v1  ;;  %v7931_v30 = vadd.f32 %v7866_v47, %v7602_v51  ;;  %v3953_v42 = vpop.f32.mrb[55].mxu1 }
 0x4e6   : > { %v5586_v37 = vpop.f32.mrb[59].mxu0  ;;  %6183 = vst.msk [vmem:[%s8744_s1 + $0xc4] sm:$0xf] %vm6133_vm7, %v6969_v31  ;;  %v5801_v0 = vadd.f32 %v7930_v17, %v10663_v1  ;;  %v7932_v23 = vadd.f32 %v5570_v18, %v3953_v42 }
 0x4e7   : > { %v5867_v5 = vmax.f32 %v5803_v8, 0.0  ;;  %v5804_v48 = vadd.f32 %v7931_v30, %v10663_v1 }
 0x4e8   : > { %v5865_v57 = vmax.f32 %v5801_v0, 0.0  ;;  %v5802_v20 = vadd.f32 %v7932_v23, %v10663_v1 }
 0x4e9   : > { %v6974_v40 = vpack.c.bf16 %v5867_v5, %v5867_v5  ;;  %v5868_v34 = vmax.f32 %v5804_v48, 0.0 }
 0x4ea   : > { %v6972_v52 = vpack.c.bf16 %v5865_v57, %v5865_v57  ;;  %v5866_v16 = vmax.f32 %v5802_v20, 0.0  ;;  %v7605_v50 = vpop.f32.mrb[56].mxu1 }
 0x4eb   : > { %v7873_v63 = vpop.f32.mrb[60].mxu0  ;;  %6188 = vst.msk [vmem:[%s8744_s1 + $0xd8] sm:$0xf] %vm6133_vm7, %v6974_v40  ;;  %v6975_v59 = vpack.c.bf16 %v5868_v34, %v5868_v34  ;;  %v7933_v4 = vadd.f32 %v7869_v56, %v7605_v50  ;;  %v3966_v49 = vpop.f32.mrb[57].mxu1 }
 0x4ec   : > { %v5599_v13 = vpop.f32.mrb[61].mxu0  ;;  %6186 = vst.msk [vmem:[%s8744_s1 + $0xd0] sm:$0xf] %vm6133_vm7, %v6972_v52  ;;  %v6973_v53 = vpack.c.bf16 %v5866_v16, %v5866_v16  ;;  %v7934_v55 = vadd.f32 %v5583_v32, %v3966_v49  ;;  %v7606_v60 = vpop.f32.mrb[58].mxu1 }
 0x4ed   : > { %v7874_v26 = vpop.f32.mrb[62].mxu0  ;;  %6189 = vst.msk [vmem:[%s8744_s1 + $0xdc] sm:$0xf] %vm6133_vm7, %v6975_v59  ;;  %v5807_v12 = vadd.f32 %v7933_v4, %v10663_v1  ;;  %v7935_v58 = vadd.f32 %v7870_v41, %v7606_v60  ;;  %v3969_v3 = vpop.f32.mrb[59].mxu1 }
 0x4ee   : > { %v5602_v9 = vpop.f32.mrb[63].mxu0  ;;  %6187 = vst.msk [vmem:[%s8744_s1 + $0xd4] sm:$0xf] %vm6133_vm7, %v6973_v53  ;;  %v5805_v27 = vadd.f32 %v7934_v55, %v10663_v1  ;;  %v7936_v25 = vadd.f32 %v5586_v37, %v3969_v3 }
 0x4ef   : > { %v5871_v7 = vmax.f32 %v5807_v12, 0.0  ;;  %v5808_v29 = vadd.f32 %v7935_v58, %v10663_v1 }
 0x4f0   : > { %v5869_v38 = vmax.f32 %v5805_v27, 0.0  ;;  %v5806_v2 = vadd.f32 %v7936_v25, %v10663_v1 }
 0x4f1   : > { %v6978_v6 = vpack.c.bf16 %v5871_v7, %v5871_v7  ;;  %v5872_v47 = vmax.f32 %v5808_v29, 0.0 }
 0x4f2   : > { %v6976_v36 = vpack.c.bf16 %v5869_v38, %v5869_v38  ;;  %v5870_v62 = vmax.f32 %v5806_v2, 0.0  ;;  %v7609_v46 = vpop.f32.mrb[60].mxu1 }
 0x4f3   : > { %6192 = vst.msk [vmem:[%s8744_s1 + $0xe8] sm:$0xf] %vm6133_vm7, %v6978_v6  ;;  %v6979_v18 = vpack.c.bf16 %v5872_v47, %v5872_v47  ;;  %v7937_v21 = vadd.f32 %v7873_v63, %v7609_v46  ;;  %v3982_v35 = vpop.f32.mrb[61].mxu1 }
 0x4f4   : > { %6190 = vst.msk [vmem:[%s8744_s1 + $0xe0] sm:$0xf] %vm6133_vm7, %v6976_v36  ;;  %v6977_v44 = vpack.c.bf16 %v5870_v62, %v5870_v62  ;;  %v7938_v43 = vadd.f32 %v5599_v13, %v3982_v35  ;;  %v7610_v11 = vpop.f32.mrb[62].mxu1 }
 0x4f5   : > { %6193 = vst.msk [vmem:[%s8744_s1 + $0xec] sm:$0xf] %vm6133_vm7, %v6979_v18  ;;  %v5811_v22 = vadd.f32 %v7937_v21, %v10663_v1  ;;  %v7939_v61 = vadd.f32 %v7874_v26, %v7610_v11  ;;  %v3985_v45 = vpop.f32.mrb[63].mxu1 }
 0x4f6   : > { %6191 = vst.msk [vmem:[%s8744_s1 + $0xe4] sm:$0xf] %vm6133_vm7, %v6977_v44  ;;  %v5809_v33 = vadd.f32 %v7938_v43, %v10663_v1  ;;  %v7940_v24 = vadd.f32 %v5602_v9, %v3985_v45 }
 0x4f7   : > { %v5875_v10 = vmax.f32 %v5811_v22, 0.0  ;;  %v5812_v56 = vadd.f32 %v7939_v61, %v10663_v1 }
 0x4f8   : > { %v5873_v28 = vmax.f32 %v5809_v33, 0.0  ;;  %v5810_v19 = vadd.f32 %v7940_v24, %v10663_v1 }
 0x4f9   : > { %v6982_v54 = vpack.c.bf16 %v5875_v10, %v5875_v10  ;;  %v5876_v32 = vmax.f32 %v5812_v56, 0.0 }
 0x4fa   : > { %v6980_v14 = vpack.c.bf16 %v5873_v28, %v5873_v28  ;;  %v5874_v39 = vmax.f32 %v5810_v19, 0.0 }
 0x4fb   : > { %6196 = vst.msk [vmem:[%s8744_s1 + $0xf8] sm:$0xf] %vm6133_vm7, %v6982_v54  ;;  %v6983_v15 = vpack.c.bf16 %v5876_v32, %v5876_v32 }
 0x4fc   : > { %6194 = vst.msk [vmem:[%s8744_s1 + $0xf0] sm:$0xf] %vm6133_vm7, %v6980_v14  ;;  %v6981_v41 = vpack.c.bf16 %v5874_v39, %v5874_v39 }
 0x4fd   : > { %6197 = vst.msk [vmem:[%s8744_s1 + $0xfc] sm:$0xf] %vm6133_vm7, %v6983_v15 }
 0x4fe   : > { %6195 = vst.msk [vmem:[%s8744_s1 + $0xf4] sm:$0xf] %vm6133_vm7, %v6981_v41 }
 0x4ff PF: > { %s18_s9 = sadd.s32 1, %s8556_s9   ;;  %s11481_s27 = smov %s8548_s29 }
 0x500   : > { %p15_p0 = scmp.ge.s32.totalorder %s18_s9, 6   ;;  %s11482_s28 = smov %s8552_s30 }
 0x501   : > { %s11483_s29 = smov %s11486_s10  ;;  %s11484_s30 = smov %s11490_s11 }
 0x502   :  { %17 = sbr.rel (!%p15_p0) target bundleno = 3 (0x3), region = 124 }

</bundles_post_ra>
